<compile_context>
chip_gen: v7x
topology: tpu7x:2x2x1
jax: 0.10.0
libtpu: 0.0.40
codegen_flags: <defaults>
</compile_context>

<pallas_src>
import functools

import jax
import jax.numpy as jnp
from jax import lax
from jax.experimental import pallas as pl
from jax.experimental.pallas import tpu as pltpu

LANE = 128
# Recompute-vs-stash crossover is ~Cin 110 (v5e), ~140 (v7x), ~290 (v6e);
# use a conservative single threshold, overridable via stash_y=.
_STASH_MIN_CIN = 192


# ---------------------------------------------------------------------------
# Hardware / tiling helpers.
# ---------------------------------------------------------------------------
def _vmem_capacity_bytes():
    """Physical per-core VMEM (128 MiB v5e/v6e, 64 MiB v7x); safe fallback."""
    try:
        info = pltpu.get_tpu_info()
        cap = getattr(info, "vmem_capacity_bytes", None)
        if cap:
            return int(cap)
    except Exception:
        pass
    return 64 * 1024 * 1024  # conservative: v7x per-TensorCore VMEM


def _pick_row_tile(H, W, Cin, coutp, cstore, cbytes, budget_bytes):
    """Largest divisor of H (preferring multiples of 8) whose per-step VMEM
    footprint (resident image + weights + transients + output blocks) fits."""
    f32 = 4

    def footprint(th):
        resident = (H + 2) * (W + 2) * Cin * cbytes      # padded image (1 buffer)
        resident += 9 * Cin * coutp * cbytes             # weights (1 buffer)
        out_blk = 2 * th * W * cstore * f32              # double-buffered output
        rows = (th + 2) * (W + 2) * Cin * cbytes         # row-window copy
        patch = 2 * th * W * 9 * Cin * cbytes            # im2col concat transient
        acc = th * W * coutp * f32                       # f32 accumulator
        return resident + out_blk + rows + patch + acc

    divs = [d for d in range(1, H + 1) if H % d == 0]
    fit8 = [d for d in divs if d % 8 == 0 and footprint(d) <= budget_bytes]
    if fit8:
        return max(fit8)
    fit = [d for d in divs if footprint(d) <= budget_bytes]
    if fit:
        return max(fit)
    return min(divs)


def _spec(shape, index_map, single_buffer):
    """BlockSpec; single-buffered when the block is (nearly) grid-constant."""
    if single_buffer:
        return pl.BlockSpec(shape, index_map, pipeline_mode=pl.Buffered(1))
    return pl.BlockSpec(shape, index_map)


# ---------------------------------------------------------------------------
# Shared conv tile: 3x3 / stride 1 conv on TH output rows.
# ---------------------------------------------------------------------------
def _conv_tile(x_ref, w_ref, *, TH, W, Cin, merge):
    """x_ref: (1, H+2, W+2, Cin) zero-padded image (compute dtype, resident).
       w_ref: (9*Cin, coutp) weights (compute dtype, read once).
       Returns f32 (TH*W, coutp)."""
    h = pl.program_id(1)
    row0 = h * TH
    if TH % 8 == 0:
        row0 = pl.multiple_of(row0, 8)
    xt = x_ref[0, pl.ds(row0, TH + 2), :, :]          # (TH+2, W+2, Cin)
    w_all = w_ref[...]
    coutp = w_all.shape[-1]

    def tap(dy, dx):
        return xt[dy:dy + TH, dx:dx + W, :].reshape(TH * W, Cin)

    if merge:
        # Lane-friendly Cin: one merged (TH*W, 9*Cin) x (9*Cin, coutp) matmul.
        patch = jnp.concatenate(
            [tap(dy, dx) for dy in range(3) for dx in range(3)], axis=-1)
        return jnp.dot(patch, w_all, preferred_element_type=jnp.float32)

    # Small / non-lane-aligned Cin: skip the concat (lane-relayout heavy) and
    # accumulate the 9 per-tap matmuls directly in f32.
    acc = jnp.zeros((TH * W, coutp), jnp.float32)
    t = 0
    for dy in range(3):
        for dx in range(3):
            acc = acc + jnp.dot(tap(dy, dx), w_all[t * Cin:(t + 1) * Cin, :],
                                preferred_element_type=jnp.float32)
            t += 1
    return acc


# ---------------------------------------------------------------------------
# Kernels.
# ---------------------------------------------------------------------------
def _conv_stats_kernel(x_ref, w_ref, sum_ref, ssq_ref, *, TH, W, Cin, merge):
    acc = _conv_tile(x_ref, w_ref, TH=TH, W=W, Cin=Cin, merge=merge)
    coutp = acc.shape[-1]
    sum_ref[...] = acc.sum(axis=0, keepdims=True).reshape(1, 1, 1, coutp)
    ssq_ref[...] = (acc * acc).sum(axis=0, keepdims=True).reshape(1, 1, 1, coutp)


def _conv_stats_stash_kernel(x_ref, w_ref, y_ref, sum_ref, ssq_ref, *,
                             TH, W, Cin, Cstore, merge):
    acc = _conv_tile(x_ref, w_ref, TH=TH, W=W, Cin=Cin, merge=merge)
    coutp = acc.shape[-1]
    sum_ref[...] = acc.sum(axis=0, keepdims=True).reshape(1, 1, 1, coutp)
    ssq_ref[...] = (acc * acc).sum(axis=0, keepdims=True).reshape(1, 1, 1, coutp)
    y_ref[...] = acc[:, :Cstore].reshape(1, TH, W, Cstore).astype(y_ref.dtype)


def _conv_bn_lrelu_kernel(x_ref, w_ref, shift_ref, o_ref, *,
                          TH, W, Cin, Cstore, merge, slope):
    acc = _conv_tile(x_ref, w_ref, TH=TH, W=W, Cin=Cin, merge=merge)
    z = acc[:, :Cstore] + shift_ref[...]          # BN scale folded into W
    z = jnp.where(z > 0, z, slope * z)            # LeakyReLU
    o_ref[...] = z.reshape(1, TH, W, Cstore).astype(o_ref.dtype)


def _bn_lrelu_kernel(y_ref, scale_ref, shift_ref, o_ref, *, slope):
    z = y_ref[...].astype(jnp.float32) * scale_ref[...] + shift_ref[...]
    z = jnp.where(z > 0, z, slope * z)
    o_ref[...] = z.astype(o_ref.dtype)


# ---------------------------------------------------------------------------
# Wrapper.
# ---------------------------------------------------------------------------
def _forward_impl(x_nchw, w_hwio, gamma, beta, *, eps, slope, compute_dtype,
                  stash_y, out_layout, single_buffer):
    N, Cin, H, W = x_nchw.shape
    Cout = w_hwio.shape[3]
    coutp = ((Cout + LANE - 1) // LANE) * LANE         # MXU lane-padded channels
    # Small Cout: store the true channel count (avoids up-to-16x HBM write
    # amplification + the wrapper slice pass); Cout>=64 keeps the dense store.
    cstore = coutp if Cout >= 64 else Cout
    merge = Cin >= 64 or Cin % LANE == 0
    if stash_y is None:
        stash_y = Cin >= _STASH_MIN_CIN

    cbytes = jnp.dtype(compute_dtype).itemsize
    f32 = 4

    # NHWC, compute dtype, zero halo for the 3x3 / s1 / p1 conv.
    x = jnp.transpose(x_nchw, (0, 2, 3, 1)).astype(compute_dtype)
    x_pad = jnp.pad(x, ((0, 0), (1, 1), (1, 1), (0, 0)))
    # TODO(synk): halo-tiled (TH+2-row) input blocks with in-kernel zero padding,
    # so frames too large for VMEM (e.g. 224x224x256 on v7x) and batch-1 megacore
    # splits do not need the whole padded image resident / re-DMA'd per core.

    w2 = jnp.pad(w_hwio.astype(jnp.float32).reshape(9 * Cin, Cout),
                 ((0, 0), (0, coutp - Cout)))
    w_c = w2.astype(compute_dtype)
    gamma_p = jnp.pad(gamma.astype(jnp.float32), (0, coutp - Cout))
    beta_p = jnp.pad(beta.astype(jnp.float32), (0, coutp - Cout))

    # Generation-aware VMEM request (~48 MiB on v7x, ~96 MiB on v5e/v6e) with
    # headroom for compiler temporaries; tile budget derived from it.
    vmem_cap = _vmem_capacity_bytes()
    vmem_limit = max(32 * 1024 * 1024,
                     min(int(0.75 * vmem_cap), 100 * 1024 * 1024))
    TH = _pick_row_tile(H, W, Cin, coutp, cstore, cbytes, int(0.8 * vmem_limit))
    n_h = H // TH
    grid = (N, n_h)

    cp = pltpu.CompilerParams(
        dimension_semantics=("parallel", "parallel"),   # megacore-shardable
        vmem_limit_bytes=vmem_limit)

    # Resident blocks: image changes only with n, weights never.
    x_spec = _spec((1, H + 2, W + 2, Cin), lambda n, h: (n, 0, 0, 0), single_buffer)
    w_spec = _spec((9 * Cin, coutp), lambda n, h: (0, 0), single_buffer)
    stat_spec = pl.BlockSpec((1, 1, 1, coutp), lambda n, h: (n, h, 0, 0))
    tile_spec = pl.BlockSpec((1, TH, W, cstore), lambda n, h: (n, h, 0, 0))

    conv_flops = 2 * N * H * W * 9 * Cin * coutp
    x_bytes = N * (H + 2) * (W + 2) * Cin * cbytes
    w_bytes = 9 * Cin * coutp * cbytes
    stat_bytes = 2 * N * n_h * coutp * f32
    out_bytes = N * H * W * cstore * f32
    stash_bytes = N * H * W * cstore * cbytes

    # ---- Pass 1: conv -> per-(n, row-tile) channel sum / sum-of-squares -------
    if stash_y:
        p1 = pl.pallas_call(
            functools.partial(_conv_stats_stash_kernel, TH=TH, W=W, Cin=Cin,
                              Cstore=cstore, merge=merge),
            grid=grid,
            in_specs=[x_spec, w_spec],
            out_specs=[tile_spec, stat_spec, stat_spec],
            out_shape=[jax.ShapeDtypeStruct((N, H, W, cstore), compute_dtype),
                       jax.ShapeDtypeStruct((N, n_h, 1, coutp), jnp.float32),
                       jax.ShapeDtypeStruct((N, n_h, 1, coutp), jnp.float32)],
            compiler_params=cp,
            cost_estimate=pl.CostEstimate(
                flops=conv_flops, transcendentals=0,
                bytes_accessed=x_bytes + w_bytes + stash_bytes + stat_bytes),
        )
        y_stash, sums, ssqs = p1(x_pad, w_c)
    else:
        p1 = pl.pallas_call(
            functools.partial(_conv_stats_kernel, TH=TH, W=W, Cin=Cin, merge=merge),
            grid=grid,
            in_specs=[x_spec, w_spec],
            out_specs=[stat_spec, stat_spec],
            out_shape=[jax.ShapeDtypeStruct((N, n_h, 1, coutp), jnp.float32),
                       jax.ShapeDtypeStruct((N, n_h, 1, coutp), jnp.float32)],
            compiler_params=cp,
            cost_estimate=pl.CostEstimate(
                flops=conv_flops, transcendentals=0,
                bytes_accessed=x_bytes + w_bytes + stat_bytes),
        )
        sums, ssqs = p1(x_pad, w_c)

    # Training-mode BatchNorm: biased batch stats over (N, H, W).
    m = float(N * H * W)
    mean = sums.sum(axis=(0, 1)).reshape(coutp) / m
    var = jnp.maximum(ssqs.sum(axis=(0, 1)).reshape(coutp) / m - mean * mean, 0.0)
    # TODO(synk): shifted / Welford-style accumulation to avoid E[x^2]-E[x]^2
    # cancellation for strongly biased activations at very large N*H*W.
    scale = gamma_p / jnp.sqrt(var + eps)
    shift = beta_p - mean * scale

    # ---- Pass 2 ----------------------------------------------------------------
    if stash_y:
        # Pure-VPU BN + LeakyReLU over the stashed conv output (no MXU recompute).
        p2 = pl.pallas_call(
            functools.partial(_bn_lrelu_kernel, slope=slope),
            grid=grid,
            in_specs=[tile_spec,
                      _spec((1, 1, 1, cstore), lambda n, h: (0, 0, 0, 0),
                            single_buffer),
                      _spec((1, 1, 1, cstore), lambda n, h: (0, 0, 0, 0),
                            single_buffer)],
            out_specs=tile_spec,
            out_shape=jax.ShapeDtypeStruct((N, H, W, cstore), jnp.float32),
            compiler_params=cp,
            cost_estimate=pl.CostEstimate(
                flops=4 * N * H * W * cstore, transcendentals=0,
                bytes_accessed=stash_bytes + out_bytes),
        )
        out_nhwc = p2(y_stash,
                      scale[:cstore].reshape(1, 1, 1, cstore),
                      shift[:cstore].reshape(1, 1, 1, cstore))
    else:
        # Recompute the conv with BN scale folded into the weights, + shift, LReLU.
        w_folded = (w2 * scale[None, :]).astype(compute_dtype)
        p2 = pl.pallas_call(
            functools.partial(_conv_bn_lrelu_kernel, TH=TH, W=W, Cin=Cin,
                              Cstore=cstore, merge=merge, slope=slope),
            grid=grid,
            in_specs=[x_spec, w_spec,
                      _spec((1, cstore), lambda n, h: (0, 0), single_buffer)],
            out_specs=tile_spec,
            out_shape=jax.ShapeDtypeStruct((N, H, W, cstore), jnp.float32),
            compiler_params=cp,
            cost_estimate=pl.CostEstimate(
                flops=conv_flops + 3 * N * H * W * cstore, transcendentals=0,
                bytes_accessed=x_bytes + w_bytes + out_bytes),
        )
        out_nhwc = p2(x_pad, w_folded, shift[:cstore].reshape(1, cstore))

    if cstore != Cout:
        out_nhwc = out_nhwc[..., :Cout]
    if out_layout == "NHWC":
        return out_nhwc
    return jnp.transpose(out_nhwc, (0, 3, 1, 2))       # back to NCHW


def conv_bn_forward(x_nchw, w_hwio, gamma, beta, *, eps=1e-5, slope=0.01,
                    compute_dtype=jnp.bfloat16, stash_y=None, out_layout="NCHW"):
    kwargs = dict(eps=eps, slope=slope, compute_dtype=compute_dtype,
                  stash_y=stash_y, out_layout=out_layout)
    try:
        return _forward_impl(x_nchw, w_hwio, gamma, beta,
                             single_buffer=True, **kwargs)
    except Exception:
        # Fallback for jax builds that reject BlockSpec(pipeline_mode=Buffered(1))
        # (single-buffered resident image/weight blocks); semantics identical.
        return _forward_impl(x_nchw, w_hwio, gamma, beta,
                             single_buffer=False, **kwargs)


# ---------------------------------------------------------------------------
# Pure-JAX reference (NCHW, mirrors PyTorch training-mode forward).
# ---------------------------------------------------------------------------
def _ref_forward(x_nchw, w_hwio, gamma, beta, *, eps=1e-5, slope=0.01):
    w_oihw = jnp.transpose(w_hwio, (3, 2, 0, 1))
    y = lax.conv_general_dilated(
        x_nchw, w_oihw, window_strides=(1, 1), padding=((1, 1), (1, 1)),
        dimension_numbers=("NCHW", "OIHW", "NCHW"))
    mean = y.mean(axis=(0, 2, 3), keepdims=True)
    var = y.var(axis=(0, 2, 3), keepdims=True)          # biased (ddof=0)
    z = gamma.reshape(1, -1, 1, 1) * (y - mean) / jnp.sqrt(var + eps) \
        + beta.reshape(1, -1, 1, 1)
    return jnp.where(z > 0, z, slope * z)


if __name__ == "__main__":
    N, Cin, H, W, Cout = 2, 4, 16, 16, 8

    key = jax.random.PRNGKey(0)
    kx, kw, kg, kb = jax.random.split(key, 4)
    x = jax.random.normal(kx, (N, Cin, H, W), jnp.float32)
    w = 0.1 * jax.random.normal(kw, (3, 3, Cin, Cout), jnp.float32)
    gamma = 1.0 + 0.1 * jax.random.normal(kg, (Cout,), jnp.float32)
    beta = 0.1 * jax.random.normal(kb, (Cout,), jnp.float32)

    ref = _ref_forward(x, w, gamma, beta)

    # f32 MXU operands, conv recomputed in pass 2 (tight tolerance).
    out = jax.block_until_ready(
        conv_bn_forward(x, w, gamma, beta, compute_dtype=jnp.float32))
    assert out.shape == (N, Cout, H, W)
    assert jnp.allclose(out, ref, atol=2e-3, rtol=2e-3), \
        f"f32 recompute path: max abs err {jnp.max(jnp.abs(out - ref))}"

    # f32, forced y-stash variant (pure-VPU pass 2) — exercises the large-Cin path.
    out_s = jax.block_until_ready(
        conv_bn_forward(x, w, gamma, beta, compute_dtype=jnp.float32, stash_y=True))
    assert jnp.allclose(out_s, ref, atol=2e-3, rtol=2e-3), \
        f"f32 stash path: max abs err {jnp.max(jnp.abs(out_s - ref))}"

    # Default bf16 MXU operands (f32 accumulation) — looser tolerance.
    out_bf = jax.block_until_ready(conv_bn_forward(x, w, gamma, beta))
    assert jnp.allclose(out_bf, ref, atol=5e-2, rtol=5e-2), \
        f"bf16 path: max abs err {jnp.max(jnp.abs(out_bf - ref))}"

    print("KERNEL_OK")
</pallas_src>

<mosaic_0001>
module attributes {stable_mosaic.version = 11 : i64} {
  func.func @_conv_stats_kernel(%arg0: i32, %arg1: i32, %arg2: memref<1x18x18x4xf32, #tpu.memory_space<vmem>>, %arg3: memref<36x128xf32, #tpu.memory_space<vmem>>, %arg4: memref<1x1x1x128xf32, #tpu.memory_space<vmem>>, %arg5: memref<1x1x1x128xf32, #tpu.memory_space<vmem>>) attributes {dimension_semantics = [#tpu.dimension_semantics<parallel>, #tpu.dimension_semantics<parallel>], iteration_bounds = array<i64: 2, 1>, scalar_prefetch = 0 : i64, scratch_operands = 0 : i64, tpu.core_type = #tpu.core_type<tc>, window_params = [{pipeline_mode = #tpu.pipeline_mode<synchronous>, transform_indices = @transform_0, window_bounds = array<i64: 1, 18, 18, 4>}, {pipeline_mode = #tpu.pipeline_mode<synchronous>, transform_indices = @transform_1, window_bounds = array<i64: 36, 128>}, {transform_indices = @transform_2, window_bounds = array<i64: 1, 1, 1, 128>}, {transform_indices = @transform_3, window_bounds = array<i64: 1, 1, 1, 128>}]} {
    %c16_i32 = arith.constant 16 : i32
    %0 = arith.muli %arg1, %c16_i32 : i32
    %1 = tpu.assume_multiple %0, 8 : i32
    %c0 = arith.constant 0 : index
    %2 = arith.index_cast %1 : i32 to index
    %c0_0 = arith.constant 0 : index
    %c0_1 = arith.constant 0 : index
    %3 = vector.load %arg2[%c0, %2, %c0_0, %c0_1] : memref<1x18x18x4xf32, #tpu.memory_space<vmem>>, vector<1x18x18x4xf32>
    %4 = vector.shape_cast %3 : vector<1x18x18x4xf32> to vector<18x18x4xf32>
    %c0_2 = arith.constant 0 : index
    %c0_3 = arith.constant 0 : index
    %5 = vector.load %arg3[%c0_2, %c0_3] : memref<36x128xf32, #tpu.memory_space<vmem>>, vector<36x128xf32>
    %cst = arith.constant 0.000000e+00 : f32
    %6 = vector.broadcast %cst : f32 to vector<256x128xf32>
    %7 = vector.extract_strided_slice %4 {offsets = [0, 0, 0], sizes = [16, 16, 4], strides = [1, 1, 1]} : vector<18x18x4xf32> to vector<16x16x4xf32>
    %8 = vector.shape_cast %7 : vector<16x16x4xf32> to vector<256x4xf32>
    %9 = vector.extract_strided_slice %5 {offsets = [0, 0], sizes = [4, 128], strides = [1, 1]} : vector<36x128xf32> to vector<4x128xf32>
    %cst_4 = arith.constant dense<0.000000e+00> : vector<256x128xf32>
    %10 = tpu.matmul %8, %9, %cst_4 {dimension_numbers = #tpu.dot_dimension_numbers<[1], [0], [0], [1], [0, 0, 1, 1], [], []>} : vector<256x4xf32>, vector<4x128xf32>, vector<256x128xf32> -> vector<256x128xf32>
    %11 = arith.addf %6, %10 : vector<256x128xf32>
    %12 = vector.extract_strided_slice %4 {offsets = [0, 1, 0], sizes = [16, 16, 4], strides = [1, 1, 1]} : vector<18x18x4xf32> to vector<16x16x4xf32>
    %13 = vector.shape_cast %12 : vector<16x16x4xf32> to vector<256x4xf32>
    %14 = vector.extract_strided_slice %5 {offsets = [4, 0], sizes = [4, 128], strides = [1, 1]} : vector<36x128xf32> to vector<4x128xf32>
    %cst_5 = arith.constant dense<0.000000e+00> : vector<256x128xf32>
    %15 = tpu.matmul %13, %14, %cst_5 {dimension_numbers = #tpu.dot_dimension_numbers<[1], [0], [0], [1], [0, 0, 1, 1], [], []>} : vector<256x4xf32>, vector<4x128xf32>, vector<256x128xf32> -> vector<256x128xf32>
    %16 = arith.addf %11, %15 : vector<256x128xf32>
    %17 = vector.extract_strided_slice %4 {offsets = [0, 2, 0], sizes = [16, 16, 4], strides = [1, 1, 1]} : vector<18x18x4xf32> to vector<16x16x4xf32>
    %18 = vector.shape_cast %17 : vector<16x16x4xf32> to vector<256x4xf32>
    %19 = vector.extract_strided_slice %5 {offsets = [8, 0], sizes = [4, 128], strides = [1, 1]} : vector<36x128xf32> to vector<4x128xf32>
    %cst_6 = arith.constant dense<0.000000e+00> : vector<256x128xf32>
    %20 = tpu.matmul %18, %19, %cst_6 {dimension_numbers = #tpu.dot_dimension_numbers<[1], [0], [0], [1], [0, 0, 1, 1], [], []>} : vector<256x4xf32>, vector<4x128xf32>, vector<256x128xf32> -> vector<256x128xf32>
    %21 = arith.addf %16, %20 : vector<256x128xf32>
    %22 = vector.extract_strided_slice %4 {offsets = [1, 0, 0], sizes = [16, 16, 4], strides = [1, 1, 1]} : vector<18x18x4xf32> to vector<16x16x4xf32>
    %23 = vector.shape_cast %22 : vector<16x16x4xf32> to vector<256x4xf32>
    %24 = vector.extract_strided_slice %5 {offsets = [12, 0], sizes = [4, 128], strides = [1, 1]} : vector<36x128xf32> to vector<4x128xf32>
    %cst_7 = arith.constant dense<0.000000e+00> : vector<256x128xf32>
    %25 = tpu.matmul %23, %24, %cst_7 {dimension_numbers = #tpu.dot_dimension_numbers<[1], [0], [0], [1], [0, 0, 1, 1], [], []>} : vector<256x4xf32>, vector<4x128xf32>, vector<256x128xf32> -> vector<256x128xf32>
    %26 = arith.addf %21, %25 : vector<256x128xf32>
    %27 = vector.extract_strided_slice %4 {offsets = [1, 1, 0], sizes = [16, 16, 4], strides = [1, 1, 1]} : vector<18x18x4xf32> to vector<16x16x4xf32>
    %28 = vector.shape_cast %27 : vector<16x16x4xf32> to vector<256x4xf32>
    %29 = vector.extract_strided_slice %5 {offsets = [16, 0], sizes = [4, 128], strides = [1, 1]} : vector<36x128xf32> to vector<4x128xf32>
    %cst_8 = arith.constant dense<0.000000e+00> : vector<256x128xf32>
    %30 = tpu.matmul %28, %29, %cst_8 {dimension_numbers = #tpu.dot_dimension_numbers<[1], [0], [0], [1], [0, 0, 1, 1], [], []>} : vector<256x4xf32>, vector<4x128xf32>, vector<256x128xf32> -> vector<256x128xf32>
    %31 = arith.addf %26, %30 : vector<256x128xf32>
    %32 = vector.extract_strided_slice %4 {offsets = [1, 2, 0], sizes = [16, 16, 4], strides = [1, 1, 1]} : vector<18x18x4xf32> to vector<16x16x4xf32>
    %33 = vector.shape_cast %32 : vector<16x16x4xf32> to vector<256x4xf32>
    %34 = vector.extract_strided_slice %5 {offsets = [20, 0], sizes = [4, 128], strides = [1, 1]} : vector<36x128xf32> to vector<4x128xf32>
    %cst_9 = arith.constant dense<0.000000e+00> : vector<256x128xf32>
    %35 = tpu.matmul %33, %34, %cst_9 {dimension_numbers = #tpu.dot_dimension_numbers<[1], [0], [0], [1], [0, 0, 1, 1], [], []>} : vector<256x4xf32>, vector<4x128xf32>, vector<256x128xf32> -> vector<256x128xf32>
    %36 = arith.addf %31, %35 : vector<256x128xf32>
    %37 = vector.extract_strided_slice %4 {offsets = [2, 0, 0], sizes = [16, 16, 4], strides = [1, 1, 1]} : vector<18x18x4xf32> to vector<16x16x4xf32>
    %38 = vector.shape_cast %37 : vector<16x16x4xf32> to vector<256x4xf32>
    %39 = vector.extract_strided_slice %5 {offsets = [24, 0], sizes = [4, 128], strides = [1, 1]} : vector<36x128xf32> to vector<4x128xf32>
    %cst_10 = arith.constant dense<0.000000e+00> : vector<256x128xf32>
    %40 = tpu.matmul %38, %39, %cst_10 {dimension_numbers = #tpu.dot_dimension_numbers<[1], [0], [0], [1], [0, 0, 1, 1], [], []>} : vector<256x4xf32>, vector<4x128xf32>, vector<256x128xf32> -> vector<256x128xf32>
    %41 = arith.addf %36, %40 : vector<256x128xf32>
    %42 = vector.extract_strided_slice %4 {offsets = [2, 1, 0], sizes = [16, 16, 4], strides = [1, 1, 1]} : vector<18x18x4xf32> to vector<16x16x4xf32>
    %43 = vector.shape_cast %42 : vector<16x16x4xf32> to vector<256x4xf32>
    %44 = vector.extract_strided_slice %5 {offsets = [28, 0], sizes = [4, 128], strides = [1, 1]} : vector<36x128xf32> to vector<4x128xf32>
    %cst_11 = arith.constant dense<0.000000e+00> : vector<256x128xf32>
    %45 = tpu.matmul %43, %44, %cst_11 {dimension_numbers = #tpu.dot_dimension_numbers<[1], [0], [0], [1], [0, 0, 1, 1], [], []>} : vector<256x4xf32>, vector<4x128xf32>, vector<256x128xf32> -> vector<256x128xf32>
    %46 = arith.addf %41, %45 : vector<256x128xf32>
    %47 = vector.extract_strided_slice %4 {offsets = [2, 2, 0], sizes = [16, 16, 4], strides = [1, 1, 1]} : vector<18x18x4xf32> to vector<16x16x4xf32>
    %48 = vector.shape_cast %47 : vector<16x16x4xf32> to vector<256x4xf32>
    %49 = vector.extract_strided_slice %5 {offsets = [32, 0], sizes = [4, 128], strides = [1, 1]} : vector<36x128xf32> to vector<4x128xf32>
    %cst_12 = arith.constant dense<0.000000e+00> : vector<256x128xf32>
    %50 = tpu.matmul %48, %49, %cst_12 {dimension_numbers = #tpu.dot_dimension_numbers<[1], [0], [0], [1], [0, 0, 1, 1], [], []>} : vector<256x4xf32>, vector<4x128xf32>, vector<256x128xf32> -> vector<256x128xf32>
    %51 = arith.addf %46, %50 : vector<256x128xf32>
    %cst_13 = arith.constant dense<0.000000e+00> : vector<128xf32>
    %52 = vector.multi_reduction <add>, %51, %cst_13 [0] : vector<256x128xf32> to vector<128xf32>
    %53 = vector.shape_cast %52 : vector<128xf32> to vector<1x128xf32>
    %54 = vector.shape_cast %53 : vector<1x128xf32> to vector<1x1x1x128xf32>
    %c0_14 = arith.constant 0 : index
    %c0_15 = arith.constant 0 : index
    %c0_16 = arith.constant 0 : index
    %c0_17 = arith.constant 0 : index
    %55 = vector.load %arg4[%c0_14, %c0_15, %c0_16, %c0_17] : memref<1x1x1x128xf32, #tpu.memory_space<vmem>>, vector<1x1x1x128xf32>
    tpu.vector_store %arg4[%c0_14, %c0_15, %c0_16, %c0_17], %54 {strides = array<i32>} : memref<1x1x1x128xf32, #tpu.memory_space<vmem>>, vector<1x1x1x128xf32>,
    %56 = arith.mulf %51, %51 : vector<256x128xf32>
    %cst_18 = arith.constant dense<0.000000e+00> : vector<128xf32>
    %57 = vector.multi_reduction <add>, %56, %cst_18 [0] : vector<256x128xf32> to vector<128xf32>
    %58 = vector.shape_cast %57 : vector<128xf32> to vector<1x128xf32>
    %59 = vector.shape_cast %58 : vector<1x128xf32> to vector<1x1x1x128xf32>
    %c0_19 = arith.constant 0 : index
    %c0_20 = arith.constant 0 : index
    %c0_21 = arith.constant 0 : index
    %c0_22 = arith.constant 0 : index
    %60 = vector.load %arg5[%c0_19, %c0_20, %c0_21, %c0_22] : memref<1x1x1x128xf32, #tpu.memory_space<vmem>>, vector<1x1x1x128xf32>
    tpu.vector_store %arg5[%c0_19, %c0_20, %c0_21, %c0_22], %59 {strides = array<i32>} : memref<1x1x1x128xf32, #tpu.memory_space<vmem>>, vector<1x1x1x128xf32>,
    return
  }
  func.func @transform_0(%arg0: i32, %arg1: i32) -> (i32, i32, i32, i32) {
    %c0_i32 = arith.constant 0 : i32
    %c0_i32_0 = arith.constant 0 : i32
    %c0_i32_1 = arith.constant 0 : i32
    %c0_i32_2 = arith.constant 0 : i32
    return %arg0, %c0_i32, %c0_i32_0, %c0_i32_1 : i32, i32, i32, i32
  }
  func.func @transform_1(%arg0: i32, %arg1: i32) -> (i32, i32) {
    %c0_i32 = arith.constant 0 : i32
    %c0_i32_0 = arith.constant 0 : i32
    %c0_i32_1 = arith.constant 0 : i32
    return %c0_i32, %c0_i32_0 : i32, i32
  }
  func.func @transform_2(%arg0: i32, %arg1: i32) -> (i32, i32, i32, i32) {
    %c0_i32 = arith.constant 0 : i32
    %c0_i32_0 = arith.constant 0 : i32
    %c0_i32_1 = arith.constant 0 : i32
    return %arg0, %arg1, %c0_i32, %c0_i32_0 : i32, i32, i32, i32
  }
  func.func @transform_3(%arg0: i32, %arg1: i32) -> (i32, i32, i32, i32) {
    %c0_i32 = arith.constant 0 : i32
    %c0_i32_0 = arith.constant 0 : i32
    %c0_i32_1 = arith.constant 0 : i32
    return %arg0, %arg1, %c0_i32, %c0_i32_0 : i32, i32, i32, i32
  }
}

module attributes {stable_mosaic.version = 11 : i64} {
  func.func @_conv_stats_kernel(%arg0: i32, %arg1: i32, %arg2: memref<1x18x18x4xf32, #tpu.memory_space<vmem>>, %arg3: memref<36x128xf32, #tpu.memory_space<vmem>>, %arg4: memref<1x1x1x128xf32, #tpu.memory_space<vmem>>, %arg5: memref<1x1x1x128xf32, #tpu.memory_space<vmem>>) attributes {dimension_semantics = [#tpu.dimension_semantics<parallel>, #tpu.dimension_semantics<parallel>], iteration_bounds = array<i64: 2, 1>, scalar_prefetch = 0 : i64, scratch_operands = 0 : i64, tpu.core_type = #tpu.core_type<tc>, window_params = [{transform_indices = @transform_0, window_bounds = array<i64: 1, 18, 18, 4>}, {pipeline_mode = #tpu.pipeline_mode<synchronous>, transform_indices = @transform_1, window_bounds = array<i64: 36, 128>}, {transform_indices = @transform_2, window_bounds = array<i64: 1, 1, 1, 128>}, {transform_indices = @transform_3, window_bounds = array<i64: 1, 1, 1, 128>}]} {
    %c16_i32 = arith.constant 16 : i32
    %0 = arith.muli %arg1, %c16_i32 : i32
    %1 = tpu.assume_multiple %0, 8 : i32
    %c0 = arith.constant 0 : index
    %2 = arith.index_cast %1 : i32 to index
    %c0_0 = arith.constant 0 : index
    %c0_1 = arith.constant 0 : index
    %3 = vector.load %arg2[%c0, %2, %c0_0, %c0_1] : memref<1x18x18x4xf32, #tpu.memory_space<vmem>>, vector<1x18x18x4xf32>
    %4 = vector.shape_cast %3 : vector<1x18x18x4xf32> to vector<18x18x4xf32>
    %c0_2 = arith.constant 0 : index
    %c0_3 = arith.constant 0 : index
    %5 = vector.load %arg3[%c0_2, %c0_3] : memref<36x128xf32, #tpu.memory_space<vmem>>, vector<36x128xf32>
    %cst = arith.constant 0.000000e+00 : f32
    %6 = vector.broadcast %cst : f32 to vector<256x128xf32>
    %7 = vector.extract_strided_slice %4 {offsets = [0, 0, 0], sizes = [16, 16, 4], strides = [1, 1, 1]} : vector<18x18x4xf32> to vector<16x16x4xf32>
    %8 = vector.shape_cast %7 : vector<16x16x4xf32> to vector<256x4xf32>
    %9 = vector.extract_strided_slice %5 {offsets = [0, 0], sizes = [4, 128], strides = [1, 1]} : vector<36x128xf32> to vector<4x128xf32>
    %cst_4 = arith.constant dense<0.000000e+00> : vector<256x128xf32>
    %10 = tpu.matmul %8, %9, %cst_4 {dimension_numbers = #tpu.dot_dimension_numbers<[1], [0], [0], [1], [0, 0, 1, 1], [], []>} : vector<256x4xf32>, vector<4x128xf32>, vector<256x128xf32> -> vector<256x128xf32>
    %11 = arith.addf %6, %10 : vector<256x128xf32>
    %12 = vector.extract_strided_slice %4 {offsets = [0, 1, 0], sizes = [16, 16, 4], strides = [1, 1, 1]} : vector<18x18x4xf32> to vector<16x16x4xf32>
    %13 = vector.shape_cast %12 : vector<16x16x4xf32> to vector<256x4xf32>
    %14 = vector.extract_strided_slice %5 {offsets = [4, 0], sizes = [4, 128], strides = [1, 1]} : vector<36x128xf32> to vector<4x128xf32>
    %cst_5 = arith.constant dense<0.000000e+00> : vector<256x128xf32>
    %15 = tpu.matmul %13, %14, %cst_5 {dimension_numbers = #tpu.dot_dimension_numbers<[1], [0], [0], [1], [0, 0, 1, 1], [], []>} : vector<256x4xf32>, vector<4x128xf32>, vector<256x128xf32> -> vector<256x128xf32>
    %16 = arith.addf %11, %15 : vector<256x128xf32>
    %17 = vector.extract_strided_slice %4 {offsets = [0, 2, 0], sizes = [16, 16, 4], strides = [1, 1, 1]} : vector<18x18x4xf32> to vector<16x16x4xf32>
    %18 = vector.shape_cast %17 : vector<16x16x4xf32> to vector<256x4xf32>
    %19 = vector.extract_strided_slice %5 {offsets = [8, 0], sizes = [4, 128], strides = [1, 1]} : vector<36x128xf32> to vector<4x128xf32>
    %cst_6 = arith.constant dense<0.000000e+00> : vector<256x128xf32>
    %20 = tpu.matmul %18, %19, %cst_6 {dimension_numbers = #tpu.dot_dimension_numbers<[1], [0], [0], [1], [0, 0, 1, 1], [], []>} : vector<256x4xf32>, vector<4x128xf32>, vector<256x128xf32> -> vector<256x128xf32>
    %21 = arith.addf %16, %20 : vector<256x128xf32>
    %22 = vector.extract_strided_slice %4 {offsets = [1, 0, 0], sizes = [16, 16, 4], strides = [1, 1, 1]} : vector<18x18x4xf32> to vector<16x16x4xf32>
    %23 = vector.shape_cast %22 : vector<16x16x4xf32> to vector<256x4xf32>
    %24 = vector.extract_strided_slice %5 {offsets = [12, 0], sizes = [4, 128], strides = [1, 1]} : vector<36x128xf32> to vector<4x128xf32>
    %cst_7 = arith.constant dense<0.000000e+00> : vector<256x128xf32>
    %25 = tpu.matmul %23, %24, %cst_7 {dimension_numbers = #tpu.dot_dimension_numbers<[1], [0], [0], [1], [0, 0, 1, 1], [], []>} : vector<256x4xf32>, vector<4x128xf32>, vector<256x128xf32> -> vector<256x128xf32>
    %26 = arith.addf %21, %25 : vector<256x128xf32>
    %27 = vector.extract_strided_slice %4 {offsets = [1, 1, 0], sizes = [16, 16, 4], strides = [1, 1, 1]} : vector<18x18x4xf32> to vector<16x16x4xf32>
    %28 = vector.shape_cast %27 : vector<16x16x4xf32> to vector<256x4xf32>
    %29 = vector.extract_strided_slice %5 {offsets = [16, 0], sizes = [4, 128], strides = [1, 1]} : vector<36x128xf32> to vector<4x128xf32>
    %cst_8 = arith.constant dense<0.000000e+00> : vector<256x128xf32>
    %30 = tpu.matmul %28, %29, %cst_8 {dimension_numbers = #tpu.dot_dimension_numbers<[1], [0], [0], [1], [0, 0, 1, 1], [], []>} : vector<256x4xf32>, vector<4x128xf32>, vector<256x128xf32> -> vector<256x128xf32>
    %31 = arith.addf %26, %30 : vector<256x128xf32>
    %32 = vector.extract_strided_slice %4 {offsets = [1, 2, 0], sizes = [16, 16, 4], strides = [1, 1, 1]} : vector<18x18x4xf32> to vector<16x16x4xf32>
    %33 = vector.shape_cast %32 : vector<16x16x4xf32> to vector<256x4xf32>
    %34 = vector.extract_strided_slice %5 {offsets = [20, 0], sizes = [4, 128], strides = [1, 1]} : vector<36x128xf32> to vector<4x128xf32>
    %cst_9 = arith.constant dense<0.000000e+00> : vector<256x128xf32>
    %35 = tpu.matmul %33, %34, %cst_9 {dimension_numbers = #tpu.dot_dimension_numbers<[1], [0], [0], [1], [0, 0, 1, 1], [], []>} : vector<256x4xf32>, vector<4x128xf32>, vector<256x128xf32> -> vector<256x128xf32>
    %36 = arith.addf %31, %35 : vector<256x128xf32>
    %37 = vector.extract_strided_slice %4 {offsets = [2, 0, 0], sizes = [16, 16, 4], strides = [1, 1, 1]} : vector<18x18x4xf32> to vector<16x16x4xf32>
    %38 = vector.shape_cast %37 : vector<16x16x4xf32> to vector<256x4xf32>
    %39 = vector.extract_strided_slice %5 {offsets = [24, 0], sizes = [4, 128], strides = [1, 1]} : vector<36x128xf32> to vector<4x128xf32>
    %cst_10 = arith.constant dense<0.000000e+00> : vector<256x128xf32>
    %40 = tpu.matmul %38, %39, %cst_10 {dimension_numbers = #tpu.dot_dimension_numbers<[1], [0], [0], [1], [0, 0, 1, 1], [], []>} : vector<256x4xf32>, vector<4x128xf32>, vector<256x128xf32> -> vector<256x128xf32>
    %41 = arith.addf %36, %40 : vector<256x128xf32>
    %42 = vector.extract_strided_slice %4 {offsets = [2, 1, 0], sizes = [16, 16, 4], strides = [1, 1, 1]} : vector<18x18x4xf32> to vector<16x16x4xf32>
    %43 = vector.shape_cast %42 : vector<16x16x4xf32> to vector<256x4xf32>
    %44 = vector.extract_strided_slice %5 {offsets = [28, 0], sizes = [4, 128], strides = [1, 1]} : vector<36x128xf32> to vector<4x128xf32>
    %cst_11 = arith.constant dense<0.000000e+00> : vector<256x128xf32>
    %45 = tpu.matmul %43, %44, %cst_11 {dimension_numbers = #tpu.dot_dimension_numbers<[1], [0], [0], [1], [0, 0, 1, 1], [], []>} : vector<256x4xf32>, vector<4x128xf32>, vector<256x128xf32> -> vector<256x128xf32>
    %46 = arith.addf %41, %45 : vector<256x128xf32>
    %47 = vector.extract_strided_slice %4 {offsets = [2, 2, 0], sizes = [16, 16, 4], strides = [1, 1, 1]} : vector<18x18x4xf32> to vector<16x16x4xf32>
    %48 = vector.shape_cast %47 : vector<16x16x4xf32> to vector<256x4xf32>
    %49 = vector.extract_strided_slice %5 {offsets = [32, 0], sizes = [4, 128], strides = [1, 1]} : vector<36x128xf32> to vector<4x128xf32>
    %cst_12 = arith.constant dense<0.000000e+00> : vector<256x128xf32>
    %50 = tpu.matmul %48, %49, %cst_12 {dimension_numbers = #tpu.dot_dimension_numbers<[1], [0], [0], [1], [0, 0, 1, 1], [], []>} : vector<256x4xf32>, vector<4x128xf32>, vector<256x128xf32> -> vector<256x128xf32>
    %51 = arith.addf %46, %50 : vector<256x128xf32>
    %cst_13 = arith.constant dense<0.000000e+00> : vector<128xf32>
    %52 = vector.multi_reduction <add>, %51, %cst_13 [0] : vector<256x128xf32> to vector<128xf32>
    %53 = vector.shape_cast %52 : vector<128xf32> to vector<1x128xf32>
    %54 = vector.shape_cast %53 : vector<1x128xf32> to vector<1x1x1x128xf32>
    %c0_14 = arith.constant 0 : index
    %c0_15 = arith.constant 0 : index
    %c0_16 = arith.constant 0 : index
    %c0_17 = arith.constant 0 : index
    %55 = vector.load %arg4[%c0_14, %c0_15, %c0_16, %c0_17] : memref<1x1x1x128xf32, #tpu.memory_space<vmem>>, vector<1x1x1x128xf32>
    tpu.vector_store %arg4[%c0_14, %c0_15, %c0_16, %c0_17], %54 {strides = array<i32>} : memref<1x1x1x128xf32, #tpu.memory_space<vmem>>, vector<1x1x1x128xf32>,
    %56 = arith.mulf %51, %51 : vector<256x128xf32>
    %cst_18 = arith.constant dense<0.000000e+00> : vector<128xf32>
    %57 = vector.multi_reduction <add>, %56, %cst_18 [0] : vector<256x128xf32> to vector<128xf32>
    %58 = vector.shape_cast %57 : vector<128xf32> to vector<1x128xf32>
    %59 = vector.shape_cast %58 : vector<1x128xf32> to vector<1x1x1x128xf32>
    %c0_19 = arith.constant 0 : index
    %c0_20 = arith.constant 0 : index
    %c0_21 = arith.constant 0 : index
    %c0_22 = arith.constant 0 : index
    %60 = vector.load %arg5[%c0_19, %c0_20, %c0_21, %c0_22] : memref<1x1x1x128xf32, #tpu.memory_space<vmem>>, vector<1x1x1x128xf32>
    tpu.vector_store %arg5[%c0_19, %c0_20, %c0_21, %c0_22], %59 {strides = array<i32>} : memref<1x1x1x128xf32, #tpu.memory_space<vmem>>, vector<1x1x1x128xf32>,
    return
  }
  func.func @transform_0(%arg0: i32, %arg1: i32) -> (i32, i32, i32, i32) {
    %c0_i32 = arith.constant 0 : i32
    %c0_i32_0 = arith.constant 0 : i32
    %c0_i32_1 = arith.constant 0 : i32
    %c0_i32_2 = arith.constant 0 : i32
    return %arg0, %c0_i32, %c0_i32_0, %c0_i32_1 : i32, i32, i32, i32
  }
  func.func @transform_1(%arg0: i32, %arg1: i32) -> (i32, i32) {
    %c0_i32 = arith.constant 0 : i32
    %c0_i32_0 = arith.constant 0 : i32
    %c0_i32_1 = arith.constant 0 : i32
    return %c0_i32, %c0_i32_0 : i32, i32
  }
  func.func @transform_2(%arg0: i32, %arg1: i32) -> (i32, i32, i32, i32) {
    %c0_i32 = arith.constant 0 : i32
    %c0_i32_0 = arith.constant 0 : i32
    %c0_i32_1 = arith.constant 0 : i32
    return %arg0, %arg1, %c0_i32, %c0_i32_0 : i32, i32, i32, i32
  }
  func.func @transform_3(%arg0: i32, %arg1: i32) -> (i32, i32, i32, i32) {
    %c0_i32 = arith.constant 0 : i32
    %c0_i32_0 = arith.constant 0 : i32
    %c0_i32_1 = arith.constant 0 : i32
    return %arg0, %arg1, %c0_i32, %c0_i32_0 : i32, i32, i32, i32
  }
}

</mosaic_0001>

<bundles_post_ra>
// kernel: tpu_custom_call.1
= control target key start
LH: loop header
LB: loop body
LE: loop exit
PB: predicated region body
PF: predicated region fallthrough
CT: control target
= control target key end

     0   :  { %9 = vsyncpa [#allocation3], 0  ;;  %s5982_s0 = inlined_call_operand.vmem [shape: f32[2,18,18,4], index: 0, kind: input, shape index: {}]   ;;  %s5983_s1 = inlined_call_operand.vmem [shape: f32[36,128], index: 1, kind: input, shape index: {}]   ;;  %s5984_s2 = inlined_call_operand.hbm [shape: f32[2,1,1,128], index: 2, kind: output, shape index: {0}]   ;;  %s5985_s3 = inlined_call_operand.hbm [shape: f32[2,1,1,128], index: 3, kind: output, shape index: {1}]  }
   0x1   :  { %11 = vsyncpa [#allocation3 + $0x1], 0 }
   0x2   :  { %12 = vsyncpa [#allocation5], 0 }
   0x3   :  { %14 = vsyncpa [#allocation5 + $0x1], 0  ;;  %s4730_s12 = smov 0   ;;  %s4732_s13 = smov 0  }
   0x4   :  { %s4734_s14 = smov 0   ;;  %s4736_s15 = smov 0  }
   0x5   :  { %s4738_s16 = smov 0   ;;  %s4740_s17 = smov 0  }
   0x6 LB: > { %s3224_s18 = sadd.s32 4294967295, %s4706_s17   ;;  %s3225_s19 = sadd.s32 4294967294, %s4706_s17   ;;  %s4706_s17 = sphi %s4740_s17, %s20_s17   ;;  %s4702_s16 = sphi %s4738_s16, %s6170_s16   ;;  %s4698_s15 = sphi %s4736_s15, %s6169_s15   ;;  %s4694_s14 = sphi %s4734_s14, %s6168_s14   ;;  %s4690_s13 = sphi %s4732_s13, %s6167_s13   ;;  %s4686_s12 = sphi %s4730_s12, %s6166_s12  }
   0x7   : > { %s32_s20 = sadd.s32 1, %s4702_s16  ;;  %s88_s21 = sadd.s32 1, %s4694_s14 }
   0x8   : > { %p34_p0 = scmp.ge.s32.totalorder %s32_s20, 2  ;;  %p98_p1 = scmp.ne.s32.totalorder %s4694_s14, %s4690_s13 }
   0x9   : > { %p99_p2 = scmp.eq.s32.totalorder %s3224_s18, 1  ;;  %p104_p3 = scmp.ne.s32.totalorder %s4690_s13, %s4686_s12 }
   0xa   : > { %s6172_s20 = smov (%p34_p0, %s32_s20), 0  ;;  %p105_p5 = scmp.eq.s32.totalorder %s3225_s19, 1 }
   0xb   : > { %p4770_p4 = por %p99_p2, %p98_p1  ;;  %s83_s23 = ssub.s32 %s4702_s16, %s6172_s20 }
   0xc   : > { %p3227_p6 = scmp.ge.s32.totalorder %s4706_s17, 1  ;;  %p86_p7 = scmp.eq.s32.totalorder %s83_s23, 0 }
   0xd   : > { %p4777_p8 = por %p105_p5, %p104_p3  ;;  %p162_p9 = scmp.lt.s32.totalorder %s4706_s17, 3 }
   0xe   : > { %s4783_s25 = scalar_select %p86_p7, %s4694_s14, %s88_s21  }
   0xf   : > { %p163_p10 = pnand %p3227_p6, %p162_p9 }
  0x11   : > { %166 = sbr.rel (%p163_p10) target bundleno = 589 (0x24d), region = 28 }
  0x18   : > { %v251_v0 = vld [vmem:[%s5983_s1] sm:$0xff]  ;;  %vm452_vm0 = vcmask 1043456   ;;  %v4791_v1 = vld [vmem:[%s5983_s1 + $0x10] sm:$0xff]  ;;  %p189_p11 = scmp.lt.s32.totalorder %s4698_s15, 1  ;;  %vm304_vm1 = vcmask 1046528   ;;  %vm387_vm2 = vcmask 31744  }
  0x19   : > { %v386_v2 = vrot.slane %v251_v0, 4  ;;  %4027 = vmatprep.subr.msk.mxu0 %vm452_vm0, %v4791_v1  ;;  %v1917_v3 = vrot.slane %v4791_v1, 4  ;;  %v4872_v33 = vld [vmem:[%s5983_s1 + $0x18] sm:$0xff]  ;;  %v4882_v35 = vld [vmem:[%s5983_s1 + $0x8] sm:$0xff]  ;;  %vm971_vm3 = vcmask 1045504   ;;  %s5893_s21 = sand.u32 1, %s4690_s13  }
  0x1a   : > { %4028 = vmatpush3.msk.msra.mxu0 %vm452_vm0, %v4791_v1  ;;  %s190_s30 = scalar_select %p189_p11, %s4698_s15, 1 }
  0x1b   : > { %3827 = vmatprep.subr.msk.mxu1 %vm452_vm0, %v386_v2  ;;  %4077 = vmatprep.subr.msk.mxu0 %vm452_vm0, %v1917_v3  ;;  %s3526_s23 = sshll.u32 %s4698_s15, 4  ;;  %s182_s26 = scalar_lea.vmem [#allocation2], %s5893_s21 }
  0x1c   : > { %3828 = vmatpush3.msk.msra.mxu1 %vm452_vm0, %v386_v2  ;;  %s4535_s4 = smul.u32 432, %s190_s30  ;;  %s3112_s27 = sshll.u32 %s182_s26, 4  ;;  %s5905_s27 = int_to_ptr.vmem [resolvable:$true] %s3112_s27 }
  0x1d   : > { %3877 = vmatprep.subr.msk.mxu1 %vm452_vm0, %v251_v0  ;;  %s188_s28 = scalar_lea.vmem [#allocation4], %s5893_s21  ;;  %s5903_s5 = scalar_lea.hbm %s5984_s2, %s3526_s23 }
  0x1e   : > { %s4807_s7 = scalar_lea.vmem %s5982_s0, %s4535_s4  ;;  %s3126_s29 = sshll.u32 %s188_s28, 4  ;;  %s5912_s29 = int_to_ptr.vmem [resolvable:$true] %s3126_s29 }
  0x1f   : > { %v4810_v4 = vld [vmem:[%s4807_s7] sm:$0xff]  ;;  %v4813_v5 = vld [vmem:[%s4807_s7 + $0x8] sm:$0xff]  ;;  %v4816_v6 = vld [vmem:[%s4807_s7 + $0x18] sm:$0xff]  ;;  %s3095_s8 = scalar_lea.sflag [#allocation3], %s5893_s21  ;;  %s4596_s9 = scalar_lea.vmem %s5905_s27, 16 }
  0x20   : > { %6061 = vst [vmem:[#allocation8_spill] sm:$0xff] %v4816_v6  ;;  %v305_v7 = vrot.slane %v4810_v4, 1  ;;  %v306_v8 = vrot.slane %v4813_v5, 1  ;;  %v4821_v9 = vld [vmem:[%s4807_s7 + $0x20] sm:$0xff]  ;;  %v310_v10 = vrot.slane %v4816_v6, 1  ;;  %v4833_v15 = vld [vmem:[%s4807_s7 + $0x30] sm:$0xff]  ;;  %p4597_p12 = scmp.ne.s32.totalorder %s5905_s27, %s4596_s9 }
  0x21   : > { %6062 = vst [vmem:[#allocation9_spill] sm:$0xff] %v4821_v9  ;;  %v4825_v11 = vld [vmem:[%s4807_s7 + $0x10] sm:$0x3]  ;;  %v311_v12 = vrot.slane %v4821_v9, 1  ;;  %v4830_v14 = vld [vmem:[%s4807_s7 + $0x28] sm:$0x3] }
  0x22   : > { %v308_v13 = vrot.slane %v4825_v11, 1  ;;  %v307_v16 = vsel %vm304_vm1, %v305_v7, %v306_v8  ;;  %v313_v17 = vrot.slane %v4830_v14, 1  ;;  %v4838_v18 = vld [vmem:[%s4807_s7 + $0x38] sm:$0xff]  ;;  %v315_v19 = vrot.slane %v4833_v15, 1  ;;  %v4842_v20 = vld [vmem:[%s4807_s7 + $0x40] sm:$0x3]  ;;  %p4598_p13 = pnand %p4597_p12, %p4770_p4 }
  0x23   : > { %3829 = vmatprep.mubr.msk.f32.mxu1 %vm387_vm2, %v307_v16  ;;  %v312_v21 = vsel %vm304_vm1, %v310_v10, %v311_v12  ;;  %v316_v23 = vrot.slane %v4838_v18, 1  ;;  %v318_v24 = vrot.slane %v4842_v20, 1  ;;  %v4850_v25 = vld [vmem:[%s4807_s7 + $0x48] sm:$0xff]  ;;  %v4853_v26 = vld [vmem:[%s4807_s7 + $0x50] sm:$0xff]  ;;  %v4856_v27 = vld [vmem:[%s4807_s7 + $0x58] sm:$0x3] }
  0x24   : > { %v309_v22 = vsel %vm304_vm1, %v306_v8, %v308_v13  ;;  %4029 = vmatprep.mubr.msk.f32.mxu0 %vm387_vm2, %v312_v21  ;;  %v314_v28 = vsel %vm304_vm1, %v311_v12, %v313_v17  ;;  %v320_v29 = vrot.slane %v4850_v25, 1  ;;  %v321_v30 = vrot.slane %v4853_v26, 1  ;;  %v4864_v31 = vld [vmem:[%s4807_s7 + $0x60] sm:$0xff]  ;;  %v4867_v32 = vld [vmem:[%s4807_s7 + $0x68] sm:$0xff]  ;;  %v4898_v41 = vld [vmem:[%s4807_s7 + $0x70] sm:$0x3]  ;;  %p4599_p0 = pneg %p4598_p13 }
  0x25   : > { %3830 = vmatmul.mubr.msk.f32.vlgmr.msra.gmra.mrb[0].mxu1 %vm387_vm2, %v309_v22  ;;  %4030 = vmatmul.mubr.msk.f32.vlgmr.msra.gmra.mrb[0].mxu0 %vm387_vm2, %v314_v28  ;;  %v4877_v34 = vsel %vm304_vm1, %v315_v19, %v316_v23  ;;  %v4887_v36 = vsel %vm304_vm1, %v316_v23, %v318_v24  ;;  %v323_v37 = vrot.slane %v4856_v27, 1  ;;  %v325_v39 = vrot.slane %v4864_v31, 1  ;;  %v4904_v42 = vld [vmem:[%s4807_s7 + $0x78] sm:$0xff]  ;;  %v4907_v43 = vld [vmem:[%s4807_s7 + $0x80] sm:$0xff]  ;;  %v4927_v49 = vld [vmem:[%s4807_s7 + $0x88] sm:$0x3] }
  0x26   : > { %3878 = vmatpush3.msk.msra.mxu1 %vm452_vm0, %v251_v0  ;;  %6063 = vst [vmem:[#allocation10_spill] sm:$0xff] %v4877_v34  ;;  %4078 = vmatpush3.msk.msra.mxu0 %vm452_vm0, %v1917_v3  ;;  %6064 = vst [vmem:[#allocation11_spill] sm:$0xff] %v4887_v36  ;;  %v4893_v38 = vsel %vm304_vm1, %v320_v29, %v321_v30  ;;  %v326_v40 = vrot.slane %v4867_v32, 1  ;;  %v328_v45 = vrot.slane %v4898_v41, 1  ;;  %v330_v47 = vrot.slane %v4904_v42, 1  ;;  %v4932_v50 = vld [vmem:[%s4807_s7 + $0x90] sm:$0xff] }
  0x27   : > { %3832 = vmatprep.mubr.msk.f32.mxu1 %vm387_vm2, %v312_v21  ;;  %4032 = vmatprep.mubr.msk.f32.mxu0 %vm387_vm2, %v4877_v34  ;;  %6065 = vst [vmem:[#allocation12_spill] sm:$0xff] %v4893_v38  ;;  %v4918_v44 = vsel %vm304_vm1, %v321_v30, %v323_v37  ;;  %v331_v48 = vrot.slane %v4907_v43, 1  ;;  %v4935_v51 = vld [vmem:[%s4807_s7 + $0x98] sm:$0xff]  ;;  %v333_v53 = vrot.slane %v4927_v49, 1  ;;  %v335_v55 = vrot.slane %v4932_v50, 1  ;;  %v4958_v58 = vld [vmem:[%s4807_s7 + $0xa8] sm:$0xff] }
  0x28   : > { %4127 = vmatprep.subr.msk.mxu0 %vm452_vm0, %v4872_v33  ;;  %3927 = vmatprep.subr.msk.mxu1 %vm452_vm0, %v4882_v35  ;;  %6066 = vst [vmem:[#allocation13_spill] sm:$0xff] %v4918_v44  ;;  %v4922_v46 = vsel %vm304_vm1, %v325_v39, %v326_v40  ;;  %v4944_v52 = vsel %vm304_vm1, %v326_v40, %v328_v45  ;;  %v336_v56 = vrot.slane %v4935_v51, 1  ;;  %v4953_v57 = vld [vmem:[%s4807_s7 + $0xa0] sm:$0x3]  ;;  %v4961_v59 = vld [vmem:[%s4807_s7 + $0xb0] sm:$0xff]  ;;  %v340_v63 = vrot.slane %v4958_v58, 1 }
  0x29   : > { %3833 = vmatmul.mubr.msk.f32.gmra.mrb[2].mxu1 %vm387_vm2, %v314_v28  ;;  %4033 = vmatmul.mubr.msk.f32.gmra.mrb[2].mxu0 %vm387_vm2, %v4887_v36  ;;  %6067 = vst [vmem:[#allocation14_spill] sm:$0xff] %v4922_v46  ;;  %6068 = vst [vmem:[#allocation15_spill] sm:$0xff] %v4944_v52  ;;  %v4948_v54 = vsel %vm304_vm1, %v330_v47, %v331_v48  ;;  %v4970_v60 = vsel %vm304_vm1, %v331_v48, %v333_v53  ;;  %v338_v61 = vrot.slane %v4953_v57, 1  ;;  %v4979_v2 = vld [vmem:[%s4807_s7 + $0xb8] sm:$0x3]  ;;  %v4984_v3 = vld [vmem:[%s4807_s7 + $0xc0] sm:$0xff] }
  0x2a   : > { %3835 = vmatprep.mubr.msk.f32.mxu1 %vm387_vm2, %v4877_v34  ;;  %4035 = vmatprep.mubr.msk.f32.mxu0 %vm387_vm2, %v4893_v38  ;;  %6069 = vst [vmem:[#allocation16_spill] sm:$0xff] %v4948_v54  ;;  %6070 = vst [vmem:[#allocation17_spill] sm:$0xff] %v4970_v60  ;;  %v4974_v62 = vsel %vm304_vm1, %v335_v55, %v336_v56  ;;  %v341_v0 = vrot.slane %v4961_v59, 1  ;;  %v4987_v7 = vld [vmem:[%s4807_s7 + $0xc8] sm:$0xff]  ;;  %v343_v10 = vrot.slane %v4979_v2, 1  ;;  %v345_v13 = vrot.slane %v4984_v3, 1 }
  0x2b   : > { %6071 = vst [vmem:[#allocation18_spill] sm:$0xff] %v4974_v62  ;;  %v4996_v8 = vsel %vm304_vm1, %v336_v56, %v338_v61  ;;  %v346_v16 = vrot.slane %v4987_v7, 1  ;;  %v5005_v17 = vld [vmem:[%s4807_s7 + $0xd0] sm:$0x3]  ;;  %v977_v23 = vrot.slane %v4816_v6, 2  ;;  %v978_v24 = vrot.slane %v4821_v9, 2 }
  0x2c   : > { %6072 = vst [vmem:[#allocation19_spill] sm:$0xff] %v4996_v8  ;;  %v5000_v12 = vsel %vm304_vm1, %v340_v63, %v341_v0  ;;  %v5016_v19 = vsel %vm304_vm1, %v341_v0, %v343_v10  ;;  %v348_v21 = vrot.slane %v5005_v17, 1  ;;  %v5025_v28 = vld [vmem:[%s4807_s7 + $0xd8] sm:$0xff]  ;;  %v5028_v29 = vld [vmem:[%s4807_s7 + $0xe0] sm:$0xff]  ;;  %v980_v30 = vrot.slane %v4830_v14, 2  ;;  %v5053_v53 = vld [vmem:[%s4807_s7 + $0xf0] sm:$0xff] }
  0x2d   : > { %3836 = vmatmul.mubr.msk.f32.gmra.mrb[4].mxu1 %vm387_vm2, %v4887_v36  ;;  %4036 = vmatmul.mubr.msk.f32.gmra.mrb[4].mxu0 %vm387_vm2, %v4918_v44  ;;  %6073 = vst [vmem:[#allocation20_spill] sm:$0xff] %v5000_v12  ;;  %6074 = vst [vmem:[#allocation21_spill] sm:$0xff] %v5016_v19  ;;  %v5020_v22 = vsel %vm304_vm1, %v345_v13, %v346_v16  ;;  %v350_v39 = vrot.slane %v5025_v28, 1  ;;  %v351_v40 = vrot.slane %v5028_v29, 1  ;;  %v5045_v45 = vld [vmem:[%s4807_s7 + $0xe8] sm:$0x3] }
  0x2e   : > { %3838 = vmatprep.mubr.msk.f32.mxu1 %vm387_vm2, %v4893_v38  ;;  %4038 = vmatprep.mubr.msk.f32.mxu0 %vm387_vm2, %v4922_v46  ;;  %6075 = vst [vmem:[#allocation22_spill] sm:$0xff] %v5020_v22  ;;  %v5040_v37 = vsel %vm304_vm1, %v346_v16, %v348_v21  ;;  %v5048_v47 = vsel %vm971_vm3, %v977_v23, %v978_v24  ;;  %v982_v48 = vrot.slane %v4833_v15, 2  ;;  %v983_v14 = vrot.slane %v4838_v18, 2  ;;  %v5056_v55 = vld [vmem:[%s4807_s7 + $0xf8] sm:$0xff]  ;;  %v5077_v16 = vld [vmem:[%s4807_s7 + $0x100] sm:$0x3] }
  0x2f   : > { %6076 = vst [vmem:[#allocation23_spill] sm:$0xff] %v5040_v37  ;;  %v353_v56 = vrot.slane %v5045_v45, 1  ;;  %v985_v61 = vrot.slane %v4842_v20, 2  ;;  %v5069_v63 = vsel %vm971_vm3, %v978_v24, %v980_v30  ;;  %v5072_v0 = vsel %vm304_vm1, %v350_v39, %v351_v40  ;;  %v5086_v30 = vld [vmem:[%s4807_s7 + $0x108] sm:$0xff]  ;;  %v5089_v39 = vld [vmem:[%s4807_s7 + $0x110] sm:$0xff]  ;;  %s4708_s10 = smov [#allocation2]  }
  0x30   : > { %6077 = vst [vmem:[#allocation24_spill] sm:$0xff] %v5072_v0  ;;  %v355_v10 = vrot.slane %v5053_v53, 1  ;;  %v356_v13 = vrot.slane %v5056_v55, 1  ;;  %v5081_v23 = vsel %vm971_vm3, %v982_v48, %v983_v14  ;;  %v987_v20 = vrot.slane %v4850_v25, 2  ;;  %v5188_v36 = vld [vmem:[%s4807_s7 + $0x148] sm:$0x3] }
  0x31   : > { %3839 = vmatmul.mubr.msk.f32.gmra.mrb[6].mxu1 %vm387_vm2, %v4918_v44  ;;  %4039 = vmatmul.mubr.msk.f32.gmra.mrb[6].mxu0 %vm387_vm2, %v4944_v52  ;;  %v988_v24 = vrot.slane %v4853_v26, 2  ;;  %v5098_v48 = vsel %vm304_vm1, %v351_v40, %v353_v56  ;;  %v5101_v21 = vsel %vm971_vm3, %v983_v14, %v985_v61  ;;  %v361_v40 = vrot.slane %v5089_v39, 1  ;;  %v5115_v56 = vld [vmem:[%s4807_s7 + $0x118] sm:$0x3]  ;;  %s4600_s11 = sshll.u32 %s4708_s10, 4  ;;  %s4601_s11 = int_to_ptr.vmem [resolvable:$false] %s4600_s11 }
  0x32   : > { %3841 = vmatprep.mubr.msk.f32.mxu1 %vm387_vm2, %v4922_v46  ;;  %4041 = vmatprep.mubr.msk.f32.mxu0 %vm387_vm2, %v4948_v54  ;;  %6078 = vst [vmem:[#allocation25_spill] sm:$0xff] %v5098_v48  ;;  %6079 = vst [vmem:[#allocation26_spill] sm:$0xff] %v5101_v21  ;;  %v992_v61 = vrot.slane %v4864_v31, 2  ;;  %v5161_v46 = vld [vmem:[%s4807_s7 + $0x138] sm:$0xff]  ;;  %v1000_v44 = vrot.slane %v4927_v49, 2  ;;  %v1005_v34 = vrot.slane %v4953_v57, 2  ;;  %p4603_p1 = scmp.lt.s32.totalorder %s5905_s27, %s4601_s11 }
  0x33   : > { %v5118_v14 = vsel %vm971_vm3, %v987_v20, %v988_v24  ;;  %v370_v38 = vrot.slane %v5161_v46, 1  ;;  %v1007_v57 = vrot.slane %v4958_v58, 2  ;;  %s4602_s18 = scalar_lea.vmem %s4601_s11, 32 }
  0x34   : > { %6081 = vst [vmem:[#allocation28_spill] sm:$0xff] %v5118_v14  ;;  %p4604_p2 = scmp.lt.s32.totalorder %s4602_s18, %s4596_s9 }
  0x35   : > { %3842 = vmatmul.mubr.msk.f32.gmra.mrb[8].mxu1 %vm387_vm2, %v4944_v52  ;;  %4042 = vmatmul.mubr.msk.f32.gmra.mrb[8].mxu0 %vm387_vm2, %v4970_v60  ;;  %v5153_v52 = vld [vmem:[%s4807_s7 + $0x130] sm:$0x3] }
  0x36   : > { %3844 = vmatprep.mubr.msk.f32.mxu1 %vm387_vm2, %v4948_v54  ;;  %4044 = vmatprep.mubr.msk.f32.mxu0 %vm387_vm2, %v4974_v62  ;;  %p4605_p3 = por %p4604_p2, %p4603_p1 }
  0x38   : > { %p4606_p5 = pnand %p4605_p3, %p4599_p0 }
  0x39   : > { %3845 = vmatmul.mubr.msk.f32.gmra.mrb[10].mxu1 %vm387_vm2, %v4970_v60  ;;  %4045 = vmatmul.mubr.msk.f32.gmra.mrb[10].mxu0 %vm387_vm2, %v4996_v8  ;;  %v995_v60 = vrot.slane %v4898_v41, 2  ;;  %v997_v41 = vrot.slane %v4904_v42, 2 }
  0x3a   : > { %3847 = vmatprep.mubr.msk.f32.mxu1 %vm387_vm2, %v4974_v62  ;;  %4047 = vmatprep.mubr.msk.f32.mxu0 %vm387_vm2, %v5000_v12  ;;  %v363_v62 = vrot.slane %v5115_v56, 1 }
  0x3d   : > { %3848 = vmatmul.mubr.msk.f32.gmra.mrb[12].mxu1 %vm387_vm2, %v4996_v8  ;;  %4048 = vmatmul.mubr.msk.f32.gmra.mrb[12].mxu0 %vm387_vm2, %v5016_v19  ;;  %v5123_v8 = vld [vmem:[%s4807_s7 + $0x120] sm:$0xff] }
  0x3e   : > { %3850 = vmatprep.mubr.msk.f32.mxu1 %vm387_vm2, %v5000_v12  ;;  %4050 = vmatprep.mubr.msk.f32.mxu0 %vm387_vm2, %v5020_v22  ;;  %v993_v12 = vrot.slane %v4867_v32, 2  ;;  %v365_v54 = vrot.slane %v5123_v8, 1 }
  0x41   : > { %3851 = vmatmul.mubr.msk.f32.gmra.mrb[14].mxu1 %vm387_vm2, %v5016_v19  ;;  %4051 = vmatmul.mubr.msk.f32.gmra.mrb[14].mxu0 %vm387_vm2, %v5040_v37  ;;  %v990_v19 = vrot.slane %v4856_v27, 2  ;;  %v6082_v27 = vrot.slane %v4872_v33, 4 }
  0x42   : > { %3853 = vmatprep.mubr.msk.f32.mxu1 %vm387_vm2, %v5020_v22  ;;  %4079 = vmatprep.mubr.msk.f32.mxu0 %vm387_vm2, %v5048_v47  ;;  %v358_v22 = vrot.slane %v5077_v16, 1 }
  0x44   : > { %v5138_v20 = vsel %vm304_vm1, %v356_v13, %v358_v22  ;;  %v5156_v22 = vsel %vm971_vm3, %v992_v61, %v993_v12  ;;  %v368_v61 = vrot.slane %v5153_v52, 1 }
  0x45   : > { %3854 = vmatmul.mubr.msk.f32.gmra.mrb[16].mxu1 %vm387_vm2, %v5040_v37  ;;  %4080 = vmatmul.mubr.msk.f32.vlgmr.msra.gmra.mrb[0].mxu0 %vm387_vm2, %v5069_v63  ;;  %v5109_v37 = vsel %vm304_vm1, %v355_v10, %v356_v13  ;;  %v5126_v10 = vld [vmem:[%s4807_s7 + $0x128] sm:$0xff]  ;;  %6083 = vst [vmem:[#allocation29_spill] sm:$0xff] %v5138_v20  ;;  %6086 = vst [vmem:[#allocation32_spill] sm:$0xff] %v5156_v22  ;;  %v998_v13 = vrot.slane %v4907_v43, 2 }
  0x46   : > { %3856 = vmatprep.mubr.msk.f32.mxu1 %vm387_vm2, %v5072_v0  ;;  %4128 = vmatpush3.msk.msra.mxu0 %vm452_vm0, %v4872_v33  ;;  %6080 = vst [vmem:[#allocation27_spill] sm:$0xff] %v5109_v37  ;;  %v360_v0 = vrot.slane %v5086_v30, 1 }
  0x47   : > { %4082 = vmatprep.mubr.msk.f32.mxu0 %vm387_vm2, %v5081_v23  ;;  %4177 = vmatprep.subr.msk.mxu0 %vm452_vm0, %v6082_v27  ;;  %v5145_v27 = vsel %vm971_vm3, %v988_v24, %v990_v19  ;;  %v5164_v19 = vld [vmem:[%s4807_s7 + $0x140] sm:$0xff]  ;;  %v5176_v24 = vsel %vm971_vm3, %v993_v12, %v995_v60  ;;  %v1002_v60 = vrot.slane %v4932_v50, 2  ;;  %v1003_v12 = vrot.slane %v4935_v51, 2 }
  0x48   : > { %6084 = vst [vmem:[#allocation30_spill] sm:$0xff] %v5145_v27  ;;  %6088 = vst [vmem:[#allocation34_spill] sm:$0xff] %v5176_v24 }
  0x49   : > { %3857 = vmatmul.mubr.msk.f32.gmra.mrb[18].mxu1 %vm387_vm2, %v5098_v48  ;;  %4083 = vmatmul.mubr.msk.f32.gmra.mrb[2].mxu0 %vm387_vm2, %v5101_v21  ;;  %v5148_v48 = vsel %vm304_vm1, %v360_v0, %v361_v40  ;;  %v5173_v0 = vsel %vm304_vm1, %v361_v40, %v363_v62  ;;  %v5191_v62 = vsel %vm971_vm3, %v997_v41, %v998_v13  ;;  %v5196_v40 = vld [vmem:[%s4807_s7 + $0x150] sm:$0xff]  ;;  %v373_v41 = vrot.slane %v5188_v36, 1  ;;  %v5258_v21 = vld [vmem:[%s4807_s7 + $0x178] sm:$0x3] }
  0x4a   : > { %3859 = vmatprep.mubr.msk.f32.mxu1 %vm387_vm2, %v5109_v37  ;;  %4085 = vmatprep.mubr.msk.f32.mxu0 %vm387_vm2, %v5118_v14  ;;  %6085 = vst [vmem:[#allocation31_spill] sm:$0xff] %v5148_v48  ;;  %v366_v37 = vrot.slane %v5126_v10, 1  ;;  %6087 = vst [vmem:[#allocation33_spill] sm:$0xff] %v5173_v0 }
  0x4b   : > { %6090 = vst [vmem:[#allocation36_spill] sm:$0xff] %v5191_v62 }
  0x4c   : > { %v5208_v49 = vsel %vm304_vm1, %v366_v37, %v368_v61  ;;  %v1008_v61 = vrot.slane %v4961_v59, 2 }
  0x4d   : > { %3860 = vmatmul.mubr.msk.f32.gmra.mrb[20].mxu1 %vm387_vm2, %v5138_v20  ;;  %4086 = vmatmul.mubr.msk.f32.gmra.mrb[4].mxu0 %vm387_vm2, %v5145_v27  ;;  %v5182_v20 = vsel %vm304_vm1, %v365_v54, %v366_v37  ;;  %v5199_v54 = vld [vmem:[%s4807_s7 + $0x158] sm:$0xff]  ;;  %6091 = vst [vmem:[#allocation37_spill] sm:$0xff] %v5208_v49  ;;  %v5223_v27 = vld [vmem:[%s4807_s7 + $0x160] sm:$0x3]  ;;  %v5226_v37 = vsel %vm971_vm3, %v1002_v60, %v1003_v12 }
  0x4e   : > { %3862 = vmatprep.mubr.msk.f32.mxu1 %vm387_vm2, %v5148_v48  ;;  %4088 = vmatprep.mubr.msk.f32.mxu0 %vm387_vm2, %v5156_v22  ;;  %6089 = vst [vmem:[#allocation35_spill] sm:$0xff] %v5182_v20  ;;  %v371_v48 = vrot.slane %v5164_v19, 1  ;;  %v5215_v22 = vsel %vm971_vm3, %v998_v13, %v1000_v44  ;;  %v5234_v44 = vld [vmem:[%s4807_s7 + $0x170] sm:$0xff]  ;;  %v5246_v13 = vsel %vm971_vm3, %v1003_v12, %v1005_v34  ;;  %v378_v60 = vrot.slane %v5223_v27, 1 }
  0x4f   : > { %6092 = vst [vmem:[#allocation38_spill] sm:$0xff] %v5215_v22  ;;  %6094 = vst [vmem:[#allocation40_spill] sm:$0xff] %v5234_v44  ;;  %v1012_v34 = vrot.slane %v4984_v3, 2  ;;  %v1013_v12 = vrot.slane %v4987_v7, 2 }
  0x50   : > { %6096 = vst [vmem:[#allocation42_spill] sm:$0xff] %v5246_v13 }
  0x51   : > { %3863 = vmatmul.mubr.msk.f32.gmra.mrb[22].mxu1 %vm387_vm2, %v5173_v0  ;;  %4089 = vmatmul.mubr.msk.f32.gmra.mrb[6].mxu0 %vm387_vm2, %v5176_v24  ;;  %v5218_v0 = vsel %vm304_vm1, %v370_v38, %v371_v48  ;;  %v375_v24 = vrot.slane %v5196_v40, 1  ;;  %v5243_v38 = vsel %vm304_vm1, %v371_v48, %v373_v41  ;;  %v5261_v48 = vsel %vm971_vm3, %v1007_v57, %v1008_v61 }
  0x52   : > { %3865 = vmatprep.mubr.msk.f32.mxu1 %vm387_vm2, %v5182_v20  ;;  %4091 = vmatprep.mubr.msk.f32.mxu0 %vm387_vm2, %v5191_v62  ;;  %6093 = vst [vmem:[#allocation39_spill] sm:$0xff] %v5218_v0  ;;  %v376_v20 = vrot.slane %v5199_v54, 1  ;;  %v5231_v62 = vld [vmem:[%s4807_s7 + $0x168] sm:$0xff]  ;;  %6095 = vst [vmem:[#allocation41_spill] sm:$0xff] %v5243_v38 }
  0x54   : > { %v5252_v14 = vsel %vm304_vm1, %v375_v24, %v376_v20  ;;  %v383_v24 = vrot.slane %v5258_v21, 1 }
  0x55   : > { %3866 = vmatmul.mubr.msk.f32.gmra.mrb[24].mxu1 %vm387_vm2, %v5208_v49  ;;  %4092 = vmatmul.mubr.msk.f32.gmra.mrb[8].mxu0 %vm387_vm2, %v5215_v22  ;;  %6097 = vst [vmem:[#allocation43_spill] sm:$0xff] %v5252_v14  ;;  %v1010_v49 = vrot.slane %v4979_v2, 2  ;;  %v380_v22 = vrot.slane %v5231_v62, 1  ;;  %v5272_v2 = vsel %vm304_vm1, %v376_v20, %v378_v60  ;;  %v1018_v20 = vrot.slane %v5028_v29, 2 }
  0x56   : > { %3868 = vmatprep.mubr.msk.f32.mxu1 %vm387_vm2, %v5218_v0  ;;  %4094 = vmatprep.mubr.msk.f32.mxu0 %vm387_vm2, %v5226_v37  ;;  %v381_v0 = vrot.slane %v5234_v44, 1  ;;  %6098 = vst [vmem:[#allocation44_spill] sm:$0xff] %v5272_v2  ;;  %v1022_v60 = vrot.slane %v5053_v53, 2 }
  0x57   : > { %v5278_v41 = vsel %vm971_vm3, %v1008_v61, %v1010_v49  ;;  %v1020_v49 = vrot.slane %v5045_v45, 2 }
  0x58   : > { %v5281_v57 = vsel %vm304_vm1, %v380_v22, %v381_v0  ;;  %v5296_v22 = vsel %vm304_vm1, %v381_v0, %v383_v24  ;;  %v1028_v24 = vrot.slane %v5089_v39, 2  ;;  %v1033_v0 = vrot.slane %v5126_v10, 2 }
  0x59   : > { %3869 = vmatmul.mubr.msk.f32.gmra.mrb[26].mxu1 %vm387_vm2, %v5243_v38  ;;  %4095 = vmatmul.mubr.msk.f32.gmra.mrb[10].mxu0 %vm387_vm2, %v5246_v13  ;;  %6099 = vst [vmem:[#allocation45_spill] sm:$0xff] %v5281_v57  ;;  %v1015_v38 = vrot.slane %v5005_v17, 2  ;;  %v5285_v13 = vsel %vm971_vm3, %v1012_v34, %v1013_v12  ;;  %6100 = vst [vmem:[#allocation46_spill] sm:$0xff] %v5296_v22  ;;  %v1023_v34 = vrot.slane %v5056_v55, 2 }
  0x5a   : > { %3871 = vmatprep.mubr.msk.f32.mxu1 %vm387_vm2, %v5252_v14  ;;  %4097 = vmatprep.mubr.msk.f32.mxu0 %vm387_vm2, %v5261_v48  ;;  %v1017_v14 = vrot.slane %v5025_v28, 2  ;;  %v5318_v45 = vsel %vm971_vm3, %v1018_v20, %v1020_v49 }
  0x5b   : > { %v5301_v17 = vsel %vm971_vm3, %v1013_v12, %v1015_v38  ;;  %v5323_v38 = vsel %vm971_vm3, %v1022_v60, %v1023_v34  ;;  %v1027_v12 = vrot.slane %v5086_v30, 2  ;;  %v1032_v60 = vrot.slane %v5123_v8, 2 }
  0x5c   : > { %v5305_v61 = vsel %vm971_vm3, %v1017_v14, %v1018_v20  ;;  %v1025_v14 = vrot.slane %v5077_v16, 2  ;;  %v1030_v20 = vrot.slane %v5115_v56, 2 }
  0x5d   : > { %3872 = vmatmul.mubr.msk.f32.gmra.mrb[28].mxu1 %vm387_vm2, %v5272_v2  ;;  %4098 = vmatmul.mubr.msk.f32.gmra.mrb[12].mxu0 %vm387_vm2, %v5278_v41  ;;  %v5342_v49 = vsel %vm971_vm3, %v1027_v12, %v1028_v24  ;;  %v1038_v12 = vrot.slane %v5164_v19, 2  ;;  %v1048_v2 = vrot.slane %v5234_v44, 2 }
  0x5e   : > { %3874 = vmatprep.mubr.msk.f32.mxu1 %vm387_vm2, %v5281_v57  ;;  %4100 = vmatprep.mubr.msk.f32.mxu0 %vm387_vm2, %v5285_v13  ;;  %v5338_v16 = vsel %vm971_vm3, %v1023_v34, %v1025_v14  ;;  %6101 = vst [vmem:[#allocation47_spill] sm:$0xff] %v5342_v49  ;;  %v5358_v56 = vsel %vm971_vm3, %v1028_v24, %v1030_v20  ;;  %v1035_v34 = vrot.slane %v5153_v52, 2  ;;  %v1040_v24 = vrot.slane %v5188_v36, 2 }
  0x5f   : > { %v5362_v14 = vsel %vm971_vm3, %v1032_v60, %v1033_v0  ;;  %v1042_v60 = vrot.slane %v5196_v40, 2  ;;  %v1043_v57 = vrot.slane %v5199_v54, 2 }
  0x60   : > { %v5375_v52 = vsel %vm971_vm3, %v1033_v0, %v1035_v34  ;;  %v5392_v36 = vsel %vm971_vm3, %v1038_v12, %v1040_v24  ;;  %v1045_v0 = vrot.slane %v5223_v27, 2 }
  0x61   : > { %3875 = vmatmul.mubr.msk.f32.gmra.mrb[30].mxu1 %vm387_vm2, %v5296_v22  ;;  %4101 = vmatmul.mubr.msk.f32.gmra.mrb[14].mxu0 %vm387_vm2, %v5301_v17  ;;  %v6102_v22 = vrot.slane %v4882_v35, 4  ;;  %6103 = vst [vmem:[#allocation48_spill] sm:$0xff] %v5375_v52  ;;  %6105 = vst [vmem:[#allocation50_spill] sm:$0xff] %v5392_v36  ;;  %v5396_v34 = vsel %vm971_vm3, %v1042_v60, %v1043_v57 }
  0x62   : > { %3879 = vmatprep.mubr.msk.f32.mxu1 %vm387_vm2, %v4810_v4  ;;  %4103 = vmatprep.mubr.msk.f32.mxu0 %vm387_vm2, %v5305_v61  ;;  %6106 = vst [vmem:[#allocation51_spill] sm:$0xff] %v5396_v34  ;;  %v5415_v27 = vsel %vm971_vm3, %v1043_v57, %v1045_v0 }
  0x63   : > { %6107 = vst [vmem:[#allocation52_spill] sm:$0xff] %v5415_v27 }
  0x65   : > { %3880 = vmatmul.mubr.msk.f32.vlgmr.msra.gmra.mrb[0].mxu1 %vm387_vm2, %v4813_v5  ;;  %4104 = vmatmul.mubr.msk.f32.gmra.mrb[16].mxu0 %vm387_vm2, %v5318_v45 }
  0x66   : > { %3928 = vmatpush3.msk.msra.mxu1 %vm452_vm0, %v4882_v35  ;;  %3882 = vmatprep.mubr.msk.f32.mxu1 %vm387_vm2, %v4816_v6  ;;  %v5406_v6 = vld [vmem:[%s4807_s7 + $0x188] sm:$0xff] }
  0x67   : > { %4106 = vmatprep.mubr.msk.f32.mxu0 %vm387_vm2, %v5323_v38  ;;  %3977 = vmatprep.subr.msk.mxu1 %vm452_vm0, %v6102_v22  ;;  %v1037_v22 = vrot.slane %v5161_v46, 2 }
  0x69   : > { %3883 = vmatmul.mubr.msk.f32.gmra.mrb[2].mxu1 %vm387_vm2, %v4821_v9  ;;  %4107 = vmatmul.mubr.msk.f32.gmra.mrb[18].mxu0 %vm387_vm2, %v5338_v16  ;;  %v5379_v20 = vsel %vm971_vm3, %v1037_v22, %v1038_v12  ;;  %v1047_v22 = vrot.slane %v5231_v62, 2  ;;  %v5403_v9 = vld [vmem:[%s4807_s7 + $0x180] sm:$0xff]  ;;  %v1050_v12 = vrot.slane %v5258_v21, 2 }
  0x6a   : > { %3885 = vmatprep.mubr.msk.f32.mxu1 %vm387_vm2, %v4833_v15  ;;  %4109 = vmatprep.mubr.msk.f32.mxu0 %vm387_vm2, %v5342_v49  ;;  %6104 = vst [vmem:[#allocation49_spill] sm:$0xff] %v5379_v20  ;;  %v1912_v60 = vrot.slane %v5403_v9, 2 }
  0x6b   : > { %v5419_v24 = vsel %vm971_vm3, %v1047_v22, %v1048_v2  ;;  %v5435_v21 = vsel %vm971_vm3, %v1048_v2, %v1050_v12  ;;  %v6112_v22 = vrot.slane %v4872_v33, 4  ;;  %v972_v33 = vrot.slane %v4810_v4, 2 }
  0x6c   : > { %6108 = vst [vmem:[#allocation53_spill] sm:$0xff] %v5419_v24  ;;  %6109 = vst [vmem:[#allocation54_spill] sm:$0xff] %v5435_v21  ;;  %v973_v12 = vrot.slane %v4813_v5, 2  ;;  %v6113_v5 = vrot.slane %v4882_v35, 4  ;;  %v6115_v35 = vld [vmem:[#allocation28_spill] sm:$0xff] }
  0x6d   : > { %3886 = vmatmul.mubr.msk.f32.gmra.mrb[4].mxu1 %vm387_vm2, %v4838_v18  ;;  %4110 = vmatmul.mubr.msk.f32.gmra.mrb[20].mxu0 %vm387_vm2, %v5358_v56 }
  0x6e   : > { %3888 = vmatprep.mubr.msk.f32.mxu1 %vm387_vm2, %v4850_v25  ;;  %4112 = vmatprep.mubr.msk.f32.mxu0 %vm387_vm2, %v5362_v14 }
  0x71   : > { %3889 = vmatmul.mubr.msk.f32.gmra.mrb[6].mxu1 %vm387_vm2, %v4853_v26  ;;  %4113 = vmatmul.mubr.msk.f32.gmra.mrb[22].mxu0 %vm387_vm2, %v5375_v52  ;;  %v5424_v52 = vld [vmem:[%s4807_s7 + $0x190] sm:$0x3] }
  0x72   : > { %3891 = vmatprep.mubr.msk.f32.mxu1 %vm387_vm2, %v4864_v31  ;;  %4115 = vmatprep.mubr.msk.f32.mxu0 %vm387_vm2, %v5379_v20  ;;  %v1913_v20 = vrot.slane %v5406_v6, 2  ;;  %v1915_v57 = vrot.slane %v5424_v52, 2 }
  0x74   : > { %v5439_v0 = vsel %vm971_vm3, %v1912_v60, %v1913_v20  ;;  %v5450_v2 = vsel %vm971_vm3, %v1913_v20, %v1915_v57  ;;  %v5465_v20 = vld [vmem:[%s5983_s1 + $0x20] sm:$0xf]  ;;  %v975_v60 = vrot.slane %v4825_v11, 2  ;;  %v974_v57 = vsel %vm971_vm3, %v972_v33, %v973_v12  ;;  %v6114_v11 = vld [vmem:[#allocation26_spill] sm:$0xff]  ;;  %v6119_v33 = vld [vmem:[#allocation36_spill] sm:$0xff] }
  0x75   : > { %3892 = vmatmul.mubr.msk.f32.gmra.mrb[8].mxu1 %vm387_vm2, %v4867_v32  ;;  %4116 = vmatmul.mubr.msk.f32.gmra.mrb[24].mxu0 %vm387_vm2, %v5392_v36  ;;  %6110 = vst [vmem:[#allocation55_spill] sm:$0xff] %v5439_v0  ;;  %6111 = vst [vmem:[#allocation56_spill] sm:$0xff] %v5450_v2 }
  0x76   : > { %3894 = vmatprep.mubr.msk.f32.mxu1 %vm387_vm2, %v4904_v42  ;;  %4118 = vmatprep.mubr.msk.f32.mxu0 %vm387_vm2, %v5396_v34  ;;  %v976_v4 = vsel %vm971_vm3, %v973_v12, %v975_v60  ;;  %v6120_v12 = vld [vmem:[#allocation38_spill] sm:$0xff] }
  0x77   : > { %v5591_v60 = vld [vmem:[%s4807_s7 + $0x198] sm:$0xff] }
  0x79   : > { %3895 = vmatmul.mubr.msk.f32.gmra.mrb[10].mxu1 %vm387_vm2, %v4907_v43  ;;  %4119 = vmatmul.mubr.msk.f32.gmra.mrb[26].mxu0 %vm387_vm2, %v5415_v27 }
  0x7a   : > { %3897 = vmatprep.mubr.msk.f32.mxu1 %vm387_vm2, %v4932_v50  ;;  %4121 = vmatprep.mubr.msk.f32.mxu0 %vm387_vm2, %v5419_v24 }
  0x7d   : > { %3898 = vmatmul.mubr.msk.f32.gmra.mrb[12].mxu1 %vm387_vm2, %v4935_v51  ;;  %4122 = vmatmul.mubr.msk.f32.gmra.mrb[28].mxu0 %vm387_vm2, %v5435_v21 }
  0x7e   : > { %3900 = vmatprep.mubr.msk.f32.mxu1 %vm387_vm2, %v4958_v58  ;;  %4124 = vmatprep.mubr.msk.f32.mxu0 %vm387_vm2, %v5439_v0  ;;  %v6124_v0 = vld [vmem:[#allocation12_spill] sm:$0xff] }
  0x81   : > { %3901 = vmatmul.mubr.msk.f32.gmra.mrb[14].mxu1 %vm387_vm2, %v4961_v59  ;;  %4125 = vmatmul.mubr.msk.f32.gmra.mrb[30].mxu0 %vm387_vm2, %v5450_v2  ;;  %v6123_v2 = vld [vmem:[#allocation11_spill] sm:$0xff] }
  0x82   : > { %3903 = vmatprep.mubr.msk.f32.mxu1 %vm387_vm2, %v4984_v3  ;;  %4129 = vmatprep.mubr.msk.f32.mxu0 %vm387_vm2, %v4833_v15 }
  0x85   : > { %3904 = vmatmul.mubr.msk.f32.gmra.mrb[16].mxu1 %vm387_vm2, %v4987_v7  ;;  %4130 = vmatmul.mubr.msk.f32.vlgmr.msra.gmra.mrb[0].mxu0 %vm387_vm2, %v4838_v18 }
  0x86   : > { %3906 = vmatprep.mubr.msk.f32.mxu1 %vm387_vm2, %v5025_v28  ;;  %4178 = vmatpush3.msk.msra.mxu0 %vm452_vm0, %v6112_v22  ;;  %v6118_v22 = vld [vmem:[#allocation34_spill] sm:$0xff] }
  0x87   : > { %4132 = vmatprep.mubr.msk.f32.mxu0 %vm387_vm2, %v4850_v25  ;;  %4227 = vmatprep.subr.msk.mxu0 %vm452_vm0, %v5465_v20 }
  0x89   : > { %3907 = vmatmul.mubr.msk.f32.gmra.mrb[18].mxu1 %vm387_vm2, %v5028_v29  ;;  %4133 = vmatmul.mubr.msk.f32.gmra.mrb[2].mxu0 %vm387_vm2, %v4853_v26 }
  0x8a   : > { %3909 = vmatprep.mubr.msk.f32.mxu1 %vm387_vm2, %v5053_v53  ;;  %4135 = vmatprep.mubr.msk.f32.mxu0 %vm387_vm2, %v4864_v31 }
  0x8d   : > { %3910 = vmatmul.mubr.msk.f32.gmra.mrb[20].mxu1 %vm387_vm2, %v5056_v55  ;;  %4136 = vmatmul.mubr.msk.f32.gmra.mrb[4].mxu0 %vm387_vm2, %v4867_v32 }
  0x8e   : > { %3912 = vmatprep.mubr.msk.f32.mxu1 %vm387_vm2, %v5086_v30  ;;  %4138 = vmatprep.mubr.msk.f32.mxu0 %vm387_vm2, %v4904_v42 }
  0x91   : > { %3913 = vmatmul.mubr.msk.f32.gmra.mrb[22].mxu1 %vm387_vm2, %v5089_v39  ;;  %4139 = vmatmul.mubr.msk.f32.gmra.mrb[6].mxu0 %vm387_vm2, %v4907_v43 }
  0x92   : > { %3915 = vmatprep.mubr.msk.f32.mxu1 %vm387_vm2, %v5123_v8  ;;  %4141 = vmatprep.mubr.msk.f32.mxu0 %vm387_vm2, %v4932_v50 }
  0x95   : > { %3916 = vmatmul.mubr.msk.f32.gmra.mrb[24].mxu1 %vm387_vm2, %v5126_v10  ;;  %4142 = vmatmul.mubr.msk.f32.gmra.mrb[8].mxu0 %vm387_vm2, %v4935_v51 }
  0x96   : > { %3918 = vmatprep.mubr.msk.f32.mxu1 %vm387_vm2, %v5161_v46  ;;  %4144 = vmatprep.mubr.msk.f32.mxu0 %vm387_vm2, %v4958_v58 }
  0x99   : > { %3919 = vmatmul.mubr.msk.f32.gmra.mrb[26].mxu1 %vm387_vm2, %v5164_v19  ;;  %4145 = vmatmul.mubr.msk.f32.gmra.mrb[10].mxu0 %vm387_vm2, %v4961_v59 }
  0x9a   : > { %3921 = vmatprep.mubr.msk.f32.mxu1 %vm387_vm2, %v5196_v40  ;;  %4147 = vmatprep.mubr.msk.f32.mxu0 %vm387_vm2, %v4984_v3 }
  0x9d   : > { %3922 = vmatmul.mubr.msk.f32.gmra.mrb[28].mxu1 %vm387_vm2, %v5199_v54  ;;  %4148 = vmatmul.mubr.msk.f32.gmra.mrb[12].mxu0 %vm387_vm2, %v4987_v7 }
  0x9e   : > { %3924 = vmatprep.mubr.msk.f32.mxu1 %vm387_vm2, %v5231_v62  ;;  %4150 = vmatprep.mubr.msk.f32.mxu0 %vm387_vm2, %v5025_v28 }
  0xa1   : > { %3925 = vmatmul.mubr.msk.f32.gmra.mrb[30].mxu1 %vm387_vm2, %v5234_v44  ;;  %4151 = vmatmul.mubr.msk.f32.gmra.mrb[14].mxu0 %vm387_vm2, %v5028_v29 }
  0xa2   : > { %3929 = vmatprep.mubr.msk.f32.mxu1 %vm387_vm2, %v974_v57  ;;  %4153 = vmatprep.mubr.msk.f32.mxu0 %vm387_vm2, %v5053_v53  ;;  %v6121_v57 = vld [vmem:[#allocation42_spill] sm:$0xff] }
  0xa5   : > { %3930 = vmatmul.mubr.msk.f32.vlgmr.msra.gmra.mrb[0].mxu1 %vm387_vm2, %v976_v4  ;;  %4154 = vmatmul.mubr.msk.f32.gmra.mrb[16].mxu0 %vm387_vm2, %v5056_v55  ;;  %v5602_v4 = vld [vmem:[%s4807_s7 + $0x1a0] sm:$0xff] }
  0xa6   : > { %3978 = vmatpush3.msk.msra.mxu1 %vm452_vm0, %v6113_v5  ;;  %3932 = vmatprep.mubr.msk.f32.mxu1 %vm387_vm2, %v5048_v47  ;;  %v6116_v47 = vld [vmem:[#allocation30_spill] sm:$0xff] }
  0xa7   : > { %4156 = vmatprep.mubr.msk.f32.mxu0 %vm387_vm2, %v5086_v30  ;;  %4277 = vmatprep.subr.msk.mxu1 %vm452_vm0, %v4791_v1  ;;  %v6122_v5 = vld [vmem:[#allocation10_spill] sm:$0xff] }
  0xa9   : > { %3933 = vmatmul.mubr.msk.f32.gmra.mrb[2].mxu1 %vm387_vm2, %v5069_v63  ;;  %4157 = vmatmul.mubr.msk.f32.gmra.mrb[18].mxu0 %vm387_vm2, %v5089_v39  ;;  %v6117_v63 = vld [vmem:[#allocation32_spill] sm:$0xff] }
  0xaa   : > { %3935 = vmatprep.mubr.msk.f32.mxu1 %vm387_vm2, %v5081_v23  ;;  %4159 = vmatprep.mubr.msk.f32.mxu0 %vm387_vm2, %v5123_v8 }
  0xad   : > { %3936 = vmatmul.mubr.msk.f32.gmra.mrb[4].mxu1 %vm387_vm2, %v6114_v11  ;;  %4160 = vmatmul.mubr.msk.f32.gmra.mrb[20].mxu0 %vm387_vm2, %v5126_v10 }
  0xae   : > { %3938 = vmatprep.mubr.msk.f32.mxu1 %vm387_vm2, %v6115_v35  ;;  %4162 = vmatprep.mubr.msk.f32.mxu0 %vm387_vm2, %v5161_v46 }
  0xb1   : > { %3939 = vmatmul.mubr.msk.f32.gmra.mrb[6].mxu1 %vm387_vm2, %v6116_v47  ;;  %4163 = vmatmul.mubr.msk.f32.gmra.mrb[22].mxu0 %vm387_vm2, %v5164_v19 }
  0xb2   : > { %3941 = vmatprep.mubr.msk.f32.mxu1 %vm387_vm2, %v6117_v63  ;;  %4165 = vmatprep.mubr.msk.f32.mxu0 %vm387_vm2, %v5196_v40 }
  0xb5   : > { %3942 = vmatmul.mubr.msk.f32.gmra.mrb[8].mxu1 %vm387_vm2, %v6118_v22  ;;  %4166 = vmatmul.mubr.msk.f32.gmra.mrb[24].mxu0 %vm387_vm2, %v5199_v54 }
  0xb6   : > { %3944 = vmatprep.mubr.msk.f32.mxu1 %vm387_vm2, %v6119_v33  ;;  %4168 = vmatprep.mubr.msk.f32.mxu0 %vm387_vm2, %v5231_v62 }
  0xb9   : > { %3945 = vmatmul.mubr.msk.f32.gmra.mrb[10].mxu1 %vm387_vm2, %v6120_v12  ;;  %4169 = vmatmul.mubr.msk.f32.gmra.mrb[26].mxu0 %vm387_vm2, %v5234_v44  ;;  %v6125_v44 = vld [vmem:[#allocation13_spill] sm:$0xff] }
  0xba   : > { %3947 = vmatprep.mubr.msk.f32.mxu1 %vm387_vm2, %v5226_v37  ;;  %4171 = vmatprep.mubr.msk.f32.mxu0 %vm387_vm2, %v5403_v9 }
  0xbd   : > { %3948 = vmatmul.mubr.msk.f32.gmra.mrb[12].mxu1 %vm387_vm2, %v6121_v57  ;;  %4172 = vmatmul.mubr.msk.f32.gmra.mrb[28].mxu0 %vm387_vm2, %v5406_v6 }
  0xbe   : > { %3950 = vmatprep.mubr.msk.f32.mxu1 %vm387_vm2, %v5261_v48  ;;  %4174 = vmatprep.mubr.msk.f32.mxu0 %vm387_vm2, %v5591_v60 }
  0xc1   : > { %3951 = vmatmul.mubr.msk.f32.gmra.mrb[14].mxu1 %vm387_vm2, %v5278_v41  ;;  %4175 = vmatmul.mubr.msk.f32.gmra.mrb[30].mxu0 %vm387_vm2, %v5602_v4 }
  0xc2   : > { %3953 = vmatprep.mubr.msk.f32.mxu1 %vm387_vm2, %v5285_v13  ;;  %4179 = vmatprep.mubr.msk.f32.mxu0 %vm387_vm2, %v6122_v5  ;;  %v6126_v5 = vld [vmem:[#allocation14_spill] sm:$0xff] }
  0xc5   : > { %3954 = vmatmul.mubr.msk.f32.gmra.mrb[16].mxu1 %vm387_vm2, %v5301_v17  ;;  %4180 = vmatmul.mubr.msk.f32.vlgmr.msra.gmra.mrb[0].mxu0 %vm387_vm2, %v6123_v2  ;;  %v6127_v2 = vld [vmem:[#allocation15_spill] sm:$0xff] }
  0xc6   : > { %3956 = vmatprep.mubr.msk.f32.mxu1 %vm387_vm2, %v5305_v61  ;;  %4228 = vmatpush3.msk.msra.mxu0 %vm452_vm0, %v5465_v20  ;;  %v6130_v20 = vld [vmem:[#allocation18_spill] sm:$0xff] }
  0xc7   : > { %4182 = vmatprep.mubr.msk.f32.mxu0 %vm387_vm2, %v6124_v0  ;;  %v6128_v0 = vld [vmem:[#allocation16_spill] sm:$0xff] }
  0xc9   : > { %3957 = vmatmul.mubr.msk.f32.gmra.mrb[18].mxu1 %vm387_vm2, %v5318_v45  ;;  %4183 = vmatmul.mubr.msk.f32.gmra.mrb[2].mxu0 %vm387_vm2, %v6125_v44  ;;  %v6129_v44 = vld [vmem:[#allocation17_spill] sm:$0xff] }
  0xca   : > { %3959 = vmatprep.mubr.msk.f32.mxu1 %vm387_vm2, %v5323_v38  ;;  %4185 = vmatprep.mubr.msk.f32.mxu0 %vm387_vm2, %v6126_v5  ;;  %v6131_v5 = vld [vmem:[#allocation48_spill] sm:$0xff] }
  0xcd   : > { %3960 = vmatmul.mubr.msk.f32.gmra.mrb[20].mxu1 %vm387_vm2, %v5338_v16  ;;  %4186 = vmatmul.mubr.msk.f32.gmra.mrb[4].mxu0 %vm387_vm2, %v6127_v2  ;;  %v6132_v2 = vld [vmem:[#allocation19_spill] sm:$0xff] }
  0xce   : > { %3962 = vmatprep.mubr.msk.f32.mxu1 %vm387_vm2, %v5342_v49  ;;  %4188 = vmatprep.mubr.msk.f32.mxu0 %vm387_vm2, %v6128_v0  ;;  %v6133_v49 = vld [vmem:[#allocation49_spill] sm:$0xff]  ;;  %v6134_v0 = vld [vmem:[#allocation20_spill] sm:$0xff] }
  0xd1   : > { %3963 = vmatmul.mubr.msk.f32.gmra.mrb[22].mxu1 %vm387_vm2, %v5358_v56  ;;  %4189 = vmatmul.mubr.msk.f32.gmra.mrb[6].mxu0 %vm387_vm2, %v6129_v44  ;;  %v6135_v44 = vld [vmem:[#allocation21_spill] sm:$0xff] }
  0xd2   : > { %3965 = vmatprep.mubr.msk.f32.mxu1 %vm387_vm2, %v5362_v14  ;;  %4191 = vmatprep.mubr.msk.f32.mxu0 %vm387_vm2, %v6130_v20  ;;  %v6136_v20 = vld [vmem:[#allocation22_spill] sm:$0xff] }
  0xd5   : > { %3966 = vmatmul.mubr.msk.f32.gmra.mrb[24].mxu1 %vm387_vm2, %v6131_v5  ;;  %4192 = vmatmul.mubr.msk.f32.gmra.mrb[8].mxu0 %vm387_vm2, %v6132_v2  ;;  %v6137_v2 = vld [vmem:[#allocation23_spill] sm:$0xff] }
  0xd6   : > { %3968 = vmatprep.mubr.msk.f32.mxu1 %vm387_vm2, %v6133_v49  ;;  %4194 = vmatprep.mubr.msk.f32.mxu0 %vm387_vm2, %v6134_v0  ;;  %v6138_v0 = vld [vmem:[#allocation24_spill] sm:$0xff] }
  0xd9   : > { %3969 = vmatmul.mubr.msk.f32.gmra.mrb[26].mxu1 %vm387_vm2, %v5392_v36  ;;  %4195 = vmatmul.mubr.msk.f32.gmra.mrb[10].mxu0 %vm387_vm2, %v6135_v44  ;;  %v6139_v44 = vld [vmem:[#allocation25_spill] sm:$0xff]  ;;  %v5729_v36 = vld [vmem:[%s4807_s7 + $0x1a8] sm:$0x3]  ;;  %s5910_s7 = scalar_lea.hbm %s5985_s3, %s3526_s23 }
  0xda   : > { %3971 = vmatprep.mubr.msk.f32.mxu1 %vm387_vm2, %v5396_v34  ;;  %4197 = vmatprep.mubr.msk.f32.mxu0 %vm387_vm2, %v6136_v20  ;;  %v6140_v34 = vld [vmem:[#allocation8_spill] sm:$0xff]  ;;  %v6141_v20 = vld [vmem:[#allocation27_spill] sm:$0xff] }
  0xdd   : > { %3972 = vmatmul.mubr.msk.f32.gmra.mrb[28].mxu1 %vm387_vm2, %v5415_v27  ;;  %4198 = vmatmul.mubr.msk.f32.gmra.mrb[12].mxu0 %vm387_vm2, %v6137_v2  ;;  %v6142_v27 = vld [vmem:[#allocation9_spill] sm:$0xff] }
  0xde   : > { %3974 = vmatprep.mubr.msk.f32.mxu1 %vm387_vm2, %v5419_v24  ;;  %4200 = vmatprep.mubr.msk.f32.mxu0 %vm387_vm2, %v6138_v0  ;;  %v6143_v2 = vld [vmem:[#allocation29_spill] sm:$0xff]  ;;  %v6151_v24 = vld [vmem:[#allocation44_spill] sm:$0xff] }
  0xe1   : > { %3975 = vmatmul.mubr.msk.f32.gmra.mrb[30].mxu1 %vm387_vm2, %v5435_v21  ;;  %4201 = vmatmul.mubr.msk.f32.gmra.mrb[14].mxu0 %vm387_vm2, %v6139_v44  ;;  %v6144_v21 = vld [vmem:[#allocation31_spill] sm:$0xff] }
  0xe2   : > { %3979 = vmatprep.mubr.msk.f32.mxu1 %vm387_vm2, %v6140_v34  ;;  %4203 = vmatprep.mubr.msk.f32.mxu0 %vm387_vm2, %v6141_v20  ;;  %v6145_v34 = vld [vmem:[#allocation33_spill] sm:$0xff] }
  0xe5   : > { %3980 = vmatmul.mubr.msk.f32.vlgmr.msra.gmra.mrb[0].mxu1 %vm387_vm2, %v6142_v27  ;;  %4204 = vmatmul.mubr.msk.f32.gmra.mrb[16].mxu0 %vm387_vm2, %v6143_v2  ;;  %v6146_v27 = vld [vmem:[#allocation35_spill] sm:$0xff] }
  0xe6   : > { %4278 = vmatpush3.msk.msra.mxu1 %vm452_vm0, %v4791_v1  ;;  %3982 = vmatprep.mubr.msk.f32.mxu1 %vm387_vm2, %v4833_v15  ;;  %v6147_v1 = vld [vmem:[#allocation37_spill] sm:$0xff]  ;;  %v6148_v15 = vld [vmem:[#allocation39_spill] sm:$0xff] }
  0xe7   : > { %4206 = vmatprep.mubr.msk.f32.mxu0 %vm387_vm2, %v6144_v21 }
  0xe9   : > { %3983 = vmatmul.mubr.msk.f32.gmra.mrb[2].mxu1 %vm387_vm2, %v4838_v18  ;;  %4207 = vmatmul.mubr.msk.f32.gmra.mrb[18].mxu0 %vm387_vm2, %v6145_v34  ;;  %v6149_v18 = vld [vmem:[#allocation41_spill] sm:$0xff] }
  0xea   : > { %3985 = vmatprep.mubr.msk.f32.mxu1 %vm387_vm2, %v4850_v25  ;;  %4209 = vmatprep.mubr.msk.f32.mxu0 %vm387_vm2, %v6146_v27  ;;  %v6150_v25 = vld [vmem:[#allocation43_spill] sm:$0xff] }
  0xed   : > { %3986 = vmatmul.mubr.msk.f32.gmra.mrb[4].mxu1 %vm387_vm2, %v4853_v26  ;;  %4210 = vmatmul.mubr.msk.f32.gmra.mrb[20].mxu0 %vm387_vm2, %v6147_v1  ;;  %v1643_v26 = vrot.slane %v5403_v9, 1 }
  0xee   : > { %3988 = vmatprep.mubr.msk.f32.mxu1 %vm387_vm2, %v4864_v31  ;;  %4212 = vmatprep.mubr.msk.f32.mxu0 %vm387_vm2, %v6148_v15  ;;  %v1644_v31 = vrot.slane %v5406_v6, 1 }
  0xf0   : > { %v5726_v15 = vsel %vm304_vm1, %v1643_v26, %v1644_v31 }
  0xf1   : > { %3989 = vmatmul.mubr.msk.f32.gmra.mrb[6].mxu1 %vm387_vm2, %v4867_v32  ;;  %4213 = vmatmul.mubr.msk.f32.gmra.mrb[22].mxu0 %vm387_vm2, %v6149_v18  ;;  %v6152_v32 = vld [vmem:[#allocation45_spill] sm:$0xff]  ;;  %v2449_v18 = vrot.slane %v5602_v4, 1 }
  0xf2   : > { %3991 = vmatprep.mubr.msk.f32.mxu1 %vm387_vm2, %v4904_v42  ;;  %4215 = vmatprep.mubr.msk.f32.mxu0 %vm387_vm2, %v6150_v25  ;;  %v1646_v42 = vrot.slane %v5424_v52, 1  ;;  %v2448_v25 = vrot.slane %v5591_v60, 1  ;;  %v2451_v52 = vrot.slane %v5729_v36, 1 }
  0xf4   : > { %v2450_v26 = vsel %vm304_vm1, %v2448_v25, %v2449_v18 }
  0xf5   : > { %3992 = vmatmul.mubr.msk.f32.gmra.mrb[8].mxu1 %vm387_vm2, %v4907_v43  ;;  %4216 = vmatmul.mubr.msk.f32.gmra.mrb[24].mxu0 %vm387_vm2, %v6151_v24  ;;  %v6153_v43 = vld [vmem:[#allocation46_spill] sm:$0xff] }
  0xf6   : > { %3994 = vmatprep.mubr.msk.f32.mxu1 %vm387_vm2, %v4932_v50  ;;  %4218 = vmatprep.mubr.msk.f32.mxu0 %vm387_vm2, %v6152_v32  ;;  %v5740_v50 = vsel %vm304_vm1, %v1644_v31, %v1646_v42 }
  0xf9   : > { %3995 = vmatmul.mubr.msk.f32.gmra.mrb[10].mxu1 %vm387_vm2, %v4935_v51  ;;  %4219 = vmatmul.mubr.msk.f32.gmra.mrb[26].mxu0 %vm387_vm2, %v6153_v43  ;;  %v2452_v51 = vsel %vm304_vm1, %v2449_v18, %v2451_v52 }
  0xfa   : > { %3997 = vmatprep.mubr.msk.f32.mxu1 %vm387_vm2, %v4958_v58  ;;  %4221 = vmatprep.mubr.msk.f32.mxu0 %vm387_vm2, %v5726_v15  ;;  %v6157_v58 = vld [vmem:[#allocation39_spill] sm:$0xff] }
  0xfd   : > { %3998 = vmatmul.mubr.msk.f32.gmra.mrb[12].mxu1 %vm387_vm2, %v4961_v59  ;;  %4222 = vmatmul.mubr.msk.f32.gmra.mrb[28].mxu0 %vm387_vm2, %v5740_v50  ;;  %v6158_v59 = vld [vmem:[#allocation51_spill] sm:$0xff] }
  0xfe   : > { %4000 = vmatprep.mubr.msk.f32.mxu1 %vm387_vm2, %v4984_v3  ;;  %4224 = vmatprep.mubr.msk.f32.mxu0 %vm387_vm2, %v2450_v26  ;;  %v6159_v3 = vld [vmem:[#allocation41_spill] sm:$0xff] }
 0x101   : > { %4001 = vmatmul.mubr.msk.f32.gmra.mrb[14].mxu1 %vm387_vm2, %v4987_v7  ;;  %4225 = vmatmul.mubr.msk.f32.gmra.mrb[30].mxu0 %vm387_vm2, %v2452_v51  ;;  %v6160_v7 = vld [vmem:[#allocation52_spill] sm:$0xff] }
 0x102   : > { %4003 = vmatprep.mubr.msk.f32.mxu1 %vm387_vm2, %v5025_v28  ;;  %4229 = vmatprep.mubr.msk.f32.mxu0 %vm387_vm2, %v5081_v23  ;;  %v6162_v28 = vld [vmem:[#allocation53_spill] sm:$0xff]  ;;  %v6164_v23 = vld [vmem:[#allocation55_spill] sm:$0xff] }
 0x105   : > { %4004 = vmatmul.mubr.msk.f32.gmra.mrb[16].mxu1 %vm387_vm2, %v5028_v29  ;;  %4230 = vmatmul.mubr.msk.f32.vlgmr.msra.gmra.mrb[0].mxu0 %vm387_vm2, %v6114_v11  ;;  %v2717_v29 = vrot.slane %v5591_v60, 2 }
 0x106   : > { %4006 = vmatprep.mubr.msk.f32.mxu1 %vm387_vm2, %v5053_v53  ;;  %4232 = vmatprep.mubr.msk.f32.mxu0 %vm387_vm2, %v6115_v35  ;;  %v2718_v53 = vrot.slane %v5602_v4, 2 }
 0x109   : > { %4007 = vmatmul.mubr.msk.f32.gmra.mrb[18].mxu1 %vm387_vm2, %v5056_v55  ;;  %4233 = vmatmul.mubr.msk.f32.gmra.mrb[2].mxu0 %vm387_vm2, %v6116_v47  ;;  %v6163_v55 = vld [vmem:[#allocation54_spill] sm:$0xff] }
 0x10a   : > { %4009 = vmatprep.mubr.msk.f32.mxu1 %vm387_vm2, %v5086_v30  ;;  %4235 = vmatprep.mubr.msk.f32.mxu0 %vm387_vm2, %v6117_v63  ;;  %v2720_v30 = vrot.slane %v5729_v36, 2 }
 0x10d   : > { %4010 = vmatmul.mubr.msk.f32.gmra.mrb[20].mxu1 %vm387_vm2, %v5089_v39  ;;  %4236 = vmatmul.mubr.msk.f32.gmra.mrb[4].mxu0 %vm387_vm2, %v6118_v22  ;;  %v2719_v39 = vsel %vm971_vm3, %v2717_v29, %v2718_v53 }
 0x10e   : > { %4012 = vmatprep.mubr.msk.f32.mxu1 %vm387_vm2, %v5123_v8  ;;  %4238 = vmatprep.mubr.msk.f32.mxu0 %vm387_vm2, %v6119_v33  ;;  %v6161_v8 = vld [vmem:[#allocation43_spill] sm:$0xff] }
 0x111   : > { %4013 = vmatmul.mubr.msk.f32.gmra.mrb[22].mxu1 %vm387_vm2, %v5126_v10  ;;  %4239 = vmatmul.mubr.msk.f32.gmra.mrb[6].mxu0 %vm387_vm2, %v6120_v12  ;;  %v6165_v10 = vld [vmem:[#allocation56_spill] sm:$0xff] }
 0x112   : > { %4015 = vmatprep.mubr.msk.f32.mxu1 %vm387_vm2, %v5161_v46  ;;  %4241 = vmatprep.mubr.msk.f32.mxu0 %vm387_vm2, %v5226_v37  ;;  %v6154_v46 = vld [vmem:[#allocation40_spill] sm:$0xff] }
 0x115   : > { %4016 = vmatmul.mubr.msk.f32.gmra.mrb[24].mxu1 %vm387_vm2, %v5164_v19  ;;  %4242 = vmatmul.mubr.msk.f32.gmra.mrb[8].mxu0 %vm387_vm2, %v6121_v57  ;;  %v2721_v19 = vsel %vm971_vm3, %v2718_v53, %v2720_v30 }
 0x116   : > { %4018 = vmatprep.mubr.msk.f32.mxu1 %vm387_vm2, %v5196_v40  ;;  %4244 = vmatprep.mubr.msk.f32.mxu0 %vm387_vm2, %v5261_v48 }
 0x119   : > { %4019 = vmatmul.mubr.msk.f32.gmra.mrb[26].mxu1 %vm387_vm2, %v5199_v54  ;;  %4245 = vmatmul.mubr.msk.f32.gmra.mrb[10].mxu0 %vm387_vm2, %v5278_v41 }
 0x11a   : > { %4021 = vmatprep.mubr.msk.f32.mxu1 %vm387_vm2, %v5231_v62  ;;  %4247 = vmatprep.mubr.msk.f32.mxu0 %vm387_vm2, %v5285_v13 }
 0x11d   : > { %4022 = vmatmul.mubr.msk.f32.gmra.mrb[28].mxu1 %vm387_vm2, %v6154_v46  ;;  %4248 = vmatmul.mubr.msk.f32.gmra.mrb[12].mxu0 %vm387_vm2, %v5301_v17 }
 0x11e   : > { %4024 = vmatprep.mubr.msk.f32.mxu1 %vm387_vm2, %v5403_v9  ;;  %4250 = vmatprep.mubr.msk.f32.mxu0 %vm387_vm2, %v5305_v61  ;;  %v6155_v9 = vld [vmem:[#allocation47_spill] sm:$0xff] }
 0x121   : > { %4025 = vmatmul.mubr.msk.f32.gmra.mrb[30].mxu1 %vm387_vm2, %v5406_v6  ;;  %4251 = vmatmul.mubr.msk.f32.gmra.mrb[14].mxu0 %vm387_vm2, %v5318_v45  ;;  %v6156_v6 = vld [vmem:[#allocation50_spill] sm:$0xff] }
 0x122   : > { %4053 = vmatprep.mubr.msk.f32.mxu1 %vm387_vm2, %v6138_v0  ;;  %4253 = vmatprep.mubr.msk.f32.mxu0 %vm387_vm2, %v5323_v38 }
 0x125   : > { %4054 = vmatmul.mubr.msk.f32.vlgmr.msra.gmra.mrb[16].mxu1 %vm387_vm2, %v6139_v44  ;;  %4254 = vmatmul.mubr.msk.f32.gmra.mrb[16].mxu0 %vm387_vm2, %v5338_v16 }
 0x126   : > { %4056 = vmatprep.mubr.msk.f32.mxu1 %vm387_vm2, %v6141_v20  ;;  %4256 = vmatprep.mubr.msk.f32.mxu0 %vm387_vm2, %v6155_v9 }
 0x129   : > { %4057 = vmatmul.mubr.msk.f32.gmra.mrb[18].mxu1 %vm387_vm2, %v6143_v2  ;;  %4257 = vmatmul.mubr.msk.f32.gmra.mrb[18].mxu0 %vm387_vm2, %v5358_v56 }
 0x12a   : > { %4059 = vmatprep.mubr.msk.f32.mxu1 %vm387_vm2, %v6144_v21  ;;  %4259 = vmatprep.mubr.msk.f32.mxu0 %vm387_vm2, %v5362_v14 }
 0x12d   : > { %4060 = vmatmul.mubr.msk.f32.gmra.mrb[20].mxu1 %vm387_vm2, %v6145_v34  ;;  %4260 = vmatmul.mubr.msk.f32.gmra.mrb[20].mxu0 %vm387_vm2, %v6131_v5 }
 0x12e   : > { %4062 = vmatprep.mubr.msk.f32.mxu1 %vm387_vm2, %v6146_v27  ;;  %4262 = vmatprep.mubr.msk.f32.mxu0 %vm387_vm2, %v6133_v49 }
 0x131   : > { %4063 = vmatmul.mubr.msk.f32.gmra.mrb[22].mxu1 %vm387_vm2, %v6147_v1  ;;  %4263 = vmatmul.mubr.msk.f32.gmra.mrb[22].mxu0 %vm387_vm2, %v6156_v6 }
 0x132   : > { %4065 = vmatprep.mubr.msk.f32.mxu1 %vm387_vm2, %v6157_v58  ;;  %4265 = vmatprep.mubr.msk.f32.mxu0 %vm387_vm2, %v6158_v59 }
 0x135   : > { %4066 = vmatmul.mubr.msk.f32.gmra.mrb[24].mxu1 %vm387_vm2, %v6159_v3  ;;  %4266 = vmatmul.mubr.msk.f32.gmra.mrb[24].mxu0 %vm387_vm2, %v6160_v7 }
 0x136   : > { %4068 = vmatprep.mubr.msk.f32.mxu1 %vm387_vm2, %v6161_v8  ;;  %4268 = vmatprep.mubr.msk.f32.mxu0 %vm387_vm2, %v6162_v28 }
 0x139   : > { %4069 = vmatmul.mubr.msk.f32.gmra.mrb[26].mxu1 %vm387_vm2, %v6151_v24  ;;  %4269 = vmatmul.mubr.msk.f32.gmra.mrb[26].mxu0 %vm387_vm2, %v6163_v55 }
 0x13a   : > { %4071 = vmatprep.mubr.msk.f32.mxu1 %vm387_vm2, %v6152_v32  ;;  %4271 = vmatprep.mubr.msk.f32.mxu0 %vm387_vm2, %v6164_v23 }
 0x13d   : > { %4072 = vmatmul.mubr.msk.f32.gmra.mrb[28].mxu1 %vm387_vm2, %v6153_v43  ;;  %4272 = vmatmul.mubr.msk.f32.gmra.mrb[28].mxu0 %vm387_vm2, %v6165_v10 }
 0x13e   : > { %4074 = vmatprep.mubr.msk.f32.mxu1 %vm387_vm2, %v5726_v15  ;;  %4274 = vmatprep.mubr.msk.f32.mxu0 %vm387_vm2, %v2719_v39 }
 0x141   : > { %4075 = vmatmul.mubr.msk.f32.gmra.mrb[30].mxu1 %vm387_vm2, %v5740_v50  ;;  %4275 = vmatmul.mubr.msk.f32.gmra.mrb[30].mxu0 %vm387_vm2, %v2721_v19 }
 0x1b8   : > { %v3981_v62 = vpop.f32.mrb[0].mxu1 }
 0x1b9   : > { %v1451_v40 = vpop.f32.mrb[1].mxu1 }
 0x1bc   : > { %v3984_v54 = vpop.f32.mrb[2].mxu1 }
 0x1bd   : > { %v1461_v37 = vpop.f32.mrb[3].mxu1 }
 0x1c0   : > { %v3987_v13 = vpop.f32.mrb[4].mxu1 }
 0x1c1   : > { %v1471_v48 = vpop.f32.mrb[5].mxu1 }
 0x1c4   : > { %v3990_v41 = vpop.f32.mrb[6].mxu1 }
 0x1c5   : > { %v1481_v17 = vpop.f32.mrb[7].mxu1 }
 0x1c8   : > { %v3993_v61 = vpop.f32.mrb[8].mxu1 }
 0x1c9   : > { %v1491_v45 = vpop.f32.mrb[9].mxu1 }
 0x1cc   : > { %v3996_v38 = vpop.f32.mrb[10].mxu1 }
 0x1cd   : > { %v1501_v16 = vpop.f32.mrb[11].mxu1 }
 0x1d0   : > { %v3999_v49 = vpop.f32.mrb[12].mxu1 }
 0x1d1   : > { %v1511_v56 = vpop.f32.mrb[13].mxu1 }
 0x1d4   : > { %v5886_v14 = vpop.f32.mrb[14].mxu1 }
 0x1d5   : > { %v5888_v36 = vpop.f32.mrb[15].mxu1 }
 0x1d8   : > { %v4231_v24 = vpop.f32.mrb[0].mxu0 }
 0x1d9   : > { %v4279_v21 = vadd.f32 %v4231_v24, %v3981_v62  ;;  %v2795_v11 = vpop.f32.mrb[1].mxu0 }
 0x1da   : > { %v4280_v35 = vadd.f32 %v2795_v11, %v1451_v40 }
 0x1db   : > { %v3025_v47 = vmul.f32 %v4279_v21, %v4279_v21 }
 0x1dc   : > { %v2986_v63 = vadd.f32 %v4280_v35, %v4279_v21  ;;  %v3024_v22 = vmul.f32 %v4280_v35, %v4280_v35  ;;  %v4234_v33 = vpop.f32.mrb[2].mxu0 }
 0x1dd   : > { %v4281_v12 = vadd.f32 %v4234_v33, %v3984_v54  ;;  %v2805_v60 = vpop.f32.mrb[3].mxu0 }
 0x1de   : > { %v3056_v57 = vadd.f32 %v3025_v47, %v3024_v22  ;;  %v4282_v4 = vadd.f32 %v2805_v60, %v1461_v37 }
 0x1df   : > { %v3027_v34 = vmul.f32 %v4281_v12, %v4281_v12 }
 0x1e0   : > { %v2987_v5 = vadd.f32 %v4282_v4, %v2986_v63  ;;  %v3026_v0 = vmul.f32 %v4282_v4, %v4282_v4  ;;  %v4237_v44 = vpop.f32.mrb[4].mxu0 }
 0x1e1   : > { %v4283_v20 = vadd.f32 %v4237_v44, %v3987_v13  ;;  %v2815_v2 = vpop.f32.mrb[5].mxu0 }
 0x1e2   : > { %v3057_v27 = vadd.f32 %v3056_v57, %v3026_v0  ;;  %v4284_v1 = vadd.f32 %v2815_v2, %v1471_v48  ;;  %v2988_v15 = vadd.f32 %v4281_v12, %v2987_v5 }
 0x1e3   : > { %v3029_v50 = vmul.f32 %v4283_v20, %v4283_v20 }
 0x1e4   : > { %v2989_v18 = vadd.f32 %v4284_v1, %v2988_v15  ;;  %v3028_v25 = vmul.f32 %v4284_v1, %v4284_v1  ;;  %v3058_v31 = vadd.f32 %v3057_v27, %v3027_v34  ;;  %v4240_v32 = vpop.f32.mrb[6].mxu0 }
 0x1e5   : > { %v4285_v42 = vadd.f32 %v4240_v32, %v3990_v41  ;;  %v2825_v43 = vpop.f32.mrb[7].mxu0 }
 0x1e6   : > { %v3059_v52 = vadd.f32 %v3058_v31, %v3028_v25  ;;  %v4286_v26 = vadd.f32 %v2825_v43, %v1481_v17  ;;  %v2990_v51 = vadd.f32 %v4283_v20, %v2989_v18 }
 0x1e7   : > { %v3031_v7 = vmul.f32 %v4285_v42, %v4285_v42 }
 0x1e8   : > { %v2991_v46 = vadd.f32 %v4286_v26, %v2990_v51  ;;  %v3030_v9 = vmul.f32 %v4286_v26, %v4286_v26  ;;  %v3060_v6 = vadd.f32 %v3059_v52, %v3029_v50  ;;  %v4243_v58 = vpop.f32.mrb[8].mxu0 }
 0x1e9   : > { %v4287_v59 = vadd.f32 %v4243_v58, %v3993_v61  ;;  %v2835_v3 = vpop.f32.mrb[9].mxu0 }
 0x1ea   : > { %v3061_v8 = vadd.f32 %v3060_v6, %v3030_v9  ;;  %v4288_v28 = vadd.f32 %v2835_v3, %v1491_v45  ;;  %v2992_v29 = vadd.f32 %v4285_v42, %v2991_v46 }
 0x1eb   : > { %v3033_v19 = vmul.f32 %v4287_v59, %v4287_v59 }
 0x1ec   : > { %v2993_v53 = vadd.f32 %v4288_v28, %v2992_v29  ;;  %v3032_v55 = vmul.f32 %v4288_v28, %v4288_v28  ;;  %v3062_v23 = vadd.f32 %v3061_v8, %v3031_v7  ;;  %v4246_v30 = vpop.f32.mrb[10].mxu0 }
 0x1ed   : > { %v4289_v39 = vadd.f32 %v4246_v30, %v3996_v38  ;;  %v2845_v10 = vpop.f32.mrb[11].mxu0 }
 0x1ee   : > { %v3063_v62 = vadd.f32 %v3062_v23, %v3032_v55  ;;  %v4290_v40 = vadd.f32 %v2845_v10, %v1501_v16  ;;  %v2994_v54 = vadd.f32 %v4287_v59, %v2993_v53 }
 0x1ef   : > { %v3035_v24 = vmul.f32 %v4289_v39, %v4289_v39 }
 0x1f0   : > { %v2995_v37 = vadd.f32 %v4290_v40, %v2994_v54  ;;  %v3034_v13 = vmul.f32 %v4290_v40, %v4290_v40  ;;  %v3064_v48 = vadd.f32 %v3063_v62, %v3033_v19  ;;  %v4249_v41 = vpop.f32.mrb[12].mxu0 }
 0x1f1   : > { %v4291_v17 = vadd.f32 %v4249_v41, %v3999_v49  ;;  %v2855_v61 = vpop.f32.mrb[13].mxu0 }
 0x1f2   : > { %v3065_v21 = vadd.f32 %v3064_v48, %v3034_v13  ;;  %v4292_v45 = vadd.f32 %v2855_v61, %v1511_v56  ;;  %v2996_v11 = vadd.f32 %v4289_v39, %v2995_v37 }
 0x1f3   : > { %v3037_v12 = vmul.f32 %v4291_v17, %v4291_v17 }
 0x1f4   : > { %v2997_v35 = vadd.f32 %v4292_v45, %v2996_v11  ;;  %v3036_v47 = vmul.f32 %v4292_v45, %v4292_v45  ;;  %v3066_v63 = vadd.f32 %v3065_v21, %v3035_v24  ;;  %v4252_v22 = vpop.f32.mrb[14].mxu0 }
 0x1f5   : > { %v4293_v38 = vadd.f32 %v4252_v22, %v5886_v14  ;;  %v2865_v33 = vpop.f32.mrb[15].mxu0 }
 0x1f6   : > { %v3067_v16 = vadd.f32 %v3066_v63, %v3036_v47  ;;  %v4294_v60 = vadd.f32 %v2865_v33, %v5888_v36  ;;  %v2998_v57 = vadd.f32 %v4291_v17, %v2997_v35 }
 0x1f7   : > { %v3039_v34 = vmul.f32 %v4293_v38, %v4293_v38 }
 0x1f8   : > { %v4055_v4 = vpop.f32.mrb[16].mxu1  ;;  %v2999_v5 = vadd.f32 %v4294_v60, %v2998_v57  ;;  %v3038_v49 = vmul.f32 %v4294_v60, %v4294_v60  ;;  %v3068_v0 = vadd.f32 %v3067_v16, %v3037_v12  ;;  %v4255_v44 = vpop.f32.mrb[16].mxu0 }
 0x1f9   : > { %v1801_v20 = vpop.f32.mrb[17].mxu1  ;;  %v4295_v56 = vadd.f32 %v4255_v44, %v4055_v4  ;;  %v2875_v2 = vpop.f32.mrb[17].mxu0 }
 0x1fa   : > { %v3069_v27 = vadd.f32 %v3068_v0, %v3038_v49  ;;  %v4296_v1 = vadd.f32 %v2875_v2, %v1801_v20  ;;  %v3000_v15 = vadd.f32 %v4293_v38, %v2999_v5 }
 0x1fb   : > { %v3041_v50 = vmul.f32 %v4295_v56, %v4295_v56 }
 0x1fc   : > { %v4058_v18 = vpop.f32.mrb[18].mxu1  ;;  %v3001_v14 = vadd.f32 %v4296_v1, %v3000_v15  ;;  %v3040_v25 = vmul.f32 %v4296_v1, %v4296_v1  ;;  %v3070_v31 = vadd.f32 %v3069_v27, %v3039_v34  ;;  %v4258_v32 = vpop.f32.mrb[18].mxu0 }
 0x1fd   : > { %v1811_v42 = vpop.f32.mrb[19].mxu1  ;;  %v4297_v36 = vadd.f32 %v4258_v32, %v4058_v18  ;;  %v2885_v43 = vpop.f32.mrb[19].mxu0 }
 0x1fe   : > { %v3071_v52 = vadd.f32 %v3070_v31, %v3040_v25  ;;  %v4298_v26 = vadd.f32 %v2885_v43, %v1811_v42  ;;  %v3002_v51 = vadd.f32 %v4295_v56, %v3001_v14 }
 0x1ff   : > { %v3043_v28 = vmul.f32 %v4297_v36, %v4297_v36 }
 0x200   : > { %v4061_v46 = vpop.f32.mrb[20].mxu1  ;;  %v3003_v9 = vadd.f32 %v4298_v26, %v3002_v51  ;;  %v3042_v6 = vmul.f32 %v4298_v26, %v4298_v26  ;;  %v3072_v58 = vadd.f32 %v3071_v52, %v3041_v50  ;;  %v4261_v59 = vpop.f32.mrb[20].mxu0 }
 0x201   : > { %v1821_v3 = vpop.f32.mrb[21].mxu1  ;;  %v4299_v7 = vadd.f32 %v4261_v59, %v4061_v46  ;;  %v2895_v8 = vpop.f32.mrb[21].mxu0 }
 0x202   : > { %v3073_v29 = vadd.f32 %v3072_v58, %v3042_v6  ;;  %v4300_v53 = vadd.f32 %v2895_v8, %v1821_v3  ;;  %v3004_v55 = vadd.f32 %v4297_v36, %v3003_v9 }
 0x203   : > { %v3045_v37 = vmul.f32 %v4299_v7, %v4299_v7 }
 0x204   : > { %v4064_v23 = vpop.f32.mrb[22].mxu1  ;;  %v3005_v30 = vadd.f32 %v4300_v53, %v3004_v55  ;;  %v3044_v39 = vmul.f32 %v4300_v53, %v4300_v53  ;;  %v3074_v10 = vadd.f32 %v3073_v29, %v3043_v28  ;;  %v4264_v19 = vpop.f32.mrb[22].mxu0 }
 0x205   : > { %v1831_v62 = vpop.f32.mrb[23].mxu1  ;;  %v4301_v40 = vadd.f32 %v4264_v19, %v4064_v23  ;;  %v2905_v54 = vpop.f32.mrb[23].mxu0 }
 0x206   : > { %v3075_v13 = vadd.f32 %v3074_v10, %v3044_v39  ;;  %v4302_v48 = vadd.f32 %v2905_v54, %v1831_v62  ;;  %v3006_v41 = vadd.f32 %v4299_v7, %v3005_v30 }
 0x207   : > { %v3047_v63 = vmul.f32 %v4301_v40, %v4301_v40 }
 0x208   : > { %v4067_v17 = vpop.f32.mrb[24].mxu1  ;;  %v3007_v61 = vadd.f32 %v4302_v48, %v3006_v41  ;;  %v3046_v24 = vmul.f32 %v4302_v48, %v4302_v48  ;;  %v3076_v21 = vadd.f32 %v3075_v13, %v3045_v37  ;;  %v4267_v45 = vpop.f32.mrb[24].mxu0 }
 0x209   : > { %v1841_v11 = vpop.f32.mrb[25].mxu1  ;;  %v4303_v35 = vadd.f32 %v4267_v45, %v4067_v17  ;;  %v2915_v47 = vpop.f32.mrb[25].mxu0 }
 0x20a   : > { %v3077_v22 = vadd.f32 %v3076_v21, %v3046_v24  ;;  %v4304_v38 = vadd.f32 %v2915_v47, %v1841_v11  ;;  %v3008_v33 = vadd.f32 %v4301_v40, %v3007_v61 }
 0x20b   : > { %v3049_v44 = vmul.f32 %v4303_v35, %v4303_v35 }
 0x20c   : > { %v4070_v12 = vpop.f32.mrb[26].mxu1  ;;  %v3009_v16 = vadd.f32 %v4304_v38, %v3008_v33  ;;  %v3048_v60 = vmul.f32 %v4304_v38, %v4304_v38  ;;  %v3078_v57 = vadd.f32 %v3077_v22, %v3047_v63  ;;  %v4270_v4 = vpop.f32.mrb[26].mxu0 }
 0x20d   : > { %v1851_v5 = vpop.f32.mrb[27].mxu1  ;;  %v4305_v49 = vadd.f32 %v4270_v4, %v4070_v12  ;;  %v2925_v0 = vpop.f32.mrb[27].mxu0 }
 0x20e   : > { %v3079_v20 = vadd.f32 %v3078_v57, %v3048_v60  ;;  %v4306_v56 = vadd.f32 %v2925_v0, %v1851_v5  ;;  %v3010_v2 = vadd.f32 %v4303_v35, %v3009_v16 }
 0x20f   : > { %v3051_v32 = vmul.f32 %v4305_v49, %v4305_v49 }
 0x210   : > { %v4073_v34 = vpop.f32.mrb[28].mxu1  ;;  %v3011_v27 = vadd.f32 %v4306_v56, %v3010_v2  ;;  %v3050_v1 = vmul.f32 %v4306_v56, %v4306_v56  ;;  %v3080_v15 = vadd.f32 %v3079_v20, %v3049_v44  ;;  %v4273_v18 = vpop.f32.mrb[28].mxu0 }
 0x211   : > { %v1861_v14 = vpop.f32.mrb[29].mxu1  ;;  %v4307_v25 = vadd.f32 %v4273_v18, %v4073_v34  ;;  %v2935_v31 = vpop.f32.mrb[29].mxu0 }
 0x212   : > { %v3081_v42 = vadd.f32 %v3080_v15, %v3050_v1  ;;  %v4308_v36 = vadd.f32 %v2935_v31, %v1861_v14  ;;  %v3012_v43 = vadd.f32 %v4305_v49, %v3011_v27 }
 0x213   : > { %v3053_v59 = vmul.f32 %v4307_v25, %v4307_v25 }
 0x214   : > { %v4076_v50 = vpop.f32.mrb[30].mxu1  ;;  %v3013_v52 = vadd.f32 %v4308_v36, %v3012_v43  ;;  %v3052_v26 = vmul.f32 %v4308_v36, %v4308_v36  ;;  %v3082_v51 = vadd.f32 %v3081_v42, %v3051_v32  ;;  %v4276_v46 = vpop.f32.mrb[30].mxu0 }
 0x215   : > { %v1871_v9 = vpop.f32.mrb[31].mxu1  ;;  %v4309_v6 = vadd.f32 %v4276_v46, %v4076_v50  ;;  %v2945_v58 = vpop.f32.mrb[31].mxu0 }
 0x216   : > { %v3083_v3 = vadd.f32 %v3082_v51, %v3052_v26  ;;  %v4310_v7 = vadd.f32 %v2945_v58, %v1871_v9  ;;  %v3014_v8 = vadd.f32 %v4307_v25, %v3013_v52 }
 0x217   : > { %v3055_v55 = vmul.f32 %v4309_v6, %v4309_v6 }
 0x218   : > { %v3015_v28 = vadd.f32 %v4310_v7, %v3014_v8  ;;  %v3054_v29 = vmul.f32 %v4310_v7, %v4310_v7  ;;  %v3084_v53 = vadd.f32 %v3083_v3, %v3053_v59 }
 0x21a   : > { %v3016_v23 = vadd.f32 %v4309_v6, %v3015_v28  ;;  %v3085_v30 = vadd.f32 %v3084_v53, %v3054_v29 }
 0x21c   : > { %v3017_v39 = vrot.slane %v3016_v23, 4  ;;  %v3086_v10 = vadd.f32 %v3085_v30, %v3055_v55 }
 0x21e   : > { %v3018_v19 = vadd.f32 %v3017_v39, %v3016_v23  ;;  %v3087_v62 = vrot.slane %v3086_v10, 4 }
 0x220   : > { %v3019_v40 = vrot.slane %v3018_v19, 2  ;;  %v3088_v54 = vadd.f32 %v3087_v62, %v3086_v10 }
 0x222   : > { %v3020_v37 = vadd.f32 %v3019_v40, %v3018_v19  ;;  %v3089_v13 = vrot.slane %v3088_v54, 2 }
 0x224   : > { %v3021_v48 = vrot.slane %v3020_v37, 1  ;;  %v3090_v41 = vadd.f32 %v3089_v13, %v3088_v54 }
 0x226   : > { %v3022_v17 = vadd.f32 %v3021_v48, %v3020_v37  ;;  %v3091_v61 = vrot.slane %v3090_v41, 1 }
 0x228   : > { %3023 = vst [vmem:[%s182_s26] sm:$0x1] %v3022_v17  ;;  %v3092_v24 = vadd.f32 %v3091_v61, %v3090_v41 }
 0x229   : > { %4609 = shalt.err (!%p4606_p5)
}
 0x22a   : > { %s4610_s19 = scalar_lea.hbm %s5903_s5, 16  ;;  %s4614_s30 = scalar_lea.hbm %s5984_s2, 32 }
 0x22b   : > { %p4611_p6 = scmp.ne.s32.totalorder %s5903_s5, %s4610_s19  ;;  %p4615_p10 = scmp.lt.u32.totalorder %s5903_s5, %s5984_s2 }
 0x22c   : > { %p4616_p11 = scmp.lt.u32.totalorder %s4614_s30, %s4610_s19  ;;  %p4618_p13 = scmp.lt.u32.totalorder %s4610_s19, %s5903_s5 }
 0x22d   : > { %p4612_p7 = pnand %p4611_p6, %p4770_p4 }
 0x22e   : > { %p4617_p12 = por %p4616_p11, %p4615_p10 }
 0x22f   : > { %p4613_p9 = pneg %p4612_p7 }
 0x230   : > { %p4619_p0 = por %p4618_p13, %p4617_p12 }
 0x232   : > { %p4620_p1 = pnand %p4619_p0, %p4613_p9 }
 0x234   : > { %4623 = shalt.err (!%p4620_p1)
}
 0x235   : > { %4536 = dma.vmem_to_hbm [thread:$0]  (%p4770_p4), %s5905_s27, 16, %s5903_s5, %s3095_s8   ;;  %3093 = vst [vmem:[%s188_s28] sm:$0x1] %v3092_v24 }
 0x236   : > { %s3099_s6 = scalar_lea.sflag [#allocation5], %s5893_s21  ;;  %s4624_s9 = scalar_lea.vmem %s5912_s29, 16 }
 0x237   : > { %p4625_p2 = scmp.ne.s32.totalorder %s5912_s29, %s4624_s9  ;;  %s4709_s10 = smov [#allocation4]  }
 0x238   : > { %s4628_s11 = sshll.u32 %s4709_s10, 4  ;;  %s4629_s11 = int_to_ptr.vmem [resolvable:$false] %s4628_s11 }
 0x239   : > { %p4626_p3 = pnand %p4625_p2, %p4770_p4  ;;  %s4630_s18 = scalar_lea.vmem %s4629_s11, 32 }
 0x23a   : > { %p4631_p6 = scmp.lt.s32.totalorder %s5912_s29, %s4629_s11  ;;  %p4632_p7 = scmp.lt.s32.totalorder %s4630_s18, %s4624_s9 }
 0x23b   : > { %p4627_p5 = pneg %p4626_p3 }
 0x23c   : > { %p4633_p9 = por %p4632_p7, %p4631_p6 }
 0x23e   : > { %p4634_p10 = pnand %p4633_p9, %p4627_p5 }
 0x240   : > { %4637 = shalt.err (!%p4634_p10)
}
 0x241   : > { %s4638_s21 = scalar_lea.hbm %s5910_s7, 16  ;;  %s4642_s5 = scalar_lea.hbm %s5985_s3, 32 }
 0x242   : > { %p4639_p11 = scmp.ne.s32.totalorder %s5910_s7, %s4638_s21  ;;  %p4643_p0 = scmp.lt.u32.totalorder %s5910_s7, %s5985_s3 }
 0x243   : > { %p4644_p1 = scmp.lt.u32.totalorder %s4642_s5, %s4638_s21  ;;  %p4646_p3 = scmp.lt.u32.totalorder %s4638_s21, %s5910_s7 }
 0x244   : > { %p4640_p12 = pnand %p4639_p11, %p4770_p4 }
 0x245   : > { %p4645_p2 = por %p4644_p1, %p4643_p0 }
 0x246   : > { %p4641_p13 = pneg %p4640_p12 }
 0x247   : > { %p4647_p5 = por %p4646_p3, %p4645_p2 }
 0x249   : > { %p4648_p6 = pnand %p4647_p5, %p4641_p13 }
 0x24b   : > { %4651 = shalt.err (!%p4648_p6)
}
 0x24c   : > { %4537 = dma.vmem_to_hbm [thread:$0]  (%p4770_p4), %s5912_s29, 16, %s5910_s7, %s3099_s6  }
 0x24d PF: > { %p4547_p7 = scmp.ge.s32.totalorder %s4706_s17, 2  ;;  %s3138_s23 = sand.u32 1, %s4686_s12  }
 0x24e   : > { %s3139_s26 = scalar_lea.sflag [#allocation3], %s3138_s23 }
 0x24f   : > { %p4541_p9 = pnand %p4547_p7, %p4777_p8 }
 0x251   : > { %4677 = dma.done.wait (!%p4541_p9), %s3139_s26, 16  }
 0x252   : > { %4679 = vsyncadd (!%p4541_p9), %s3139_s26, 4294967280  ;;  %s3147_s30 = scalar_lea.sflag [#allocation5], %s3138_s23 }
 0x253   : > { %4681 = dma.done.wait (!%p4541_p9), %s3147_s30, 16  }
 0x254   : > { %4683 = vsyncadd (!%p4541_p9), %s3147_s30, 4294967280  ;;  %s20_s17 = sadd.s32 1, %s4706_s17   ;;  %s6166_s12 = smov %s4690_s13 }
 0x255   : > { %p17_p10 = scmp.ge.s32.totalorder %s20_s17, 4   ;;  %s6167_s13 = smov %s4694_s14 }
 0x256   : > { %s6168_s14 = smov %s4783_s25  ;;  %s6169_s15 = smov %s4702_s16 }
 0x257   : > { %s6170_s16 = smov %s6172_s20  ;;  %19 = sbr.rel (!%p17_p10) target bundleno = 6 (0x6), region = 81 }
 0x25e   :  { %3151 = vsyncpa [#allocation3], 1 }
 0x25f   :  { %3153 = vsyncpa [#allocation3 + $0x1], 1 }
 0x260   :  { %3154 = vsyncpa [#allocation5], 1 }
 0x261   :  { %3156 = vsyncpa [#allocation5 + $0x1], 1 }

// kernel: tpu_custom_call.1
= control target key start
LH: loop header
LB: loop body
LE: loop exit
PB: predicated region body
PF: predicated region fallthrough
CT: control target
= control target key end

     0   :  { %9 = vsyncpa [#allocation3], 0  ;;  %s5980_s0 = inlined_call_operand.vmem [shape: f32[2,18,18,4], index: 0, kind: input, shape index: {}]   ;;  %s5981_s1 = inlined_call_operand.vmem [shape: f32[36,128], index: 1, kind: input, shape index: {}]   ;;  %s5982_s2 = inlined_call_operand.hbm [shape: f32[2,1,1,128], index: 2, kind: output, shape index: {0}]   ;;  %s5983_s3 = inlined_call_operand.hbm [shape: f32[2,1,1,128], index: 3, kind: output, shape index: {1}]  }
   0x1   :  { %11 = vsyncpa [#allocation3 + $0x1], 0 }
   0x2   :  { %12 = vsyncpa [#allocation5], 0 }
   0x3   :  { %14 = vsyncpa [#allocation5 + $0x1], 0  ;;  %s4728_s12 = smov 0   ;;  %s4730_s13 = smov 0  }
   0x4   :  { %s4732_s14 = smov 0   ;;  %s4734_s15 = smov 0  }
   0x5   :  { %s4736_s16 = smov 0   ;;  %s4738_s17 = smov 0  }
   0x6 LB: > { %s3221_s18 = sadd.s32 4294967295, %s4704_s17   ;;  %s3222_s19 = sadd.s32 4294967294, %s4704_s17   ;;  %s4704_s17 = sphi %s4738_s17, %s20_s17   ;;  %s4700_s16 = sphi %s4736_s16, %s6168_s16   ;;  %s4696_s15 = sphi %s4734_s15, %s6167_s15   ;;  %s4692_s14 = sphi %s4732_s14, %s6166_s14   ;;  %s4688_s13 = sphi %s4730_s13, %s6165_s13   ;;  %s4684_s12 = sphi %s4728_s12, %s6164_s12  }
   0x7   : > { %s32_s20 = sadd.s32 1, %s4700_s16  ;;  %s88_s21 = sadd.s32 1, %s4692_s14 }
   0x8   : > { %p34_p0 = scmp.ge.s32.totalorder %s32_s20, 2  ;;  %p98_p1 = scmp.ne.s32.totalorder %s4692_s14, %s4688_s13 }
   0x9   : > { %p99_p2 = scmp.eq.s32.totalorder %s3221_s18, 1  ;;  %p104_p3 = scmp.ne.s32.totalorder %s4688_s13, %s4684_s12 }
   0xa   : > { %s6170_s20 = smov (%p34_p0, %s32_s20), 0  ;;  %p105_p5 = scmp.eq.s32.totalorder %s3222_s19, 1 }
   0xb   : > { %p4768_p4 = por %p99_p2, %p98_p1  ;;  %s83_s23 = ssub.s32 %s4700_s16, %s6170_s20 }
   0xc   : > { %p3225_p6 = scmp.ge.s32.totalorder %s4704_s17, 1  ;;  %p86_p7 = scmp.eq.s32.totalorder %s83_s23, 0 }
   0xd   : > { %p4775_p8 = por %p105_p5, %p104_p3  ;;  %p162_p9 = scmp.lt.s32.totalorder %s4704_s17, 3 }
   0xe   : > { %s4781_s25 = scalar_select %p86_p7, %s4692_s14, %s88_s21  }
   0xf   : > { %p163_p10 = pnand %p3225_p6, %p162_p9 }
  0x11   : > { %166 = sbr.rel (%p163_p10) target bundleno = 589 (0x24d), region = 28 }
  0x18   : > { %v251_v0 = vld [vmem:[%s5981_s1] sm:$0xff]  ;;  %vm452_vm0 = vcmask 1043456   ;;  %v4789_v1 = vld [vmem:[%s5981_s1 + $0x10] sm:$0xff]  ;;  %p189_p11 = scmp.lt.s32.totalorder %s4696_s15, 1  ;;  %vm304_vm1 = vcmask 1046528   ;;  %vm387_vm2 = vcmask 31744  }
  0x19   : > { %v386_v2 = vrot.slane %v251_v0, 4  ;;  %4025 = vmatprep.subr.msk.mxu0 %vm452_vm0, %v4789_v1  ;;  %v1917_v3 = vrot.slane %v4789_v1, 4  ;;  %v4870_v33 = vld [vmem:[%s5981_s1 + $0x18] sm:$0xff]  ;;  %v4880_v35 = vld [vmem:[%s5981_s1 + $0x8] sm:$0xff]  ;;  %vm971_vm3 = vcmask 1045504   ;;  %s5891_s21 = sand.u32 1, %s4688_s13  }
  0x1a   : > { %4026 = vmatpush3.msk.msra.mxu0 %vm452_vm0, %v4789_v1  ;;  %s190_s30 = scalar_select %p189_p11, %s4696_s15, 1 }
  0x1b   : > { %3825 = vmatprep.subr.msk.mxu1 %vm452_vm0, %v386_v2  ;;  %4075 = vmatprep.subr.msk.mxu0 %vm452_vm0, %v1917_v3  ;;  %s3524_s23 = sshll.u32 %s4696_s15, 4  ;;  %s182_s26 = scalar_lea.vmem [#allocation2], %s5891_s21 }
  0x1c   : > { %3826 = vmatpush3.msk.msra.mxu1 %vm452_vm0, %v386_v2  ;;  %s4533_s4 = smul.u32 432, %s190_s30  ;;  %s3112_s27 = sshll.u32 %s182_s26, 4  ;;  %s5903_s27 = int_to_ptr.vmem [resolvable:$true] %s3112_s27 }
  0x1d   : > { %3875 = vmatprep.subr.msk.mxu1 %vm452_vm0, %v251_v0  ;;  %s188_s28 = scalar_lea.vmem [#allocation4], %s5891_s21  ;;  %s5901_s5 = scalar_lea.hbm %s5982_s2, %s3524_s23 }
  0x1e   : > { %s4805_s7 = scalar_lea.vmem %s5980_s0, %s4533_s4  ;;  %s3126_s29 = sshll.u32 %s188_s28, 4  ;;  %s5910_s29 = int_to_ptr.vmem [resolvable:$true] %s3126_s29 }
  0x1f   : > { %v4808_v4 = vld [vmem:[%s4805_s7] sm:$0xff]  ;;  %v4811_v5 = vld [vmem:[%s4805_s7 + $0x8] sm:$0xff]  ;;  %v4814_v6 = vld [vmem:[%s4805_s7 + $0x18] sm:$0xff]  ;;  %s3095_s8 = scalar_lea.sflag [#allocation3], %s5891_s21  ;;  %s4594_s9 = scalar_lea.vmem %s5903_s27, 16 }
  0x20   : > { %6059 = vst [vmem:[#allocation8_spill] sm:$0xff] %v4814_v6  ;;  %v305_v7 = vrot.slane %v4808_v4, 1  ;;  %v306_v8 = vrot.slane %v4811_v5, 1  ;;  %v4819_v9 = vld [vmem:[%s4805_s7 + $0x20] sm:$0xff]  ;;  %v310_v10 = vrot.slane %v4814_v6, 1  ;;  %v4831_v15 = vld [vmem:[%s4805_s7 + $0x30] sm:$0xff]  ;;  %p4595_p12 = scmp.ne.s32.totalorder %s5903_s27, %s4594_s9 }
  0x21   : > { %6060 = vst [vmem:[#allocation9_spill] sm:$0xff] %v4819_v9  ;;  %v4823_v11 = vld [vmem:[%s4805_s7 + $0x10] sm:$0x3]  ;;  %v311_v12 = vrot.slane %v4819_v9, 1  ;;  %v4828_v14 = vld [vmem:[%s4805_s7 + $0x28] sm:$0x3] }
  0x22   : > { %v308_v13 = vrot.slane %v4823_v11, 1  ;;  %v307_v16 = vsel %vm304_vm1, %v305_v7, %v306_v8  ;;  %v313_v17 = vrot.slane %v4828_v14, 1  ;;  %v4836_v18 = vld [vmem:[%s4805_s7 + $0x38] sm:$0xff]  ;;  %v315_v19 = vrot.slane %v4831_v15, 1  ;;  %v4840_v20 = vld [vmem:[%s4805_s7 + $0x40] sm:$0x3]  ;;  %p4596_p13 = pnand %p4595_p12, %p4768_p4 }
  0x23   : > { %3827 = vmatprep.mubr.msk.f32.mxu1 %vm387_vm2, %v307_v16  ;;  %v312_v21 = vsel %vm304_vm1, %v310_v10, %v311_v12  ;;  %v316_v23 = vrot.slane %v4836_v18, 1  ;;  %v318_v24 = vrot.slane %v4840_v20, 1  ;;  %v4848_v25 = vld [vmem:[%s4805_s7 + $0x48] sm:$0xff]  ;;  %v4851_v26 = vld [vmem:[%s4805_s7 + $0x50] sm:$0xff]  ;;  %v4854_v27 = vld [vmem:[%s4805_s7 + $0x58] sm:$0x3] }
  0x24   : > { %v309_v22 = vsel %vm304_vm1, %v306_v8, %v308_v13  ;;  %4027 = vmatprep.mubr.msk.f32.mxu0 %vm387_vm2, %v312_v21  ;;  %v314_v28 = vsel %vm304_vm1, %v311_v12, %v313_v17  ;;  %v320_v29 = vrot.slane %v4848_v25, 1  ;;  %v321_v30 = vrot.slane %v4851_v26, 1  ;;  %v4862_v31 = vld [vmem:[%s4805_s7 + $0x60] sm:$0xff]  ;;  %v4865_v32 = vld [vmem:[%s4805_s7 + $0x68] sm:$0xff]  ;;  %v4896_v41 = vld [vmem:[%s4805_s7 + $0x70] sm:$0x3]  ;;  %p4597_p0 = pneg %p4596_p13 }
  0x25   : > { %3828 = vmatmul.mubr.msk.f32.vlgmr.msra.gmra.mrb[0].mxu1 %vm387_vm2, %v309_v22  ;;  %4028 = vmatmul.mubr.msk.f32.vlgmr.msra.gmra.mrb[0].mxu0 %vm387_vm2, %v314_v28  ;;  %v4875_v34 = vsel %vm304_vm1, %v315_v19, %v316_v23  ;;  %v4885_v36 = vsel %vm304_vm1, %v316_v23, %v318_v24  ;;  %v323_v37 = vrot.slane %v4854_v27, 1  ;;  %v325_v39 = vrot.slane %v4862_v31, 1  ;;  %v4902_v42 = vld [vmem:[%s4805_s7 + $0x78] sm:$0xff]  ;;  %v4905_v43 = vld [vmem:[%s4805_s7 + $0x80] sm:$0xff]  ;;  %v4925_v49 = vld [vmem:[%s4805_s7 + $0x88] sm:$0x3] }
  0x26   : > { %3876 = vmatpush3.msk.msra.mxu1 %vm452_vm0, %v251_v0  ;;  %6061 = vst [vmem:[#allocation10_spill] sm:$0xff] %v4875_v34  ;;  %4076 = vmatpush3.msk.msra.mxu0 %vm452_vm0, %v1917_v3  ;;  %6062 = vst [vmem:[#allocation11_spill] sm:$0xff] %v4885_v36  ;;  %v4891_v38 = vsel %vm304_vm1, %v320_v29, %v321_v30  ;;  %v326_v40 = vrot.slane %v4865_v32, 1  ;;  %v328_v45 = vrot.slane %v4896_v41, 1  ;;  %v330_v47 = vrot.slane %v4902_v42, 1  ;;  %v4930_v50 = vld [vmem:[%s4805_s7 + $0x90] sm:$0xff] }
  0x27   : > { %3830 = vmatprep.mubr.msk.f32.mxu1 %vm387_vm2, %v312_v21  ;;  %4030 = vmatprep.mubr.msk.f32.mxu0 %vm387_vm2, %v4875_v34  ;;  %6063 = vst [vmem:[#allocation12_spill] sm:$0xff] %v4891_v38  ;;  %v4916_v44 = vsel %vm304_vm1, %v321_v30, %v323_v37  ;;  %v331_v48 = vrot.slane %v4905_v43, 1  ;;  %v4933_v51 = vld [vmem:[%s4805_s7 + $0x98] sm:$0xff]  ;;  %v333_v53 = vrot.slane %v4925_v49, 1  ;;  %v335_v55 = vrot.slane %v4930_v50, 1  ;;  %v4956_v58 = vld [vmem:[%s4805_s7 + $0xa8] sm:$0xff] }
  0x28   : > { %4125 = vmatprep.subr.msk.mxu0 %vm452_vm0, %v4870_v33  ;;  %3925 = vmatprep.subr.msk.mxu1 %vm452_vm0, %v4880_v35  ;;  %6064 = vst [vmem:[#allocation13_spill] sm:$0xff] %v4916_v44  ;;  %v4920_v46 = vsel %vm304_vm1, %v325_v39, %v326_v40  ;;  %v4942_v52 = vsel %vm304_vm1, %v326_v40, %v328_v45  ;;  %v336_v56 = vrot.slane %v4933_v51, 1  ;;  %v4951_v57 = vld [vmem:[%s4805_s7 + $0xa0] sm:$0x3]  ;;  %v4959_v59 = vld [vmem:[%s4805_s7 + $0xb0] sm:$0xff]  ;;  %v340_v63 = vrot.slane %v4956_v58, 1 }
  0x29   : > { %3831 = vmatmul.mubr.msk.f32.gmra.mrb[2].mxu1 %vm387_vm2, %v314_v28  ;;  %4031 = vmatmul.mubr.msk.f32.gmra.mrb[2].mxu0 %vm387_vm2, %v4885_v36  ;;  %6065 = vst [vmem:[#allocation14_spill] sm:$0xff] %v4920_v46  ;;  %6066 = vst [vmem:[#allocation15_spill] sm:$0xff] %v4942_v52  ;;  %v4946_v54 = vsel %vm304_vm1, %v330_v47, %v331_v48  ;;  %v4968_v60 = vsel %vm304_vm1, %v331_v48, %v333_v53  ;;  %v338_v61 = vrot.slane %v4951_v57, 1  ;;  %v4977_v2 = vld [vmem:[%s4805_s7 + $0xb8] sm:$0x3]  ;;  %v4982_v3 = vld [vmem:[%s4805_s7 + $0xc0] sm:$0xff] }
  0x2a   : > { %3833 = vmatprep.mubr.msk.f32.mxu1 %vm387_vm2, %v4875_v34  ;;  %4033 = vmatprep.mubr.msk.f32.mxu0 %vm387_vm2, %v4891_v38  ;;  %6067 = vst [vmem:[#allocation16_spill] sm:$0xff] %v4946_v54  ;;  %6068 = vst [vmem:[#allocation17_spill] sm:$0xff] %v4968_v60  ;;  %v4972_v62 = vsel %vm304_vm1, %v335_v55, %v336_v56  ;;  %v341_v0 = vrot.slane %v4959_v59, 1  ;;  %v4985_v7 = vld [vmem:[%s4805_s7 + $0xc8] sm:$0xff]  ;;  %v343_v10 = vrot.slane %v4977_v2, 1  ;;  %v345_v13 = vrot.slane %v4982_v3, 1 }
  0x2b   : > { %6069 = vst [vmem:[#allocation18_spill] sm:$0xff] %v4972_v62  ;;  %v4994_v8 = vsel %vm304_vm1, %v336_v56, %v338_v61  ;;  %v346_v16 = vrot.slane %v4985_v7, 1  ;;  %v5003_v17 = vld [vmem:[%s4805_s7 + $0xd0] sm:$0x3]  ;;  %v977_v23 = vrot.slane %v4814_v6, 2  ;;  %v978_v24 = vrot.slane %v4819_v9, 2 }
  0x2c   : > { %6070 = vst [vmem:[#allocation19_spill] sm:$0xff] %v4994_v8  ;;  %v4998_v12 = vsel %vm304_vm1, %v340_v63, %v341_v0  ;;  %v5014_v19 = vsel %vm304_vm1, %v341_v0, %v343_v10  ;;  %v348_v21 = vrot.slane %v5003_v17, 1  ;;  %v5023_v28 = vld [vmem:[%s4805_s7 + $0xd8] sm:$0xff]  ;;  %v5026_v29 = vld [vmem:[%s4805_s7 + $0xe0] sm:$0xff]  ;;  %v980_v30 = vrot.slane %v4828_v14, 2  ;;  %v5051_v53 = vld [vmem:[%s4805_s7 + $0xf0] sm:$0xff] }
  0x2d   : > { %3834 = vmatmul.mubr.msk.f32.gmra.mrb[4].mxu1 %vm387_vm2, %v4885_v36  ;;  %4034 = vmatmul.mubr.msk.f32.gmra.mrb[4].mxu0 %vm387_vm2, %v4916_v44  ;;  %6071 = vst [vmem:[#allocation20_spill] sm:$0xff] %v4998_v12  ;;  %6072 = vst [vmem:[#allocation21_spill] sm:$0xff] %v5014_v19  ;;  %v5018_v22 = vsel %vm304_vm1, %v345_v13, %v346_v16  ;;  %v350_v39 = vrot.slane %v5023_v28, 1  ;;  %v351_v40 = vrot.slane %v5026_v29, 1  ;;  %v5043_v45 = vld [vmem:[%s4805_s7 + $0xe8] sm:$0x3] }
  0x2e   : > { %3836 = vmatprep.mubr.msk.f32.mxu1 %vm387_vm2, %v4891_v38  ;;  %4036 = vmatprep.mubr.msk.f32.mxu0 %vm387_vm2, %v4920_v46  ;;  %6073 = vst [vmem:[#allocation22_spill] sm:$0xff] %v5018_v22  ;;  %v5038_v37 = vsel %vm304_vm1, %v346_v16, %v348_v21  ;;  %v5046_v47 = vsel %vm971_vm3, %v977_v23, %v978_v24  ;;  %v982_v48 = vrot.slane %v4831_v15, 2  ;;  %v983_v14 = vrot.slane %v4836_v18, 2  ;;  %v5054_v55 = vld [vmem:[%s4805_s7 + $0xf8] sm:$0xff]  ;;  %v5075_v16 = vld [vmem:[%s4805_s7 + $0x100] sm:$0x3] }
  0x2f   : > { %6074 = vst [vmem:[#allocation23_spill] sm:$0xff] %v5038_v37  ;;  %v353_v56 = vrot.slane %v5043_v45, 1  ;;  %v985_v61 = vrot.slane %v4840_v20, 2  ;;  %v5067_v63 = vsel %vm971_vm3, %v978_v24, %v980_v30  ;;  %v5070_v0 = vsel %vm304_vm1, %v350_v39, %v351_v40  ;;  %v5084_v30 = vld [vmem:[%s4805_s7 + $0x108] sm:$0xff]  ;;  %v5087_v39 = vld [vmem:[%s4805_s7 + $0x110] sm:$0xff]  ;;  %s4706_s10 = smov [#allocation2]  }
  0x30   : > { %6075 = vst [vmem:[#allocation24_spill] sm:$0xff] %v5070_v0  ;;  %v355_v10 = vrot.slane %v5051_v53, 1  ;;  %v356_v13 = vrot.slane %v5054_v55, 1  ;;  %v5079_v23 = vsel %vm971_vm3, %v982_v48, %v983_v14  ;;  %v987_v20 = vrot.slane %v4848_v25, 2  ;;  %v5186_v36 = vld [vmem:[%s4805_s7 + $0x148] sm:$0x3] }
  0x31   : > { %3837 = vmatmul.mubr.msk.f32.gmra.mrb[6].mxu1 %vm387_vm2, %v4916_v44  ;;  %4037 = vmatmul.mubr.msk.f32.gmra.mrb[6].mxu0 %vm387_vm2, %v4942_v52  ;;  %v988_v24 = vrot.slane %v4851_v26, 2  ;;  %v5096_v48 = vsel %vm304_vm1, %v351_v40, %v353_v56  ;;  %v5099_v21 = vsel %vm971_vm3, %v983_v14, %v985_v61  ;;  %v361_v40 = vrot.slane %v5087_v39, 1  ;;  %v5113_v56 = vld [vmem:[%s4805_s7 + $0x118] sm:$0x3]  ;;  %s4598_s11 = sshll.u32 %s4706_s10, 4  ;;  %s4599_s11 = int_to_ptr.vmem [resolvable:$false] %s4598_s11 }
  0x32   : > { %3839 = vmatprep.mubr.msk.f32.mxu1 %vm387_vm2, %v4920_v46  ;;  %4039 = vmatprep.mubr.msk.f32.mxu0 %vm387_vm2, %v4946_v54  ;;  %6076 = vst [vmem:[#allocation25_spill] sm:$0xff] %v5096_v48  ;;  %6077 = vst [vmem:[#allocation26_spill] sm:$0xff] %v5099_v21  ;;  %v992_v61 = vrot.slane %v4862_v31, 2  ;;  %v5159_v46 = vld [vmem:[%s4805_s7 + $0x138] sm:$0xff]  ;;  %v1000_v44 = vrot.slane %v4925_v49, 2  ;;  %v1005_v34 = vrot.slane %v4951_v57, 2  ;;  %p4601_p1 = scmp.lt.s32.totalorder %s5903_s27, %s4599_s11 }
  0x33   : > { %v5116_v14 = vsel %vm971_vm3, %v987_v20, %v988_v24  ;;  %v370_v38 = vrot.slane %v5159_v46, 1  ;;  %v1007_v57 = vrot.slane %v4956_v58, 2  ;;  %s4600_s18 = scalar_lea.vmem %s4599_s11, 32 }
  0x34   : > { %6079 = vst [vmem:[#allocation28_spill] sm:$0xff] %v5116_v14  ;;  %p4602_p2 = scmp.lt.s32.totalorder %s4600_s18, %s4594_s9 }
  0x35   : > { %3840 = vmatmul.mubr.msk.f32.gmra.mrb[8].mxu1 %vm387_vm2, %v4942_v52  ;;  %4040 = vmatmul.mubr.msk.f32.gmra.mrb[8].mxu0 %vm387_vm2, %v4968_v60  ;;  %v5151_v52 = vld [vmem:[%s4805_s7 + $0x130] sm:$0x3] }
  0x36   : > { %3842 = vmatprep.mubr.msk.f32.mxu1 %vm387_vm2, %v4946_v54  ;;  %4042 = vmatprep.mubr.msk.f32.mxu0 %vm387_vm2, %v4972_v62  ;;  %p4603_p3 = por %p4602_p2, %p4601_p1 }
  0x38   : > { %p4604_p5 = pnand %p4603_p3, %p4597_p0 }
  0x39   : > { %3843 = vmatmul.mubr.msk.f32.gmra.mrb[10].mxu1 %vm387_vm2, %v4968_v60  ;;  %4043 = vmatmul.mubr.msk.f32.gmra.mrb[10].mxu0 %vm387_vm2, %v4994_v8  ;;  %v995_v60 = vrot.slane %v4896_v41, 2  ;;  %v997_v41 = vrot.slane %v4902_v42, 2 }
  0x3a   : > { %3845 = vmatprep.mubr.msk.f32.mxu1 %vm387_vm2, %v4972_v62  ;;  %4045 = vmatprep.mubr.msk.f32.mxu0 %vm387_vm2, %v4998_v12  ;;  %v363_v62 = vrot.slane %v5113_v56, 1 }
  0x3d   : > { %3846 = vmatmul.mubr.msk.f32.gmra.mrb[12].mxu1 %vm387_vm2, %v4994_v8  ;;  %4046 = vmatmul.mubr.msk.f32.gmra.mrb[12].mxu0 %vm387_vm2, %v5014_v19  ;;  %v5121_v8 = vld [vmem:[%s4805_s7 + $0x120] sm:$0xff] }
  0x3e   : > { %3848 = vmatprep.mubr.msk.f32.mxu1 %vm387_vm2, %v4998_v12  ;;  %4048 = vmatprep.mubr.msk.f32.mxu0 %vm387_vm2, %v5018_v22  ;;  %v993_v12 = vrot.slane %v4865_v32, 2  ;;  %v365_v54 = vrot.slane %v5121_v8, 1 }
  0x41   : > { %3849 = vmatmul.mubr.msk.f32.gmra.mrb[14].mxu1 %vm387_vm2, %v5014_v19  ;;  %4049 = vmatmul.mubr.msk.f32.gmra.mrb[14].mxu0 %vm387_vm2, %v5038_v37  ;;  %v990_v19 = vrot.slane %v4854_v27, 2  ;;  %v6080_v27 = vrot.slane %v4870_v33, 4 }
  0x42   : > { %3851 = vmatprep.mubr.msk.f32.mxu1 %vm387_vm2, %v5018_v22  ;;  %4077 = vmatprep.mubr.msk.f32.mxu0 %vm387_vm2, %v5046_v47  ;;  %v358_v22 = vrot.slane %v5075_v16, 1 }
  0x44   : > { %v5136_v20 = vsel %vm304_vm1, %v356_v13, %v358_v22  ;;  %v5154_v22 = vsel %vm971_vm3, %v992_v61, %v993_v12  ;;  %v368_v61 = vrot.slane %v5151_v52, 1 }
  0x45   : > { %3852 = vmatmul.mubr.msk.f32.gmra.mrb[16].mxu1 %vm387_vm2, %v5038_v37  ;;  %4078 = vmatmul.mubr.msk.f32.vlgmr.msra.gmra.mrb[0].mxu0 %vm387_vm2, %v5067_v63  ;;  %v5107_v37 = vsel %vm304_vm1, %v355_v10, %v356_v13  ;;  %v5124_v10 = vld [vmem:[%s4805_s7 + $0x128] sm:$0xff]  ;;  %6081 = vst [vmem:[#allocation29_spill] sm:$0xff] %v5136_v20  ;;  %6084 = vst [vmem:[#allocation32_spill] sm:$0xff] %v5154_v22  ;;  %v998_v13 = vrot.slane %v4905_v43, 2 }
  0x46   : > { %3854 = vmatprep.mubr.msk.f32.mxu1 %vm387_vm2, %v5070_v0  ;;  %4126 = vmatpush3.msk.msra.mxu0 %vm452_vm0, %v4870_v33  ;;  %6078 = vst [vmem:[#allocation27_spill] sm:$0xff] %v5107_v37  ;;  %v360_v0 = vrot.slane %v5084_v30, 1 }
  0x47   : > { %4080 = vmatprep.mubr.msk.f32.mxu0 %vm387_vm2, %v5079_v23  ;;  %4175 = vmatprep.subr.msk.mxu0 %vm452_vm0, %v6080_v27  ;;  %v5143_v27 = vsel %vm971_vm3, %v988_v24, %v990_v19  ;;  %v5162_v19 = vld [vmem:[%s4805_s7 + $0x140] sm:$0xff]  ;;  %v5174_v24 = vsel %vm971_vm3, %v993_v12, %v995_v60  ;;  %v1002_v60 = vrot.slane %v4930_v50, 2  ;;  %v1003_v12 = vrot.slane %v4933_v51, 2 }
  0x48   : > { %6082 = vst [vmem:[#allocation30_spill] sm:$0xff] %v5143_v27  ;;  %6086 = vst [vmem:[#allocation34_spill] sm:$0xff] %v5174_v24 }
  0x49   : > { %3855 = vmatmul.mubr.msk.f32.gmra.mrb[18].mxu1 %vm387_vm2, %v5096_v48  ;;  %4081 = vmatmul.mubr.msk.f32.gmra.mrb[2].mxu0 %vm387_vm2, %v5099_v21  ;;  %v5146_v48 = vsel %vm304_vm1, %v360_v0, %v361_v40  ;;  %v5171_v0 = vsel %vm304_vm1, %v361_v40, %v363_v62  ;;  %v5189_v62 = vsel %vm971_vm3, %v997_v41, %v998_v13  ;;  %v5194_v40 = vld [vmem:[%s4805_s7 + $0x150] sm:$0xff]  ;;  %v373_v41 = vrot.slane %v5186_v36, 1  ;;  %v5256_v21 = vld [vmem:[%s4805_s7 + $0x178] sm:$0x3] }
  0x4a   : > { %3857 = vmatprep.mubr.msk.f32.mxu1 %vm387_vm2, %v5107_v37  ;;  %4083 = vmatprep.mubr.msk.f32.mxu0 %vm387_vm2, %v5116_v14  ;;  %6083 = vst [vmem:[#allocation31_spill] sm:$0xff] %v5146_v48  ;;  %v366_v37 = vrot.slane %v5124_v10, 1  ;;  %6085 = vst [vmem:[#allocation33_spill] sm:$0xff] %v5171_v0 }
  0x4b   : > { %6088 = vst [vmem:[#allocation36_spill] sm:$0xff] %v5189_v62 }
  0x4c   : > { %v5206_v49 = vsel %vm304_vm1, %v366_v37, %v368_v61  ;;  %v1008_v61 = vrot.slane %v4959_v59, 2 }
  0x4d   : > { %3858 = vmatmul.mubr.msk.f32.gmra.mrb[20].mxu1 %vm387_vm2, %v5136_v20  ;;  %4084 = vmatmul.mubr.msk.f32.gmra.mrb[4].mxu0 %vm387_vm2, %v5143_v27  ;;  %v5180_v20 = vsel %vm304_vm1, %v365_v54, %v366_v37  ;;  %v5197_v54 = vld [vmem:[%s4805_s7 + $0x158] sm:$0xff]  ;;  %6089 = vst [vmem:[#allocation37_spill] sm:$0xff] %v5206_v49  ;;  %v5221_v27 = vld [vmem:[%s4805_s7 + $0x160] sm:$0x3]  ;;  %v5224_v37 = vsel %vm971_vm3, %v1002_v60, %v1003_v12 }
  0x4e   : > { %3860 = vmatprep.mubr.msk.f32.mxu1 %vm387_vm2, %v5146_v48  ;;  %4086 = vmatprep.mubr.msk.f32.mxu0 %vm387_vm2, %v5154_v22  ;;  %6087 = vst [vmem:[#allocation35_spill] sm:$0xff] %v5180_v20  ;;  %v371_v48 = vrot.slane %v5162_v19, 1  ;;  %v5213_v22 = vsel %vm971_vm3, %v998_v13, %v1000_v44  ;;  %v5232_v44 = vld [vmem:[%s4805_s7 + $0x170] sm:$0xff]  ;;  %v5244_v13 = vsel %vm971_vm3, %v1003_v12, %v1005_v34  ;;  %v378_v60 = vrot.slane %v5221_v27, 1 }
  0x4f   : > { %6090 = vst [vmem:[#allocation38_spill] sm:$0xff] %v5213_v22  ;;  %6092 = vst [vmem:[#allocation40_spill] sm:$0xff] %v5232_v44  ;;  %v1012_v34 = vrot.slane %v4982_v3, 2  ;;  %v1013_v12 = vrot.slane %v4985_v7, 2 }
  0x50   : > { %6094 = vst [vmem:[#allocation42_spill] sm:$0xff] %v5244_v13 }
  0x51   : > { %3861 = vmatmul.mubr.msk.f32.gmra.mrb[22].mxu1 %vm387_vm2, %v5171_v0  ;;  %4087 = vmatmul.mubr.msk.f32.gmra.mrb[6].mxu0 %vm387_vm2, %v5174_v24  ;;  %v5216_v0 = vsel %vm304_vm1, %v370_v38, %v371_v48  ;;  %v375_v24 = vrot.slane %v5194_v40, 1  ;;  %v5241_v38 = vsel %vm304_vm1, %v371_v48, %v373_v41  ;;  %v5259_v48 = vsel %vm971_vm3, %v1007_v57, %v1008_v61 }
  0x52   : > { %3863 = vmatprep.mubr.msk.f32.mxu1 %vm387_vm2, %v5180_v20  ;;  %4089 = vmatprep.mubr.msk.f32.mxu0 %vm387_vm2, %v5189_v62  ;;  %6091 = vst [vmem:[#allocation39_spill] sm:$0xff] %v5216_v0  ;;  %v376_v20 = vrot.slane %v5197_v54, 1  ;;  %v5229_v62 = vld [vmem:[%s4805_s7 + $0x168] sm:$0xff]  ;;  %6093 = vst [vmem:[#allocation41_spill] sm:$0xff] %v5241_v38 }
  0x54   : > { %v5250_v14 = vsel %vm304_vm1, %v375_v24, %v376_v20  ;;  %v383_v24 = vrot.slane %v5256_v21, 1 }
  0x55   : > { %3864 = vmatmul.mubr.msk.f32.gmra.mrb[24].mxu1 %vm387_vm2, %v5206_v49  ;;  %4090 = vmatmul.mubr.msk.f32.gmra.mrb[8].mxu0 %vm387_vm2, %v5213_v22  ;;  %6095 = vst [vmem:[#allocation43_spill] sm:$0xff] %v5250_v14  ;;  %v1010_v49 = vrot.slane %v4977_v2, 2  ;;  %v380_v22 = vrot.slane %v5229_v62, 1  ;;  %v5270_v2 = vsel %vm304_vm1, %v376_v20, %v378_v60  ;;  %v1018_v20 = vrot.slane %v5026_v29, 2 }
  0x56   : > { %3866 = vmatprep.mubr.msk.f32.mxu1 %vm387_vm2, %v5216_v0  ;;  %4092 = vmatprep.mubr.msk.f32.mxu0 %vm387_vm2, %v5224_v37  ;;  %v381_v0 = vrot.slane %v5232_v44, 1  ;;  %6096 = vst [vmem:[#allocation44_spill] sm:$0xff] %v5270_v2  ;;  %v1022_v60 = vrot.slane %v5051_v53, 2 }
  0x57   : > { %v5276_v41 = vsel %vm971_vm3, %v1008_v61, %v1010_v49  ;;  %v1020_v49 = vrot.slane %v5043_v45, 2 }
  0x58   : > { %v5279_v57 = vsel %vm304_vm1, %v380_v22, %v381_v0  ;;  %v5294_v22 = vsel %vm304_vm1, %v381_v0, %v383_v24  ;;  %v1028_v24 = vrot.slane %v5087_v39, 2  ;;  %v1033_v0 = vrot.slane %v5124_v10, 2 }
  0x59   : > { %3867 = vmatmul.mubr.msk.f32.gmra.mrb[26].mxu1 %vm387_vm2, %v5241_v38  ;;  %4093 = vmatmul.mubr.msk.f32.gmra.mrb[10].mxu0 %vm387_vm2, %v5244_v13  ;;  %6097 = vst [vmem:[#allocation45_spill] sm:$0xff] %v5279_v57  ;;  %v1015_v38 = vrot.slane %v5003_v17, 2  ;;  %v5283_v13 = vsel %vm971_vm3, %v1012_v34, %v1013_v12  ;;  %6098 = vst [vmem:[#allocation46_spill] sm:$0xff] %v5294_v22  ;;  %v1023_v34 = vrot.slane %v5054_v55, 2 }
  0x5a   : > { %3869 = vmatprep.mubr.msk.f32.mxu1 %vm387_vm2, %v5250_v14  ;;  %4095 = vmatprep.mubr.msk.f32.mxu0 %vm387_vm2, %v5259_v48  ;;  %v1017_v14 = vrot.slane %v5023_v28, 2  ;;  %v5316_v45 = vsel %vm971_vm3, %v1018_v20, %v1020_v49 }
  0x5b   : > { %v5299_v17 = vsel %vm971_vm3, %v1013_v12, %v1015_v38  ;;  %v5321_v38 = vsel %vm971_vm3, %v1022_v60, %v1023_v34  ;;  %v1027_v12 = vrot.slane %v5084_v30, 2  ;;  %v1032_v60 = vrot.slane %v5121_v8, 2 }
  0x5c   : > { %v5303_v61 = vsel %vm971_vm3, %v1017_v14, %v1018_v20  ;;  %v1025_v14 = vrot.slane %v5075_v16, 2  ;;  %v1030_v20 = vrot.slane %v5113_v56, 2 }
  0x5d   : > { %3870 = vmatmul.mubr.msk.f32.gmra.mrb[28].mxu1 %vm387_vm2, %v5270_v2  ;;  %4096 = vmatmul.mubr.msk.f32.gmra.mrb[12].mxu0 %vm387_vm2, %v5276_v41  ;;  %v5340_v49 = vsel %vm971_vm3, %v1027_v12, %v1028_v24  ;;  %v1038_v12 = vrot.slane %v5162_v19, 2  ;;  %v1048_v2 = vrot.slane %v5232_v44, 2 }
  0x5e   : > { %3872 = vmatprep.mubr.msk.f32.mxu1 %vm387_vm2, %v5279_v57  ;;  %4098 = vmatprep.mubr.msk.f32.mxu0 %vm387_vm2, %v5283_v13  ;;  %v5336_v16 = vsel %vm971_vm3, %v1023_v34, %v1025_v14  ;;  %6099 = vst [vmem:[#allocation47_spill] sm:$0xff] %v5340_v49  ;;  %v5356_v56 = vsel %vm971_vm3, %v1028_v24, %v1030_v20  ;;  %v1035_v34 = vrot.slane %v5151_v52, 2  ;;  %v1040_v24 = vrot.slane %v5186_v36, 2 }
  0x5f   : > { %v5360_v14 = vsel %vm971_vm3, %v1032_v60, %v1033_v0  ;;  %v1042_v60 = vrot.slane %v5194_v40, 2  ;;  %v1043_v57 = vrot.slane %v5197_v54, 2 }
  0x60   : > { %v5373_v52 = vsel %vm971_vm3, %v1033_v0, %v1035_v34  ;;  %v5390_v36 = vsel %vm971_vm3, %v1038_v12, %v1040_v24  ;;  %v1045_v0 = vrot.slane %v5221_v27, 2 }
  0x61   : > { %3873 = vmatmul.mubr.msk.f32.gmra.mrb[30].mxu1 %vm387_vm2, %v5294_v22  ;;  %4099 = vmatmul.mubr.msk.f32.gmra.mrb[14].mxu0 %vm387_vm2, %v5299_v17  ;;  %v6100_v22 = vrot.slane %v4880_v35, 4  ;;  %6101 = vst [vmem:[#allocation48_spill] sm:$0xff] %v5373_v52  ;;  %6103 = vst [vmem:[#allocation50_spill] sm:$0xff] %v5390_v36  ;;  %v5394_v34 = vsel %vm971_vm3, %v1042_v60, %v1043_v57 }
  0x62   : > { %3877 = vmatprep.mubr.msk.f32.mxu1 %vm387_vm2, %v4808_v4  ;;  %4101 = vmatprep.mubr.msk.f32.mxu0 %vm387_vm2, %v5303_v61  ;;  %6104 = vst [vmem:[#allocation51_spill] sm:$0xff] %v5394_v34  ;;  %v5413_v27 = vsel %vm971_vm3, %v1043_v57, %v1045_v0 }
  0x63   : > { %6105 = vst [vmem:[#allocation52_spill] sm:$0xff] %v5413_v27 }
  0x65   : > { %3878 = vmatmul.mubr.msk.f32.vlgmr.msra.gmra.mrb[0].mxu1 %vm387_vm2, %v4811_v5  ;;  %4102 = vmatmul.mubr.msk.f32.gmra.mrb[16].mxu0 %vm387_vm2, %v5316_v45 }
  0x66   : > { %3926 = vmatpush3.msk.msra.mxu1 %vm452_vm0, %v4880_v35  ;;  %3880 = vmatprep.mubr.msk.f32.mxu1 %vm387_vm2, %v4814_v6  ;;  %v5404_v6 = vld [vmem:[%s4805_s7 + $0x188] sm:$0xff] }
  0x67   : > { %4104 = vmatprep.mubr.msk.f32.mxu0 %vm387_vm2, %v5321_v38  ;;  %3975 = vmatprep.subr.msk.mxu1 %vm452_vm0, %v6100_v22  ;;  %v1037_v22 = vrot.slane %v5159_v46, 2 }
  0x69   : > { %3881 = vmatmul.mubr.msk.f32.gmra.mrb[2].mxu1 %vm387_vm2, %v4819_v9  ;;  %4105 = vmatmul.mubr.msk.f32.gmra.mrb[18].mxu0 %vm387_vm2, %v5336_v16  ;;  %v5377_v20 = vsel %vm971_vm3, %v1037_v22, %v1038_v12  ;;  %v1047_v22 = vrot.slane %v5229_v62, 2  ;;  %v5401_v9 = vld [vmem:[%s4805_s7 + $0x180] sm:$0xff]  ;;  %v1050_v12 = vrot.slane %v5256_v21, 2 }
  0x6a   : > { %3883 = vmatprep.mubr.msk.f32.mxu1 %vm387_vm2, %v4831_v15  ;;  %4107 = vmatprep.mubr.msk.f32.mxu0 %vm387_vm2, %v5340_v49  ;;  %6102 = vst [vmem:[#allocation49_spill] sm:$0xff] %v5377_v20  ;;  %v1912_v60 = vrot.slane %v5401_v9, 2 }
  0x6b   : > { %v5417_v24 = vsel %vm971_vm3, %v1047_v22, %v1048_v2  ;;  %v5433_v21 = vsel %vm971_vm3, %v1048_v2, %v1050_v12  ;;  %v6110_v22 = vrot.slane %v4870_v33, 4  ;;  %v972_v33 = vrot.slane %v4808_v4, 2 }
  0x6c   : > { %6106 = vst [vmem:[#allocation53_spill] sm:$0xff] %v5417_v24  ;;  %6107 = vst [vmem:[#allocation54_spill] sm:$0xff] %v5433_v21  ;;  %v973_v12 = vrot.slane %v4811_v5, 2  ;;  %v6111_v5 = vrot.slane %v4880_v35, 4  ;;  %v6113_v35 = vld [vmem:[#allocation28_spill] sm:$0xff] }
  0x6d   : > { %3884 = vmatmul.mubr.msk.f32.gmra.mrb[4].mxu1 %vm387_vm2, %v4836_v18  ;;  %4108 = vmatmul.mubr.msk.f32.gmra.mrb[20].mxu0 %vm387_vm2, %v5356_v56 }
  0x6e   : > { %3886 = vmatprep.mubr.msk.f32.mxu1 %vm387_vm2, %v4848_v25  ;;  %4110 = vmatprep.mubr.msk.f32.mxu0 %vm387_vm2, %v5360_v14 }
  0x71   : > { %3887 = vmatmul.mubr.msk.f32.gmra.mrb[6].mxu1 %vm387_vm2, %v4851_v26  ;;  %4111 = vmatmul.mubr.msk.f32.gmra.mrb[22].mxu0 %vm387_vm2, %v5373_v52  ;;  %v5422_v52 = vld [vmem:[%s4805_s7 + $0x190] sm:$0x3] }
  0x72   : > { %3889 = vmatprep.mubr.msk.f32.mxu1 %vm387_vm2, %v4862_v31  ;;  %4113 = vmatprep.mubr.msk.f32.mxu0 %vm387_vm2, %v5377_v20  ;;  %v1913_v20 = vrot.slane %v5404_v6, 2  ;;  %v1915_v57 = vrot.slane %v5422_v52, 2 }
  0x74   : > { %v5437_v0 = vsel %vm971_vm3, %v1912_v60, %v1913_v20  ;;  %v5448_v2 = vsel %vm971_vm3, %v1913_v20, %v1915_v57  ;;  %v5463_v20 = vld [vmem:[%s5981_s1 + $0x20] sm:$0xf]  ;;  %v975_v60 = vrot.slane %v4823_v11, 2  ;;  %v974_v57 = vsel %vm971_vm3, %v972_v33, %v973_v12  ;;  %v6112_v11 = vld [vmem:[#allocation26_spill] sm:$0xff]  ;;  %v6117_v33 = vld [vmem:[#allocation36_spill] sm:$0xff] }
  0x75   : > { %3890 = vmatmul.mubr.msk.f32.gmra.mrb[8].mxu1 %vm387_vm2, %v4865_v32  ;;  %4114 = vmatmul.mubr.msk.f32.gmra.mrb[24].mxu0 %vm387_vm2, %v5390_v36  ;;  %6108 = vst [vmem:[#allocation55_spill] sm:$0xff] %v5437_v0  ;;  %6109 = vst [vmem:[#allocation56_spill] sm:$0xff] %v5448_v2 }
  0x76   : > { %3892 = vmatprep.mubr.msk.f32.mxu1 %vm387_vm2, %v4902_v42  ;;  %4116 = vmatprep.mubr.msk.f32.mxu0 %vm387_vm2, %v5394_v34  ;;  %v976_v4 = vsel %vm971_vm3, %v973_v12, %v975_v60  ;;  %v6118_v12 = vld [vmem:[#allocation38_spill] sm:$0xff] }
  0x77   : > { %v5589_v60 = vld [vmem:[%s4805_s7 + $0x198] sm:$0xff] }
  0x79   : > { %3893 = vmatmul.mubr.msk.f32.gmra.mrb[10].mxu1 %vm387_vm2, %v4905_v43  ;;  %4117 = vmatmul.mubr.msk.f32.gmra.mrb[26].mxu0 %vm387_vm2, %v5413_v27 }
  0x7a   : > { %3895 = vmatprep.mubr.msk.f32.mxu1 %vm387_vm2, %v4930_v50  ;;  %4119 = vmatprep.mubr.msk.f32.mxu0 %vm387_vm2, %v5417_v24 }
  0x7d   : > { %3896 = vmatmul.mubr.msk.f32.gmra.mrb[12].mxu1 %vm387_vm2, %v4933_v51  ;;  %4120 = vmatmul.mubr.msk.f32.gmra.mrb[28].mxu0 %vm387_vm2, %v5433_v21 }
  0x7e   : > { %3898 = vmatprep.mubr.msk.f32.mxu1 %vm387_vm2, %v4956_v58  ;;  %4122 = vmatprep.mubr.msk.f32.mxu0 %vm387_vm2, %v5437_v0  ;;  %v6122_v0 = vld [vmem:[#allocation12_spill] sm:$0xff] }
  0x81   : > { %3899 = vmatmul.mubr.msk.f32.gmra.mrb[14].mxu1 %vm387_vm2, %v4959_v59  ;;  %4123 = vmatmul.mubr.msk.f32.gmra.mrb[30].mxu0 %vm387_vm2, %v5448_v2  ;;  %v6121_v2 = vld [vmem:[#allocation11_spill] sm:$0xff] }
  0x82   : > { %3901 = vmatprep.mubr.msk.f32.mxu1 %vm387_vm2, %v4982_v3  ;;  %4127 = vmatprep.mubr.msk.f32.mxu0 %vm387_vm2, %v4831_v15 }
  0x85   : > { %3902 = vmatmul.mubr.msk.f32.gmra.mrb[16].mxu1 %vm387_vm2, %v4985_v7  ;;  %4128 = vmatmul.mubr.msk.f32.vlgmr.msra.gmra.mrb[0].mxu0 %vm387_vm2, %v4836_v18 }
  0x86   : > { %3904 = vmatprep.mubr.msk.f32.mxu1 %vm387_vm2, %v5023_v28  ;;  %4176 = vmatpush3.msk.msra.mxu0 %vm452_vm0, %v6110_v22  ;;  %v6116_v22 = vld [vmem:[#allocation34_spill] sm:$0xff] }
  0x87   : > { %4130 = vmatprep.mubr.msk.f32.mxu0 %vm387_vm2, %v4848_v25  ;;  %4225 = vmatprep.subr.msk.mxu0 %vm452_vm0, %v5463_v20 }
  0x89   : > { %3905 = vmatmul.mubr.msk.f32.gmra.mrb[18].mxu1 %vm387_vm2, %v5026_v29  ;;  %4131 = vmatmul.mubr.msk.f32.gmra.mrb[2].mxu0 %vm387_vm2, %v4851_v26 }
  0x8a   : > { %3907 = vmatprep.mubr.msk.f32.mxu1 %vm387_vm2, %v5051_v53  ;;  %4133 = vmatprep.mubr.msk.f32.mxu0 %vm387_vm2, %v4862_v31 }
  0x8d   : > { %3908 = vmatmul.mubr.msk.f32.gmra.mrb[20].mxu1 %vm387_vm2, %v5054_v55  ;;  %4134 = vmatmul.mubr.msk.f32.gmra.mrb[4].mxu0 %vm387_vm2, %v4865_v32 }
  0x8e   : > { %3910 = vmatprep.mubr.msk.f32.mxu1 %vm387_vm2, %v5084_v30  ;;  %4136 = vmatprep.mubr.msk.f32.mxu0 %vm387_vm2, %v4902_v42 }
  0x91   : > { %3911 = vmatmul.mubr.msk.f32.gmra.mrb[22].mxu1 %vm387_vm2, %v5087_v39  ;;  %4137 = vmatmul.mubr.msk.f32.gmra.mrb[6].mxu0 %vm387_vm2, %v4905_v43 }
  0x92   : > { %3913 = vmatprep.mubr.msk.f32.mxu1 %vm387_vm2, %v5121_v8  ;;  %4139 = vmatprep.mubr.msk.f32.mxu0 %vm387_vm2, %v4930_v50 }
  0x95   : > { %3914 = vmatmul.mubr.msk.f32.gmra.mrb[24].mxu1 %vm387_vm2, %v5124_v10  ;;  %4140 = vmatmul.mubr.msk.f32.gmra.mrb[8].mxu0 %vm387_vm2, %v4933_v51 }
  0x96   : > { %3916 = vmatprep.mubr.msk.f32.mxu1 %vm387_vm2, %v5159_v46  ;;  %4142 = vmatprep.mubr.msk.f32.mxu0 %vm387_vm2, %v4956_v58 }
  0x99   : > { %3917 = vmatmul.mubr.msk.f32.gmra.mrb[26].mxu1 %vm387_vm2, %v5162_v19  ;;  %4143 = vmatmul.mubr.msk.f32.gmra.mrb[10].mxu0 %vm387_vm2, %v4959_v59 }
  0x9a   : > { %3919 = vmatprep.mubr.msk.f32.mxu1 %vm387_vm2, %v5194_v40  ;;  %4145 = vmatprep.mubr.msk.f32.mxu0 %vm387_vm2, %v4982_v3 }
  0x9d   : > { %3920 = vmatmul.mubr.msk.f32.gmra.mrb[28].mxu1 %vm387_vm2, %v5197_v54  ;;  %4146 = vmatmul.mubr.msk.f32.gmra.mrb[12].mxu0 %vm387_vm2, %v4985_v7 }
  0x9e   : > { %3922 = vmatprep.mubr.msk.f32.mxu1 %vm387_vm2, %v5229_v62  ;;  %4148 = vmatprep.mubr.msk.f32.mxu0 %vm387_vm2, %v5023_v28 }
  0xa1   : > { %3923 = vmatmul.mubr.msk.f32.gmra.mrb[30].mxu1 %vm387_vm2, %v5232_v44  ;;  %4149 = vmatmul.mubr.msk.f32.gmra.mrb[14].mxu0 %vm387_vm2, %v5026_v29 }
  0xa2   : > { %3927 = vmatprep.mubr.msk.f32.mxu1 %vm387_vm2, %v974_v57  ;;  %4151 = vmatprep.mubr.msk.f32.mxu0 %vm387_vm2, %v5051_v53  ;;  %v6119_v57 = vld [vmem:[#allocation42_spill] sm:$0xff] }
  0xa5   : > { %3928 = vmatmul.mubr.msk.f32.vlgmr.msra.gmra.mrb[0].mxu1 %vm387_vm2, %v976_v4  ;;  %4152 = vmatmul.mubr.msk.f32.gmra.mrb[16].mxu0 %vm387_vm2, %v5054_v55  ;;  %v5600_v4 = vld [vmem:[%s4805_s7 + $0x1a0] sm:$0xff] }
  0xa6   : > { %3976 = vmatpush3.msk.msra.mxu1 %vm452_vm0, %v6111_v5  ;;  %3930 = vmatprep.mubr.msk.f32.mxu1 %vm387_vm2, %v5046_v47  ;;  %v6114_v47 = vld [vmem:[#allocation30_spill] sm:$0xff] }
  0xa7   : > { %4154 = vmatprep.mubr.msk.f32.mxu0 %vm387_vm2, %v5084_v30  ;;  %4275 = vmatprep.subr.msk.mxu1 %vm452_vm0, %v4789_v1  ;;  %v6120_v5 = vld [vmem:[#allocation10_spill] sm:$0xff] }
  0xa9   : > { %3931 = vmatmul.mubr.msk.f32.gmra.mrb[2].mxu1 %vm387_vm2, %v5067_v63  ;;  %4155 = vmatmul.mubr.msk.f32.gmra.mrb[18].mxu0 %vm387_vm2, %v5087_v39  ;;  %v6115_v63 = vld [vmem:[#allocation32_spill] sm:$0xff] }
  0xaa   : > { %3933 = vmatprep.mubr.msk.f32.mxu1 %vm387_vm2, %v5079_v23  ;;  %4157 = vmatprep.mubr.msk.f32.mxu0 %vm387_vm2, %v5121_v8 }
  0xad   : > { %3934 = vmatmul.mubr.msk.f32.gmra.mrb[4].mxu1 %vm387_vm2, %v6112_v11  ;;  %4158 = vmatmul.mubr.msk.f32.gmra.mrb[20].mxu0 %vm387_vm2, %v5124_v10 }
  0xae   : > { %3936 = vmatprep.mubr.msk.f32.mxu1 %vm387_vm2, %v6113_v35  ;;  %4160 = vmatprep.mubr.msk.f32.mxu0 %vm387_vm2, %v5159_v46 }
  0xb1   : > { %3937 = vmatmul.mubr.msk.f32.gmra.mrb[6].mxu1 %vm387_vm2, %v6114_v47  ;;  %4161 = vmatmul.mubr.msk.f32.gmra.mrb[22].mxu0 %vm387_vm2, %v5162_v19 }
  0xb2   : > { %3939 = vmatprep.mubr.msk.f32.mxu1 %vm387_vm2, %v6115_v63  ;;  %4163 = vmatprep.mubr.msk.f32.mxu0 %vm387_vm2, %v5194_v40 }
  0xb5   : > { %3940 = vmatmul.mubr.msk.f32.gmra.mrb[8].mxu1 %vm387_vm2, %v6116_v22  ;;  %4164 = vmatmul.mubr.msk.f32.gmra.mrb[24].mxu0 %vm387_vm2, %v5197_v54 }
  0xb6   : > { %3942 = vmatprep.mubr.msk.f32.mxu1 %vm387_vm2, %v6117_v33  ;;  %4166 = vmatprep.mubr.msk.f32.mxu0 %vm387_vm2, %v5229_v62 }
  0xb9   : > { %3943 = vmatmul.mubr.msk.f32.gmra.mrb[10].mxu1 %vm387_vm2, %v6118_v12  ;;  %4167 = vmatmul.mubr.msk.f32.gmra.mrb[26].mxu0 %vm387_vm2, %v5232_v44  ;;  %v6123_v44 = vld [vmem:[#allocation13_spill] sm:$0xff] }
  0xba   : > { %3945 = vmatprep.mubr.msk.f32.mxu1 %vm387_vm2, %v5224_v37  ;;  %4169 = vmatprep.mubr.msk.f32.mxu0 %vm387_vm2, %v5401_v9 }
  0xbd   : > { %3946 = vmatmul.mubr.msk.f32.gmra.mrb[12].mxu1 %vm387_vm2, %v6119_v57  ;;  %4170 = vmatmul.mubr.msk.f32.gmra.mrb[28].mxu0 %vm387_vm2, %v5404_v6 }
  0xbe   : > { %3948 = vmatprep.mubr.msk.f32.mxu1 %vm387_vm2, %v5259_v48  ;;  %4172 = vmatprep.mubr.msk.f32.mxu0 %vm387_vm2, %v5589_v60 }
  0xc1   : > { %3949 = vmatmul.mubr.msk.f32.gmra.mrb[14].mxu1 %vm387_vm2, %v5276_v41  ;;  %4173 = vmatmul.mubr.msk.f32.gmra.mrb[30].mxu0 %vm387_vm2, %v5600_v4 }
  0xc2   : > { %3951 = vmatprep.mubr.msk.f32.mxu1 %vm387_vm2, %v5283_v13  ;;  %4177 = vmatprep.mubr.msk.f32.mxu0 %vm387_vm2, %v6120_v5  ;;  %v6124_v5 = vld [vmem:[#allocation14_spill] sm:$0xff] }
  0xc5   : > { %3952 = vmatmul.mubr.msk.f32.gmra.mrb[16].mxu1 %vm387_vm2, %v5299_v17  ;;  %4178 = vmatmul.mubr.msk.f32.vlgmr.msra.gmra.mrb[0].mxu0 %vm387_vm2, %v6121_v2  ;;  %v6125_v2 = vld [vmem:[#allocation15_spill] sm:$0xff] }
  0xc6   : > { %3954 = vmatprep.mubr.msk.f32.mxu1 %vm387_vm2, %v5303_v61  ;;  %4226 = vmatpush3.msk.msra.mxu0 %vm452_vm0, %v5463_v20  ;;  %v6128_v20 = vld [vmem:[#allocation18_spill] sm:$0xff] }
  0xc7   : > { %4180 = vmatprep.mubr.msk.f32.mxu0 %vm387_vm2, %v6122_v0  ;;  %v6126_v0 = vld [vmem:[#allocation16_spill] sm:$0xff] }
  0xc9   : > { %3955 = vmatmul.mubr.msk.f32.gmra.mrb[18].mxu1 %vm387_vm2, %v5316_v45  ;;  %4181 = vmatmul.mubr.msk.f32.gmra.mrb[2].mxu0 %vm387_vm2, %v6123_v44  ;;  %v6127_v44 = vld [vmem:[#allocation17_spill] sm:$0xff] }
  0xca   : > { %3957 = vmatprep.mubr.msk.f32.mxu1 %vm387_vm2, %v5321_v38  ;;  %4183 = vmatprep.mubr.msk.f32.mxu0 %vm387_vm2, %v6124_v5  ;;  %v6129_v5 = vld [vmem:[#allocation48_spill] sm:$0xff] }
  0xcd   : > { %3958 = vmatmul.mubr.msk.f32.gmra.mrb[20].mxu1 %vm387_vm2, %v5336_v16  ;;  %4184 = vmatmul.mubr.msk.f32.gmra.mrb[4].mxu0 %vm387_vm2, %v6125_v2  ;;  %v6130_v2 = vld [vmem:[#allocation19_spill] sm:$0xff] }
  0xce   : > { %3960 = vmatprep.mubr.msk.f32.mxu1 %vm387_vm2, %v5340_v49  ;;  %4186 = vmatprep.mubr.msk.f32.mxu0 %vm387_vm2, %v6126_v0  ;;  %v6131_v49 = vld [vmem:[#allocation49_spill] sm:$0xff]  ;;  %v6132_v0 = vld [vmem:[#allocation20_spill] sm:$0xff] }
  0xd1   : > { %3961 = vmatmul.mubr.msk.f32.gmra.mrb[22].mxu1 %vm387_vm2, %v5356_v56  ;;  %4187 = vmatmul.mubr.msk.f32.gmra.mrb[6].mxu0 %vm387_vm2, %v6127_v44  ;;  %v6133_v44 = vld [vmem:[#allocation21_spill] sm:$0xff] }
  0xd2   : > { %3963 = vmatprep.mubr.msk.f32.mxu1 %vm387_vm2, %v5360_v14  ;;  %4189 = vmatprep.mubr.msk.f32.mxu0 %vm387_vm2, %v6128_v20  ;;  %v6134_v20 = vld [vmem:[#allocation22_spill] sm:$0xff] }
  0xd5   : > { %3964 = vmatmul.mubr.msk.f32.gmra.mrb[24].mxu1 %vm387_vm2, %v6129_v5  ;;  %4190 = vmatmul.mubr.msk.f32.gmra.mrb[8].mxu0 %vm387_vm2, %v6130_v2  ;;  %v6135_v2 = vld [vmem:[#allocation23_spill] sm:$0xff] }
  0xd6   : > { %3966 = vmatprep.mubr.msk.f32.mxu1 %vm387_vm2, %v6131_v49  ;;  %4192 = vmatprep.mubr.msk.f32.mxu0 %vm387_vm2, %v6132_v0  ;;  %v6136_v0 = vld [vmem:[#allocation24_spill] sm:$0xff] }
  0xd9   : > { %3967 = vmatmul.mubr.msk.f32.gmra.mrb[26].mxu1 %vm387_vm2, %v5390_v36  ;;  %4193 = vmatmul.mubr.msk.f32.gmra.mrb[10].mxu0 %vm387_vm2, %v6133_v44  ;;  %v6137_v44 = vld [vmem:[#allocation25_spill] sm:$0xff]  ;;  %v5727_v36 = vld [vmem:[%s4805_s7 + $0x1a8] sm:$0x3]  ;;  %s5908_s7 = scalar_lea.hbm %s5983_s3, %s3524_s23 }
  0xda   : > { %3969 = vmatprep.mubr.msk.f32.mxu1 %vm387_vm2, %v5394_v34  ;;  %4195 = vmatprep.mubr.msk.f32.mxu0 %vm387_vm2, %v6134_v20  ;;  %v6138_v34 = vld [vmem:[#allocation8_spill] sm:$0xff]  ;;  %v6139_v20 = vld [vmem:[#allocation27_spill] sm:$0xff] }
  0xdd   : > { %3970 = vmatmul.mubr.msk.f32.gmra.mrb[28].mxu1 %vm387_vm2, %v5413_v27  ;;  %4196 = vmatmul.mubr.msk.f32.gmra.mrb[12].mxu0 %vm387_vm2, %v6135_v2  ;;  %v6140_v27 = vld [vmem:[#allocation9_spill] sm:$0xff] }
  0xde   : > { %3972 = vmatprep.mubr.msk.f32.mxu1 %vm387_vm2, %v5417_v24  ;;  %4198 = vmatprep.mubr.msk.f32.mxu0 %vm387_vm2, %v6136_v0  ;;  %v6141_v2 = vld [vmem:[#allocation29_spill] sm:$0xff]  ;;  %v6149_v24 = vld [vmem:[#allocation44_spill] sm:$0xff] }
  0xe1   : > { %3973 = vmatmul.mubr.msk.f32.gmra.mrb[30].mxu1 %vm387_vm2, %v5433_v21  ;;  %4199 = vmatmul.mubr.msk.f32.gmra.mrb[14].mxu0 %vm387_vm2, %v6137_v44  ;;  %v6142_v21 = vld [vmem:[#allocation31_spill] sm:$0xff] }
  0xe2   : > { %3977 = vmatprep.mubr.msk.f32.mxu1 %vm387_vm2, %v6138_v34  ;;  %4201 = vmatprep.mubr.msk.f32.mxu0 %vm387_vm2, %v6139_v20  ;;  %v6143_v34 = vld [vmem:[#allocation33_spill] sm:$0xff] }
  0xe5   : > { %3978 = vmatmul.mubr.msk.f32.vlgmr.msra.gmra.mrb[0].mxu1 %vm387_vm2, %v6140_v27  ;;  %4202 = vmatmul.mubr.msk.f32.gmra.mrb[16].mxu0 %vm387_vm2, %v6141_v2  ;;  %v6144_v27 = vld [vmem:[#allocation35_spill] sm:$0xff] }
  0xe6   : > { %4276 = vmatpush3.msk.msra.mxu1 %vm452_vm0, %v4789_v1  ;;  %3980 = vmatprep.mubr.msk.f32.mxu1 %vm387_vm2, %v4831_v15  ;;  %v6145_v1 = vld [vmem:[#allocation37_spill] sm:$0xff]  ;;  %v6146_v15 = vld [vmem:[#allocation39_spill] sm:$0xff] }
  0xe7   : > { %4204 = vmatprep.mubr.msk.f32.mxu0 %vm387_vm2, %v6142_v21 }
  0xe9   : > { %3981 = vmatmul.mubr.msk.f32.gmra.mrb[2].mxu1 %vm387_vm2, %v4836_v18  ;;  %4205 = vmatmul.mubr.msk.f32.gmra.mrb[18].mxu0 %vm387_vm2, %v6143_v34  ;;  %v6147_v18 = vld [vmem:[#allocation41_spill] sm:$0xff] }
  0xea   : > { %3983 = vmatprep.mubr.msk.f32.mxu1 %vm387_vm2, %v4848_v25  ;;  %4207 = vmatprep.mubr.msk.f32.mxu0 %vm387_vm2, %v6144_v27  ;;  %v6148_v25 = vld [vmem:[#allocation43_spill] sm:$0xff] }
  0xed   : > { %3984 = vmatmul.mubr.msk.f32.gmra.mrb[4].mxu1 %vm387_vm2, %v4851_v26  ;;  %4208 = vmatmul.mubr.msk.f32.gmra.mrb[20].mxu0 %vm387_vm2, %v6145_v1  ;;  %v1643_v26 = vrot.slane %v5401_v9, 1 }
  0xee   : > { %3986 = vmatprep.mubr.msk.f32.mxu1 %vm387_vm2, %v4862_v31  ;;  %4210 = vmatprep.mubr.msk.f32.mxu0 %vm387_vm2, %v6146_v15  ;;  %v1644_v31 = vrot.slane %v5404_v6, 1 }
  0xf0   : > { %v5724_v15 = vsel %vm304_vm1, %v1643_v26, %v1644_v31 }
  0xf1   : > { %3987 = vmatmul.mubr.msk.f32.gmra.mrb[6].mxu1 %vm387_vm2, %v4865_v32  ;;  %4211 = vmatmul.mubr.msk.f32.gmra.mrb[22].mxu0 %vm387_vm2, %v6147_v18  ;;  %v6150_v32 = vld [vmem:[#allocation45_spill] sm:$0xff]  ;;  %v2449_v18 = vrot.slane %v5600_v4, 1 }
  0xf2   : > { %3989 = vmatprep.mubr.msk.f32.mxu1 %vm387_vm2, %v4902_v42  ;;  %4213 = vmatprep.mubr.msk.f32.mxu0 %vm387_vm2, %v6148_v25  ;;  %v1646_v42 = vrot.slane %v5422_v52, 1  ;;  %v2448_v25 = vrot.slane %v5589_v60, 1  ;;  %v2451_v52 = vrot.slane %v5727_v36, 1 }
  0xf4   : > { %v2450_v26 = vsel %vm304_vm1, %v2448_v25, %v2449_v18 }
  0xf5   : > { %3990 = vmatmul.mubr.msk.f32.gmra.mrb[8].mxu1 %vm387_vm2, %v4905_v43  ;;  %4214 = vmatmul.mubr.msk.f32.gmra.mrb[24].mxu0 %vm387_vm2, %v6149_v24  ;;  %v6151_v43 = vld [vmem:[#allocation46_spill] sm:$0xff] }
  0xf6   : > { %3992 = vmatprep.mubr.msk.f32.mxu1 %vm387_vm2, %v4930_v50  ;;  %4216 = vmatprep.mubr.msk.f32.mxu0 %vm387_vm2, %v6150_v32  ;;  %v5738_v50 = vsel %vm304_vm1, %v1644_v31, %v1646_v42 }
  0xf9   : > { %3993 = vmatmul.mubr.msk.f32.gmra.mrb[10].mxu1 %vm387_vm2, %v4933_v51  ;;  %4217 = vmatmul.mubr.msk.f32.gmra.mrb[26].mxu0 %vm387_vm2, %v6151_v43  ;;  %v2452_v51 = vsel %vm304_vm1, %v2449_v18, %v2451_v52 }
  0xfa   : > { %3995 = vmatprep.mubr.msk.f32.mxu1 %vm387_vm2, %v4956_v58  ;;  %4219 = vmatprep.mubr.msk.f32.mxu0 %vm387_vm2, %v5724_v15  ;;  %v6155_v58 = vld [vmem:[#allocation39_spill] sm:$0xff] }
  0xfd   : > { %3996 = vmatmul.mubr.msk.f32.gmra.mrb[12].mxu1 %vm387_vm2, %v4959_v59  ;;  %4220 = vmatmul.mubr.msk.f32.gmra.mrb[28].mxu0 %vm387_vm2, %v5738_v50  ;;  %v6156_v59 = vld [vmem:[#allocation51_spill] sm:$0xff] }
  0xfe   : > { %3998 = vmatprep.mubr.msk.f32.mxu1 %vm387_vm2, %v4982_v3  ;;  %4222 = vmatprep.mubr.msk.f32.mxu0 %vm387_vm2, %v2450_v26  ;;  %v6157_v3 = vld [vmem:[#allocation41_spill] sm:$0xff] }
 0x101   : > { %3999 = vmatmul.mubr.msk.f32.gmra.mrb[14].mxu1 %vm387_vm2, %v4985_v7  ;;  %4223 = vmatmul.mubr.msk.f32.gmra.mrb[30].mxu0 %vm387_vm2, %v2452_v51  ;;  %v6158_v7 = vld [vmem:[#allocation52_spill] sm:$0xff] }
 0x102   : > { %4001 = vmatprep.mubr.msk.f32.mxu1 %vm387_vm2, %v5023_v28  ;;  %4227 = vmatprep.mubr.msk.f32.mxu0 %vm387_vm2, %v5079_v23  ;;  %v6160_v28 = vld [vmem:[#allocation53_spill] sm:$0xff]  ;;  %v6162_v23 = vld [vmem:[#allocation55_spill] sm:$0xff] }
 0x105   : > { %4002 = vmatmul.mubr.msk.f32.gmra.mrb[16].mxu1 %vm387_vm2, %v5026_v29  ;;  %4228 = vmatmul.mubr.msk.f32.vlgmr.msra.gmra.mrb[0].mxu0 %vm387_vm2, %v6112_v11  ;;  %v2717_v29 = vrot.slane %v5589_v60, 2 }
 0x106   : > { %4004 = vmatprep.mubr.msk.f32.mxu1 %vm387_vm2, %v5051_v53  ;;  %4230 = vmatprep.mubr.msk.f32.mxu0 %vm387_vm2, %v6113_v35  ;;  %v2718_v53 = vrot.slane %v5600_v4, 2 }
 0x109   : > { %4005 = vmatmul.mubr.msk.f32.gmra.mrb[18].mxu1 %vm387_vm2, %v5054_v55  ;;  %4231 = vmatmul.mubr.msk.f32.gmra.mrb[2].mxu0 %vm387_vm2, %v6114_v47  ;;  %v6161_v55 = vld [vmem:[#allocation54_spill] sm:$0xff] }
 0x10a   : > { %4007 = vmatprep.mubr.msk.f32.mxu1 %vm387_vm2, %v5084_v30  ;;  %4233 = vmatprep.mubr.msk.f32.mxu0 %vm387_vm2, %v6115_v63  ;;  %v2720_v30 = vrot.slane %v5727_v36, 2 }
 0x10d   : > { %4008 = vmatmul.mubr.msk.f32.gmra.mrb[20].mxu1 %vm387_vm2, %v5087_v39  ;;  %4234 = vmatmul.mubr.msk.f32.gmra.mrb[4].mxu0 %vm387_vm2, %v6116_v22  ;;  %v2719_v39 = vsel %vm971_vm3, %v2717_v29, %v2718_v53 }
 0x10e   : > { %4010 = vmatprep.mubr.msk.f32.mxu1 %vm387_vm2, %v5121_v8  ;;  %4236 = vmatprep.mubr.msk.f32.mxu0 %vm387_vm2, %v6117_v33  ;;  %v6159_v8 = vld [vmem:[#allocation43_spill] sm:$0xff] }
 0x111   : > { %4011 = vmatmul.mubr.msk.f32.gmra.mrb[22].mxu1 %vm387_vm2, %v5124_v10  ;;  %4237 = vmatmul.mubr.msk.f32.gmra.mrb[6].mxu0 %vm387_vm2, %v6118_v12  ;;  %v6163_v10 = vld [vmem:[#allocation56_spill] sm:$0xff] }
 0x112   : > { %4013 = vmatprep.mubr.msk.f32.mxu1 %vm387_vm2, %v5159_v46  ;;  %4239 = vmatprep.mubr.msk.f32.mxu0 %vm387_vm2, %v5224_v37  ;;  %v6152_v46 = vld [vmem:[#allocation40_spill] sm:$0xff] }
 0x115   : > { %4014 = vmatmul.mubr.msk.f32.gmra.mrb[24].mxu1 %vm387_vm2, %v5162_v19  ;;  %4240 = vmatmul.mubr.msk.f32.gmra.mrb[8].mxu0 %vm387_vm2, %v6119_v57  ;;  %v2721_v19 = vsel %vm971_vm3, %v2718_v53, %v2720_v30 }
 0x116   : > { %4016 = vmatprep.mubr.msk.f32.mxu1 %vm387_vm2, %v5194_v40  ;;  %4242 = vmatprep.mubr.msk.f32.mxu0 %vm387_vm2, %v5259_v48 }
 0x119   : > { %4017 = vmatmul.mubr.msk.f32.gmra.mrb[26].mxu1 %vm387_vm2, %v5197_v54  ;;  %4243 = vmatmul.mubr.msk.f32.gmra.mrb[10].mxu0 %vm387_vm2, %v5276_v41 }
 0x11a   : > { %4019 = vmatprep.mubr.msk.f32.mxu1 %vm387_vm2, %v5229_v62  ;;  %4245 = vmatprep.mubr.msk.f32.mxu0 %vm387_vm2, %v5283_v13 }
 0x11d   : > { %4020 = vmatmul.mubr.msk.f32.gmra.mrb[28].mxu1 %vm387_vm2, %v6152_v46  ;;  %4246 = vmatmul.mubr.msk.f32.gmra.mrb[12].mxu0 %vm387_vm2, %v5299_v17 }
 0x11e   : > { %4022 = vmatprep.mubr.msk.f32.mxu1 %vm387_vm2, %v5401_v9  ;;  %4248 = vmatprep.mubr.msk.f32.mxu0 %vm387_vm2, %v5303_v61  ;;  %v6153_v9 = vld [vmem:[#allocation47_spill] sm:$0xff] }
 0x121   : > { %4023 = vmatmul.mubr.msk.f32.gmra.mrb[30].mxu1 %vm387_vm2, %v5404_v6  ;;  %4249 = vmatmul.mubr.msk.f32.gmra.mrb[14].mxu0 %vm387_vm2, %v5316_v45  ;;  %v6154_v6 = vld [vmem:[#allocation50_spill] sm:$0xff] }
 0x122   : > { %4051 = vmatprep.mubr.msk.f32.mxu1 %vm387_vm2, %v6136_v0  ;;  %4251 = vmatprep.mubr.msk.f32.mxu0 %vm387_vm2, %v5321_v38 }
 0x125   : > { %4052 = vmatmul.mubr.msk.f32.vlgmr.msra.gmra.mrb[16].mxu1 %vm387_vm2, %v6137_v44  ;;  %4252 = vmatmul.mubr.msk.f32.gmra.mrb[16].mxu0 %vm387_vm2, %v5336_v16 }
 0x126   : > { %4054 = vmatprep.mubr.msk.f32.mxu1 %vm387_vm2, %v6139_v20  ;;  %4254 = vmatprep.mubr.msk.f32.mxu0 %vm387_vm2, %v6153_v9 }
 0x129   : > { %4055 = vmatmul.mubr.msk.f32.gmra.mrb[18].mxu1 %vm387_vm2, %v6141_v2  ;;  %4255 = vmatmul.mubr.msk.f32.gmra.mrb[18].mxu0 %vm387_vm2, %v5356_v56 }
 0x12a   : > { %4057 = vmatprep.mubr.msk.f32.mxu1 %vm387_vm2, %v6142_v21  ;;  %4257 = vmatprep.mubr.msk.f32.mxu0 %vm387_vm2, %v5360_v14 }
 0x12d   : > { %4058 = vmatmul.mubr.msk.f32.gmra.mrb[20].mxu1 %vm387_vm2, %v6143_v34  ;;  %4258 = vmatmul.mubr.msk.f32.gmra.mrb[20].mxu0 %vm387_vm2, %v6129_v5 }
 0x12e   : > { %4060 = vmatprep.mubr.msk.f32.mxu1 %vm387_vm2, %v6144_v27  ;;  %4260 = vmatprep.mubr.msk.f32.mxu0 %vm387_vm2, %v6131_v49 }
 0x131   : > { %4061 = vmatmul.mubr.msk.f32.gmra.mrb[22].mxu1 %vm387_vm2, %v6145_v1  ;;  %4261 = vmatmul.mubr.msk.f32.gmra.mrb[22].mxu0 %vm387_vm2, %v6154_v6 }
 0x132   : > { %4063 = vmatprep.mubr.msk.f32.mxu1 %vm387_vm2, %v6155_v58  ;;  %4263 = vmatprep.mubr.msk.f32.mxu0 %vm387_vm2, %v6156_v59 }
 0x135   : > { %4064 = vmatmul.mubr.msk.f32.gmra.mrb[24].mxu1 %vm387_vm2, %v6157_v3  ;;  %4264 = vmatmul.mubr.msk.f32.gmra.mrb[24].mxu0 %vm387_vm2, %v6158_v7 }
 0x136   : > { %4066 = vmatprep.mubr.msk.f32.mxu1 %vm387_vm2, %v6159_v8  ;;  %4266 = vmatprep.mubr.msk.f32.mxu0 %vm387_vm2, %v6160_v28 }
 0x139   : > { %4067 = vmatmul.mubr.msk.f32.gmra.mrb[26].mxu1 %vm387_vm2, %v6149_v24  ;;  %4267 = vmatmul.mubr.msk.f32.gmra.mrb[26].mxu0 %vm387_vm2, %v6161_v55 }
 0x13a   : > { %4069 = vmatprep.mubr.msk.f32.mxu1 %vm387_vm2, %v6150_v32  ;;  %4269 = vmatprep.mubr.msk.f32.mxu0 %vm387_vm2, %v6162_v23 }
 0x13d   : > { %4070 = vmatmul.mubr.msk.f32.gmra.mrb[28].mxu1 %vm387_vm2, %v6151_v43  ;;  %4270 = vmatmul.mubr.msk.f32.gmra.mrb[28].mxu0 %vm387_vm2, %v6163_v10 }
 0x13e   : > { %4072 = vmatprep.mubr.msk.f32.mxu1 %vm387_vm2, %v5724_v15  ;;  %4272 = vmatprep.mubr.msk.f32.mxu0 %vm387_vm2, %v2719_v39 }
 0x141   : > { %4073 = vmatmul.mubr.msk.f32.gmra.mrb[30].mxu1 %vm387_vm2, %v5738_v50  ;;  %4273 = vmatmul.mubr.msk.f32.gmra.mrb[30].mxu0 %vm387_vm2, %v2721_v19 }
 0x1b8   : > { %v3979_v62 = vpop.f32.mrb[0].mxu1 }
 0x1b9   : > { %v1451_v40 = vpop.f32.mrb[1].mxu1 }
 0x1bc   : > { %v3982_v54 = vpop.f32.mrb[2].mxu1 }
 0x1bd   : > { %v1461_v37 = vpop.f32.mrb[3].mxu1 }
 0x1c0   : > { %v3985_v13 = vpop.f32.mrb[4].mxu1 }
 0x1c1   : > { %v1471_v48 = vpop.f32.mrb[5].mxu1 }
 0x1c4   : > { %v3988_v41 = vpop.f32.mrb[6].mxu1 }
 0x1c5   : > { %v1481_v17 = vpop.f32.mrb[7].mxu1 }
 0x1c8   : > { %v3991_v61 = vpop.f32.mrb[8].mxu1 }
 0x1c9   : > { %v1491_v45 = vpop.f32.mrb[9].mxu1 }
 0x1cc   : > { %v3994_v38 = vpop.f32.mrb[10].mxu1 }
 0x1cd   : > { %v1501_v16 = vpop.f32.mrb[11].mxu1 }
 0x1d0   : > { %v3997_v49 = vpop.f32.mrb[12].mxu1 }
 0x1d1   : > { %v1511_v56 = vpop.f32.mrb[13].mxu1 }
 0x1d4   : > { %v5884_v14 = vpop.f32.mrb[14].mxu1 }
 0x1d5   : > { %v5886_v36 = vpop.f32.mrb[15].mxu1 }
 0x1d8   : > { %v4229_v24 = vpop.f32.mrb[0].mxu0 }
 0x1d9   : > { %v4277_v21 = vadd.f32 %v4229_v24, %v3979_v62  ;;  %v2795_v11 = vpop.f32.mrb[1].mxu0 }
 0x1da   : > { %v4278_v35 = vadd.f32 %v2795_v11, %v1451_v40 }
 0x1db   : > { %v3025_v47 = vmul.f32 %v4277_v21, %v4277_v21 }
 0x1dc   : > { %v2986_v63 = vadd.f32 %v4278_v35, %v4277_v21  ;;  %v3024_v22 = vmul.f32 %v4278_v35, %v4278_v35  ;;  %v4232_v33 = vpop.f32.mrb[2].mxu0 }
 0x1dd   : > { %v4279_v12 = vadd.f32 %v4232_v33, %v3982_v54  ;;  %v2805_v60 = vpop.f32.mrb[3].mxu0 }
 0x1de   : > { %v3056_v57 = vadd.f32 %v3025_v47, %v3024_v22  ;;  %v4280_v4 = vadd.f32 %v2805_v60, %v1461_v37 }
 0x1df   : > { %v3027_v34 = vmul.f32 %v4279_v12, %v4279_v12 }
 0x1e0   : > { %v2987_v5 = vadd.f32 %v4280_v4, %v2986_v63  ;;  %v3026_v0 = vmul.f32 %v4280_v4, %v4280_v4  ;;  %v4235_v44 = vpop.f32.mrb[4].mxu0 }
 0x1e1   : > { %v4281_v20 = vadd.f32 %v4235_v44, %v3985_v13  ;;  %v2815_v2 = vpop.f32.mrb[5].mxu0 }
 0x1e2   : > { %v3057_v27 = vadd.f32 %v3056_v57, %v3026_v0  ;;  %v4282_v1 = vadd.f32 %v2815_v2, %v1471_v48  ;;  %v2988_v15 = vadd.f32 %v4279_v12, %v2987_v5 }
 0x1e3   : > { %v3029_v50 = vmul.f32 %v4281_v20, %v4281_v20 }
 0x1e4   : > { %v2989_v18 = vadd.f32 %v4282_v1, %v2988_v15  ;;  %v3028_v25 = vmul.f32 %v4282_v1, %v4282_v1  ;;  %v3058_v31 = vadd.f32 %v3057_v27, %v3027_v34  ;;  %v4238_v32 = vpop.f32.mrb[6].mxu0 }
 0x1e5   : > { %v4283_v42 = vadd.f32 %v4238_v32, %v3988_v41  ;;  %v2825_v43 = vpop.f32.mrb[7].mxu0 }
 0x1e6   : > { %v3059_v52 = vadd.f32 %v3058_v31, %v3028_v25  ;;  %v4284_v26 = vadd.f32 %v2825_v43, %v1481_v17  ;;  %v2990_v51 = vadd.f32 %v4281_v20, %v2989_v18 }
 0x1e7   : > { %v3031_v7 = vmul.f32 %v4283_v42, %v4283_v42 }
 0x1e8   : > { %v2991_v46 = vadd.f32 %v4284_v26, %v2990_v51  ;;  %v3030_v9 = vmul.f32 %v4284_v26, %v4284_v26  ;;  %v3060_v6 = vadd.f32 %v3059_v52, %v3029_v50  ;;  %v4241_v58 = vpop.f32.mrb[8].mxu0 }
 0x1e9   : > { %v4285_v59 = vadd.f32 %v4241_v58, %v3991_v61  ;;  %v2835_v3 = vpop.f32.mrb[9].mxu0 }
 0x1ea   : > { %v3061_v8 = vadd.f32 %v3060_v6, %v3030_v9  ;;  %v4286_v28 = vadd.f32 %v2835_v3, %v1491_v45  ;;  %v2992_v29 = vadd.f32 %v4283_v42, %v2991_v46 }
 0x1eb   : > { %v3033_v19 = vmul.f32 %v4285_v59, %v4285_v59 }
 0x1ec   : > { %v2993_v53 = vadd.f32 %v4286_v28, %v2992_v29  ;;  %v3032_v55 = vmul.f32 %v4286_v28, %v4286_v28  ;;  %v3062_v23 = vadd.f32 %v3061_v8, %v3031_v7  ;;  %v4244_v30 = vpop.f32.mrb[10].mxu0 }
 0x1ed   : > { %v4287_v39 = vadd.f32 %v4244_v30, %v3994_v38  ;;  %v2845_v10 = vpop.f32.mrb[11].mxu0 }
 0x1ee   : > { %v3063_v62 = vadd.f32 %v3062_v23, %v3032_v55  ;;  %v4288_v40 = vadd.f32 %v2845_v10, %v1501_v16  ;;  %v2994_v54 = vadd.f32 %v4285_v59, %v2993_v53 }
 0x1ef   : > { %v3035_v24 = vmul.f32 %v4287_v39, %v4287_v39 }
 0x1f0   : > { %v2995_v37 = vadd.f32 %v4288_v40, %v2994_v54  ;;  %v3034_v13 = vmul.f32 %v4288_v40, %v4288_v40  ;;  %v3064_v48 = vadd.f32 %v3063_v62, %v3033_v19  ;;  %v4247_v41 = vpop.f32.mrb[12].mxu0 }
 0x1f1   : > { %v4289_v17 = vadd.f32 %v4247_v41, %v3997_v49  ;;  %v2855_v61 = vpop.f32.mrb[13].mxu0 }
 0x1f2   : > { %v3065_v21 = vadd.f32 %v3064_v48, %v3034_v13  ;;  %v4290_v45 = vadd.f32 %v2855_v61, %v1511_v56  ;;  %v2996_v11 = vadd.f32 %v4287_v39, %v2995_v37 }
 0x1f3   : > { %v3037_v12 = vmul.f32 %v4289_v17, %v4289_v17 }
 0x1f4   : > { %v2997_v35 = vadd.f32 %v4290_v45, %v2996_v11  ;;  %v3036_v47 = vmul.f32 %v4290_v45, %v4290_v45  ;;  %v3066_v63 = vadd.f32 %v3065_v21, %v3035_v24  ;;  %v4250_v22 = vpop.f32.mrb[14].mxu0 }
 0x1f5   : > { %v4291_v38 = vadd.f32 %v4250_v22, %v5884_v14  ;;  %v2865_v33 = vpop.f32.mrb[15].mxu0 }
 0x1f6   : > { %v3067_v16 = vadd.f32 %v3066_v63, %v3036_v47  ;;  %v4292_v60 = vadd.f32 %v2865_v33, %v5886_v36  ;;  %v2998_v57 = vadd.f32 %v4289_v17, %v2997_v35 }
 0x1f7   : > { %v3039_v34 = vmul.f32 %v4291_v38, %v4291_v38 }
 0x1f8   : > { %v4053_v4 = vpop.f32.mrb[16].mxu1  ;;  %v2999_v5 = vadd.f32 %v4292_v60, %v2998_v57  ;;  %v3038_v49 = vmul.f32 %v4292_v60, %v4292_v60  ;;  %v3068_v0 = vadd.f32 %v3067_v16, %v3037_v12  ;;  %v4253_v44 = vpop.f32.mrb[16].mxu0 }
 0x1f9   : > { %v1801_v20 = vpop.f32.mrb[17].mxu1  ;;  %v4293_v56 = vadd.f32 %v4253_v44, %v4053_v4  ;;  %v2875_v2 = vpop.f32.mrb[17].mxu0 }
 0x1fa   : > { %v3069_v27 = vadd.f32 %v3068_v0, %v3038_v49  ;;  %v4294_v1 = vadd.f32 %v2875_v2, %v1801_v20  ;;  %v3000_v15 = vadd.f32 %v4291_v38, %v2999_v5 }
 0x1fb   : > { %v3041_v50 = vmul.f32 %v4293_v56, %v4293_v56 }
 0x1fc   : > { %v4056_v18 = vpop.f32.mrb[18].mxu1  ;;  %v3001_v14 = vadd.f32 %v4294_v1, %v3000_v15  ;;  %v3040_v25 = vmul.f32 %v4294_v1, %v4294_v1  ;;  %v3070_v31 = vadd.f32 %v3069_v27, %v3039_v34  ;;  %v4256_v32 = vpop.f32.mrb[18].mxu0 }
 0x1fd   : > { %v1811_v42 = vpop.f32.mrb[19].mxu1  ;;  %v4295_v36 = vadd.f32 %v4256_v32, %v4056_v18  ;;  %v2885_v43 = vpop.f32.mrb[19].mxu0 }
 0x1fe   : > { %v3071_v52 = vadd.f32 %v3070_v31, %v3040_v25  ;;  %v4296_v26 = vadd.f32 %v2885_v43, %v1811_v42  ;;  %v3002_v51 = vadd.f32 %v4293_v56, %v3001_v14 }
 0x1ff   : > { %v3043_v28 = vmul.f32 %v4295_v36, %v4295_v36 }
 0x200   : > { %v4059_v46 = vpop.f32.mrb[20].mxu1  ;;  %v3003_v9 = vadd.f32 %v4296_v26, %v3002_v51  ;;  %v3042_v6 = vmul.f32 %v4296_v26, %v4296_v26  ;;  %v3072_v58 = vadd.f32 %v3071_v52, %v3041_v50  ;;  %v4259_v59 = vpop.f32.mrb[20].mxu0 }
 0x201   : > { %v1821_v3 = vpop.f32.mrb[21].mxu1  ;;  %v4297_v7 = vadd.f32 %v4259_v59, %v4059_v46  ;;  %v2895_v8 = vpop.f32.mrb[21].mxu0 }
 0x202   : > { %v3073_v29 = vadd.f32 %v3072_v58, %v3042_v6  ;;  %v4298_v53 = vadd.f32 %v2895_v8, %v1821_v3  ;;  %v3004_v55 = vadd.f32 %v4295_v36, %v3003_v9 }
 0x203   : > { %v3045_v37 = vmul.f32 %v4297_v7, %v4297_v7 }
 0x204   : > { %v4062_v23 = vpop.f32.mrb[22].mxu1  ;;  %v3005_v30 = vadd.f32 %v4298_v53, %v3004_v55  ;;  %v3044_v39 = vmul.f32 %v4298_v53, %v4298_v53  ;;  %v3074_v10 = vadd.f32 %v3073_v29, %v3043_v28  ;;  %v4262_v19 = vpop.f32.mrb[22].mxu0 }
 0x205   : > { %v1831_v62 = vpop.f32.mrb[23].mxu1  ;;  %v4299_v40 = vadd.f32 %v4262_v19, %v4062_v23  ;;  %v2905_v54 = vpop.f32.mrb[23].mxu0 }
 0x206   : > { %v3075_v13 = vadd.f32 %v3074_v10, %v3044_v39  ;;  %v4300_v48 = vadd.f32 %v2905_v54, %v1831_v62  ;;  %v3006_v41 = vadd.f32 %v4297_v7, %v3005_v30 }
 0x207   : > { %v3047_v63 = vmul.f32 %v4299_v40, %v4299_v40 }
 0x208   : > { %v4065_v17 = vpop.f32.mrb[24].mxu1  ;;  %v3007_v61 = vadd.f32 %v4300_v48, %v3006_v41  ;;  %v3046_v24 = vmul.f32 %v4300_v48, %v4300_v48  ;;  %v3076_v21 = vadd.f32 %v3075_v13, %v3045_v37  ;;  %v4265_v45 = vpop.f32.mrb[24].mxu0 }
 0x209   : > { %v1841_v11 = vpop.f32.mrb[25].mxu1  ;;  %v4301_v35 = vadd.f32 %v4265_v45, %v4065_v17  ;;  %v2915_v47 = vpop.f32.mrb[25].mxu0 }
 0x20a   : > { %v3077_v22 = vadd.f32 %v3076_v21, %v3046_v24  ;;  %v4302_v38 = vadd.f32 %v2915_v47, %v1841_v11  ;;  %v3008_v33 = vadd.f32 %v4299_v40, %v3007_v61 }
 0x20b   : > { %v3049_v44 = vmul.f32 %v4301_v35, %v4301_v35 }
 0x20c   : > { %v4068_v12 = vpop.f32.mrb[26].mxu1  ;;  %v3009_v16 = vadd.f32 %v4302_v38, %v3008_v33  ;;  %v3048_v60 = vmul.f32 %v4302_v38, %v4302_v38  ;;  %v3078_v57 = vadd.f32 %v3077_v22, %v3047_v63  ;;  %v4268_v4 = vpop.f32.mrb[26].mxu0 }
 0x20d   : > { %v1851_v5 = vpop.f32.mrb[27].mxu1  ;;  %v4303_v49 = vadd.f32 %v4268_v4, %v4068_v12  ;;  %v2925_v0 = vpop.f32.mrb[27].mxu0 }
 0x20e   : > { %v3079_v20 = vadd.f32 %v3078_v57, %v3048_v60  ;;  %v4304_v56 = vadd.f32 %v2925_v0, %v1851_v5  ;;  %v3010_v2 = vadd.f32 %v4301_v35, %v3009_v16 }
 0x20f   : > { %v3051_v32 = vmul.f32 %v4303_v49, %v4303_v49 }
 0x210   : > { %v4071_v34 = vpop.f32.mrb[28].mxu1  ;;  %v3011_v27 = vadd.f32 %v4304_v56, %v3010_v2  ;;  %v3050_v1 = vmul.f32 %v4304_v56, %v4304_v56  ;;  %v3080_v15 = vadd.f32 %v3079_v20, %v3049_v44  ;;  %v4271_v18 = vpop.f32.mrb[28].mxu0 }
 0x211   : > { %v1861_v14 = vpop.f32.mrb[29].mxu1  ;;  %v4305_v25 = vadd.f32 %v4271_v18, %v4071_v34  ;;  %v2935_v31 = vpop.f32.mrb[29].mxu0 }
 0x212   : > { %v3081_v42 = vadd.f32 %v3080_v15, %v3050_v1  ;;  %v4306_v36 = vadd.f32 %v2935_v31, %v1861_v14  ;;  %v3012_v43 = vadd.f32 %v4303_v49, %v3011_v27 }
 0x213   : > { %v3053_v59 = vmul.f32 %v4305_v25, %v4305_v25 }
 0x214   : > { %v4074_v50 = vpop.f32.mrb[30].mxu1  ;;  %v3013_v52 = vadd.f32 %v4306_v36, %v3012_v43  ;;  %v3052_v26 = vmul.f32 %v4306_v36, %v4306_v36  ;;  %v3082_v51 = vadd.f32 %v3081_v42, %v3051_v32  ;;  %v4274_v46 = vpop.f32.mrb[30].mxu0 }
 0x215   : > { %v1871_v9 = vpop.f32.mrb[31].mxu1  ;;  %v4307_v6 = vadd.f32 %v4274_v46, %v4074_v50  ;;  %v2945_v58 = vpop.f32.mrb[31].mxu0 }
 0x216   : > { %v3083_v3 = vadd.f32 %v3082_v51, %v3052_v26  ;;  %v4308_v7 = vadd.f32 %v2945_v58, %v1871_v9  ;;  %v3014_v8 = vadd.f32 %v4305_v25, %v3013_v52 }
 0x217   : > { %v3055_v55 = vmul.f32 %v4307_v6, %v4307_v6 }
 0x218   : > { %v3015_v28 = vadd.f32 %v4308_v7, %v3014_v8  ;;  %v3054_v29 = vmul.f32 %v4308_v7, %v4308_v7  ;;  %v3084_v53 = vadd.f32 %v3083_v3, %v3053_v59 }
 0x21a   : > { %v3016_v23 = vadd.f32 %v4307_v6, %v3015_v28  ;;  %v3085_v30 = vadd.f32 %v3084_v53, %v3054_v29 }
 0x21c   : > { %v3017_v39 = vrot.slane %v3016_v23, 4  ;;  %v3086_v10 = vadd.f32 %v3085_v30, %v3055_v55 }
 0x21e   : > { %v3018_v19 = vadd.f32 %v3017_v39, %v3016_v23  ;;  %v3087_v62 = vrot.slane %v3086_v10, 4 }
 0x220   : > { %v3019_v40 = vrot.slane %v3018_v19, 2  ;;  %v3088_v54 = vadd.f32 %v3087_v62, %v3086_v10 }
 0x222   : > { %v3020_v37 = vadd.f32 %v3019_v40, %v3018_v19  ;;  %v3089_v13 = vrot.slane %v3088_v54, 2 }
 0x224   : > { %v3021_v48 = vrot.slane %v3020_v37, 1  ;;  %v3090_v41 = vadd.f32 %v3089_v13, %v3088_v54 }
 0x226   : > { %v3022_v17 = vadd.f32 %v3021_v48, %v3020_v37  ;;  %v3091_v61 = vrot.slane %v3090_v41, 1 }
 0x228   : > { %3023 = vst [vmem:[%s182_s26] sm:$0x1] %v3022_v17  ;;  %v3092_v24 = vadd.f32 %v3091_v61, %v3090_v41 }
 0x229   : > { %4607 = shalt.err (!%p4604_p5)
}
 0x22a   : > { %s4608_s19 = scalar_lea.hbm %s5901_s5, 16  ;;  %s4612_s30 = scalar_lea.hbm %s5982_s2, 32 }
 0x22b   : > { %p4609_p6 = scmp.ne.s32.totalorder %s5901_s5, %s4608_s19  ;;  %p4613_p10 = scmp.lt.u32.totalorder %s5901_s5, %s5982_s2 }
 0x22c   : > { %p4614_p11 = scmp.lt.u32.totalorder %s4612_s30, %s4608_s19  ;;  %p4616_p13 = scmp.lt.u32.totalorder %s4608_s19, %s5901_s5 }
 0x22d   : > { %p4610_p7 = pnand %p4609_p6, %p4768_p4 }
 0x22e   : > { %p4615_p12 = por %p4614_p11, %p4613_p10 }
 0x22f   : > { %p4611_p9 = pneg %p4610_p7 }
 0x230   : > { %p4617_p0 = por %p4616_p13, %p4615_p12 }
 0x232   : > { %p4618_p1 = pnand %p4617_p0, %p4611_p9 }
 0x234   : > { %4621 = shalt.err (!%p4618_p1)
}
 0x235   : > { %4534 = dma.vmem_to_hbm [thread:$0]  (%p4768_p4), %s5903_s27, 16, %s5901_s5, %s3095_s8   ;;  %3093 = vst [vmem:[%s188_s28] sm:$0x1] %v3092_v24 }
 0x236   : > { %s3099_s6 = scalar_lea.sflag [#allocation5], %s5891_s21  ;;  %s4622_s9 = scalar_lea.vmem %s5910_s29, 16 }
 0x237   : > { %p4623_p2 = scmp.ne.s32.totalorder %s5910_s29, %s4622_s9  ;;  %s4707_s10 = smov [#allocation4]  }
 0x238   : > { %s4626_s11 = sshll.u32 %s4707_s10, 4  ;;  %s4627_s11 = int_to_ptr.vmem [resolvable:$false] %s4626_s11 }
 0x239   : > { %p4624_p3 = pnand %p4623_p2, %p4768_p4  ;;  %s4628_s18 = scalar_lea.vmem %s4627_s11, 32 }
 0x23a   : > { %p4629_p6 = scmp.lt.s32.totalorder %s5910_s29, %s4627_s11  ;;  %p4630_p7 = scmp.lt.s32.totalorder %s4628_s18, %s4622_s9 }
 0x23b   : > { %p4625_p5 = pneg %p4624_p3 }
 0x23c   : > { %p4631_p9 = por %p4630_p7, %p4629_p6 }
 0x23e   : > { %p4632_p10 = pnand %p4631_p9, %p4625_p5 }
 0x240   : > { %4635 = shalt.err (!%p4632_p10)
}
 0x241   : > { %s4636_s21 = scalar_lea.hbm %s5908_s7, 16  ;;  %s4640_s5 = scalar_lea.hbm %s5983_s3, 32 }
 0x242   : > { %p4637_p11 = scmp.ne.s32.totalorder %s5908_s7, %s4636_s21  ;;  %p4641_p0 = scmp.lt.u32.totalorder %s5908_s7, %s5983_s3 }
 0x243   : > { %p4642_p1 = scmp.lt.u32.totalorder %s4640_s5, %s4636_s21  ;;  %p4644_p3 = scmp.lt.u32.totalorder %s4636_s21, %s5908_s7 }
 0x244   : > { %p4638_p12 = pnand %p4637_p11, %p4768_p4 }
 0x245   : > { %p4643_p2 = por %p4642_p1, %p4641_p0 }
 0x246   : > { %p4639_p13 = pneg %p4638_p12 }
 0x247   : > { %p4645_p5 = por %p4644_p3, %p4643_p2 }
 0x249   : > { %p4646_p6 = pnand %p4645_p5, %p4639_p13 }
 0x24b   : > { %4649 = shalt.err (!%p4646_p6)
}
 0x24c   : > { %4535 = dma.vmem_to_hbm [thread:$0]  (%p4768_p4), %s5910_s29, 16, %s5908_s7, %s3099_s6  }
 0x24d PF: > { %p4545_p7 = scmp.ge.s32.totalorder %s4704_s17, 2  ;;  %s3138_s23 = sand.u32 1, %s4684_s12  }
 0x24e   : > { %s3139_s26 = scalar_lea.sflag [#allocation3], %s3138_s23 }
 0x24f   : > { %p4539_p9 = pnand %p4545_p7, %p4775_p8 }
 0x251   : > { %4675 = dma.done.wait (!%p4539_p9), %s3139_s26, 16  }
 0x252   : > { %4677 = vsyncadd (!%p4539_p9), %s3139_s26, 4294967280  ;;  %s3147_s30 = scalar_lea.sflag [#allocation5], %s3138_s23 }
 0x253   : > { %4679 = dma.done.wait (!%p4539_p9), %s3147_s30, 16  }
 0x254   : > { %4681 = vsyncadd (!%p4539_p9), %s3147_s30, 4294967280  ;;  %s20_s17 = sadd.s32 1, %s4704_s17   ;;  %s6164_s12 = smov %s4688_s13 }
 0x255   : > { %p17_p10 = scmp.ge.s32.totalorder %s20_s17, 4   ;;  %s6165_s13 = smov %s4692_s14 }
 0x256   : > { %s6166_s14 = smov %s4781_s25  ;;  %s6167_s15 = smov %s4700_s16 }
 0x257   : > { %s6168_s16 = smov %s6170_s20  ;;  %19 = sbr.rel (!%p17_p10) target bundleno = 6 (0x6), region = 81 }
 0x25e   :  { %3151 = vsyncpa [#allocation3], 1 }
 0x25f   :  { %3153 = vsyncpa [#allocation3 + $0x1], 1 }
 0x260   :  { %3154 = vsyncpa [#allocation5], 1 }
 0x261   :  { %3156 = vsyncpa [#allocation5 + $0x1], 1 }

</bundles_post_ra>
